<compile_context>
chip_gen: v6e
topology: v6e:2x2x1
jax: 0.10.0
libtpu: 0.0.40
codegen_flags: <defaults>
</compile_context>

<pallas_src>
import functools

import jax
import jax.numpy as jnp
from jax.experimental import pallas as pl
from jax.experimental.pallas import tpu as pltpu


# ---------------------------------------------------------------------------
# Device-dependent configuration
# ---------------------------------------------------------------------------

def _device_kind() -> str:
    try:
        return jax.devices()[0].device_kind.lower()
    except Exception:
        return ""


def _elementwise_dtype(kind: str):
    # bf16 elementwise only where VPU/EUP handle it natively (v6e / v7x);
    # keep f32 on v5e and older (and when the generation is unknown).
    if any(tag in kind for tag in ("v6", "v7", "7x")):
        return jnp.bfloat16
    return jnp.float32


def _vmem_limit_bytes(kind: str) -> int:
    try:
        cap = int(pltpu.get_tpu_info().vmem_capacity_bytes)
    except Exception:
        cap = (64 if ("v7" in kind or "7x" in kind) else 128) * 1024 * 1024
    # Leave headroom for compiler-internal scratch; never request the full chip.
    return min(int(cap * 0.85), 110 * 1024 * 1024)


# ---------------------------------------------------------------------------
# Kernel
# ---------------------------------------------------------------------------

def _gcfn_kernel(t0_ref, x_ref, halo_ref,
                 w1v_ref, b1v_ref, dwv_ref, dbv_ref,
                 w1g_ref, b1g_ref, dwg_ref, dbg_ref,
                 w2_ref, b2_ref, out_ref,
                 *, T, tile_m, ew_dtype):
    tm = tile_m
    x = x_ref[...]                               # (TM, C) f32 (residual path)
    xb = x.astype(jnp.bfloat16)                  # MXU LHS
    hb = halo_ref[...].astype(jnp.bfloat16)      # (8, C); rows 0/1 = start-1 / start+TM

    # Sequence position of each row (for Conv1d zero-padding masks at batch
    # seams).  t0 = (tile_start % T) comes from the scalar-prefetch table; the
    # wrap-around uses a statically bounded conditional subtract (no vector mod).
    row = jax.lax.broadcasted_iota(jnp.int32, (tm, 1), 0)
    t = t0_ref[pl.program_id(0)] + row
    for _ in range((T + tm - 2) // T):
        t = jnp.where(t >= T, t - T, t)
    one = jnp.asarray(1.0, ew_dtype)
    zero = jnp.asarray(0.0, ew_dtype)
    mprev = jnp.where(t != 0, one, zero)         # kill t-1 tap at t == 0
    mnext = jnp.where(t != T - 1, one, zero)     # kill t+1 tap at t == T-1
    is_first_row = row == 0
    is_last_row = row == tm - 1

    def half(w1_ref, b1_ref, dw_ref, db_ref):
        # pconv1 half: Linear(C -> 3C) on the aligned (TM, C) tile; the halo
        # rows get their own tiny sublane-aligned (8, C) @ (C, 3C) projection.
        h = jnp.dot(xb, w1_ref[...], preferred_element_type=jnp.float32) + b1_ref[...]
        hh = jnp.dot(hb, w1_ref[...], preferred_element_type=jnp.float32) + b1_ref[...]
        # depthwise Conv1d(k=3, pad=1) along rows: t-1 / t+1 taps via XLU roll
        # (positive shifts only); rows 0 / TM-1 patched with halo projections;
        # masks implement the zero padding at batch seams.
        h_prev = jnp.where(is_first_row, hh[0:1, :],
                           pltpu.roll(h, shift=1, axis=0)).astype(ew_dtype)
        h_next = jnp.where(is_last_row, hh[1:2, :],
                           pltpu.roll(h, shift=tm - 1, axis=0)).astype(ew_dtype)
        dw = dw_ref[...].astype(ew_dtype)
        return (h_prev * dw[0:1, :] * mprev
                + h.astype(ew_dtype) * dw[1:2, :]
                + h_next * dw[2:3, :] * mnext
                + db_ref[...].astype(ew_dtype))

    # Gate first so its temporaries die before the value half is materialised
    # (keeps live temporaries low -- mainly helps v5e's f32 path).
    gate = jax.nn.sigmoid(half(w1g_ref, b1g_ref, dwg_ref, dbg_ref))
    g = (half(w1v_ref, b1v_ref, dwv_ref, dbv_ref) * gate).astype(jnp.bfloat16)

    # pconv2 (Dropout = identity); LayerScale gamma is folded into w2 / b2.
    y = jnp.dot(g, w2_ref[...], preferred_element_type=jnp.float32) + b2_ref[...]
    out_ref[...] = (x + y).astype(out_ref.dtype)      # residual add in f32


# ---------------------------------------------------------------------------
# One-time parameter preparation (hoisted out of the per-call wrapper)
# ---------------------------------------------------------------------------

def prepare_gcfn_params(w1, b1, dw, db, w2, b2, gamma):
    """Splits the fused 6C projection into lane-aligned value/gate halves, casts
    MXU weights to bf16, and folds LayerScale gamma into the second projection:
    x + gamma*(g@w2 + b2) == x + g@(w2*gamma) + b2*gamma."""
    C = w1.shape[0]
    H = 3 * C
    f32 = jnp.float32
    w1 = w1.astype(f32); b1 = b1.astype(f32)
    dw = dw.astype(f32); db = db.astype(f32)
    g32 = gamma.astype(f32)
    return dict(
        C=C, H=H,
        w1v=w1[:, :H].astype(jnp.bfloat16),
        w1g=w1[:, H:].astype(jnp.bfloat16),
        b1v=b1[:H].reshape(1, H), b1g=b1[H:].reshape(1, H),
        dwv=dw[:, :H], dwg=dw[:, H:],
        dbv=db[:H].reshape(1, H), dbg=db[H:].reshape(1, H),
        w2=(w2.astype(f32) * g32[None, :]).astype(jnp.bfloat16),
        b2=(b2.astype(f32) * g32).reshape(1, C),
    )


# ---------------------------------------------------------------------------
# Wrapper
# ---------------------------------------------------------------------------

def gcfn_pallas(x, params, *, tile_m=512):
    """GCFN forward.  x: (B, T, C) float32; params from prepare_gcfn_params."""
    B, T, C = x.shape
    assert C == params["C"]
    assert tile_m % 8 == 0
    H = params["H"]

    kind = _device_kind()
    ew_dtype = _elementwise_dtype(kind)
    vmem_limit = _vmem_limit_bytes(kind)

    M = B * T
    n_tiles = pl.cdiv(M, tile_m)
    Mp = n_tiles * tile_m

    # Flatten (B, T) -> rows.  Fast path: no pad copy / output slice when
    # B*T is already a multiple of tile_m.
    xf = x.reshape(M, C)
    if Mp != M:
        xf = jnp.pad(xf, ((0, Mp - M), (0, 0)))

    # Per-tile 1-row conv halo (rows start-1, start+tile_m), gathered from a
    # (n_tiles, tile_m, C) view -- no padded full-activation copy.  Padded to
    # 8 sublane rows so the in-kernel halo projection is tile-aligned.
    xt = xf.reshape(n_tiles, tile_m, C)
    zrow = jnp.zeros((1, C), xf.dtype)
    prev_rows = jnp.concatenate([zrow, xt[:-1, -1, :]], axis=0)      # (n_tiles, C)
    next_rows = jnp.concatenate([xt[1:, 0, :], zrow], axis=0)        # (n_tiles, C)
    halo = jnp.stack([prev_rows, next_rows], axis=1)                 # (n_tiles, 2, C)
    halo = jnp.pad(halo, ((0, 0), (0, 6), (0, 0)))                   # (n_tiles, 8, C)

    # Scalar-prefetch table: sequence position of each tile's first row.
    tile_t0 = (jnp.arange(n_tiles, dtype=jnp.int32) * tile_m) % T

    row_spec = pl.BlockSpec((tile_m, C), lambda i, t0: (i, 0))
    halo_spec = pl.BlockSpec((pl.Squeezed(), 8, C), lambda i, t0: (i, 0, 0))

    def const_spec(shape):
        zeros = (0,) * len(shape)
        # Constant index map + single buffer: never re-fetched, half the VMEM.
        return pl.BlockSpec(shape, lambda i, t0: zeros, pipeline_mode=pl.Buffered(1))

    kernel = functools.partial(_gcfn_kernel, T=T, tile_m=tile_m, ew_dtype=ew_dtype)

    out = pl.pallas_call(
        kernel,
        out_shape=jax.ShapeDtypeStruct((Mp, C), x.dtype),
        grid_spec=pltpu.PrefetchScalarGridSpec(
            num_scalar_prefetch=1,
            grid=(n_tiles,),
            in_specs=[
                row_spec,                                    # x rows (TM, C)
                halo_spec,                                   # conv halo (8, C)
                const_spec((C, H)), const_spec((1, H)),      # w1v, b1v
                const_spec((3, H)), const_spec((1, H)),      # dwv, dbv
                const_spec((C, H)), const_spec((1, H)),      # w1g, b1g
                const_spec((3, H)), const_spec((1, H)),      # dwg, dbg
                const_spec((H, C)), const_spec((1, C)),      # w2*gamma, b2*gamma
            ],
            out_specs=row_spec,
        ),
        compiler_params=pltpu.CompilerParams(
            dimension_semantics=("parallel",),               # independent row tiles
            vmem_limit_bytes=vmem_limit),
    )(tile_t0, xf, halo,
      params["w1v"], params["b1v"], params["dwv"], params["dbv"],
      params["w1g"], params["b1g"], params["dwg"], params["dbg"],
      params["w2"], params["b2"])

    if Mp != M:
        out = out[:M]
    return out.reshape(B, T, C)


# ---------------------------------------------------------------------------
# Reference + test
# ---------------------------------------------------------------------------

def gcfn_reference(x, w1, b1, dw, db, w2, b2, gamma):
    """Plain-JAX (f32) reference mirroring the PyTorch GCFN forward."""
    h = x @ w1 + b1                                          # (B, T, 6C)
    hp = jnp.pad(h, ((0, 0), (1, 1), (0, 0)))
    conv = hp[:, :-2] * dw[0] + hp[:, 1:-1] * dw[1] + hp[:, 2:] * dw[2] + db
    half = conv.shape[-1] // 2
    g = conv[..., :half] * jax.nn.sigmoid(conv[..., half:])
    y = g @ w2 + b2
    return x + gamma * y


def init_params(key, C):
    H = 3 * C
    H2 = 2 * H
    ks = jax.random.split(key, 7)
    w1 = jax.random.normal(ks[0], (C, H2), jnp.float32) * 0.1     # Linear(C, 6C)
    b1 = jax.random.normal(ks[1], (H2,), jnp.float32) * 0.1
    dw = jax.random.normal(ks[2], (3, H2), jnp.float32) * 0.1     # depthwise taps
    db = jax.random.normal(ks[3], (H2,), jnp.float32) * 0.1
    w2 = jax.random.normal(ks[4], (H, C), jnp.float32) * 0.1      # Linear(3C, C)
    b2 = jax.random.normal(ks[5], (C,), jnp.float32) * 0.1
    # LayerScale gamma (module init 1e-5); non-trivial values so the branch is
    # exercised by the correctness check.
    gamma = jax.random.normal(ks[6], (C,), jnp.float32) * 0.1
    return w1, b1, dw, db, w2, b2, gamma


if __name__ == "__main__":
    key = jax.random.PRNGKey(0)
    kx, kp, kx2 = jax.random.split(key, 3)

    C = 64
    raw = init_params(kp, C)
    params = prepare_gcfn_params(*raw)

    # Config 1: exact tiling (fast path, no padding).  Batch seam falls
    # mid-tile and tile seams fall mid-batch -> exercises masks + halo path.
    B, T = 2, 192
    x = jax.random.normal(kx, (B, T, C), jnp.float32)
    out = jax.block_until_ready(gcfn_pallas(x, params, tile_m=128))
    ref = gcfn_reference(x, *raw)
    assert out.shape == (B, T, C)
    err = float(jnp.max(jnp.abs(out - ref)))
    assert jnp.allclose(out, ref, atol=2e-2, rtol=2e-2), f"mismatch (exact tiling): {err}"

    # Config 2: ragged row count -> padded slow path.
    B2, T2 = 2, 100
    x2 = jax.random.normal(kx2, (B2, T2, C), jnp.float32)
    out2 = jax.block_until_ready(gcfn_pallas(x2, params, tile_m=128))
    ref2 = gcfn_reference(x2, *raw)
    assert out2.shape == (B2, T2, C)
    err2 = float(jnp.max(jnp.abs(out2 - ref2)))
    assert jnp.allclose(out2, ref2, atol=2e-2, rtol=2e-2), f"mismatch (padded tiling): {err2}"

    print("KERNEL_OK")
</pallas_src>

<mosaic_0001>
module attributes {stable_mosaic.version = 11 : i64} {
  func.func @_gcfn_kernel(%arg0: i32, %arg1: memref<3xi32, #tpu.memory_space<smem>>, %arg2: memref<128x64xf32, #tpu.memory_space<vmem>>, %arg3: memref<1x8x64xf32, #tpu.memory_space<vmem>>, %arg4: memref<64x192xbf16, #tpu.memory_space<vmem>>, %arg5: memref<1x192xf32, #tpu.memory_space<vmem>>, %arg6: memref<3x192xf32, #tpu.memory_space<vmem>>, %arg7: memref<1x192xf32, #tpu.memory_space<vmem>>, %arg8: memref<64x192xbf16, #tpu.memory_space<vmem>>, %arg9: memref<1x192xf32, #tpu.memory_space<vmem>>, %arg10: memref<3x192xf32, #tpu.memory_space<vmem>>, %arg11: memref<1x192xf32, #tpu.memory_space<vmem>>, %arg12: memref<192x64xbf16, #tpu.memory_space<vmem>>, %arg13: memref<1x64xf32, #tpu.memory_space<vmem>>, %arg14: memref<128x64xf32, #tpu.memory_space<vmem>>) attributes {dimension_semantics = [#tpu.dimension_semantics<parallel>], iteration_bounds = array<i64: 3>, scalar_prefetch = 1 : i64, scratch_operands = 0 : i64, tpu.core_type = #tpu.core_type<tc>, window_params = [{transform_indices = @transform_0, window_bounds = array<i64: 128, 64>}, {transform_indices = @transform_1, window_bounds = array<i64: 1, 8, 64>}, {pipeline_mode = #tpu.pipeline_mode<synchronous>, transform_indices = @transform_2, window_bounds = array<i64: 64, 192>}, {pipeline_mode = #tpu.pipeline_mode<synchronous>, transform_indices = @transform_3, window_bounds = array<i64: 1, 192>}, {pipeline_mode = #tpu.pipeline_mode<synchronous>, transform_indices = @transform_4, window_bounds = array<i64: 3, 192>}, {pipeline_mode = #tpu.pipeline_mode<synchronous>, transform_indices = @transform_5, window_bounds = array<i64: 1, 192>}, {pipeline_mode = #tpu.pipeline_mode<synchronous>, transform_indices = @transform_6, window_bounds = array<i64: 64, 192>}, {pipeline_mode = #tpu.pipeline_mode<synchronous>, transform_indices = @transform_7, window_bounds = array<i64: 1, 192>}, {pipeline_mode = #tpu.pipeline_mode<synchronous>, transform_indices = @transform_8, window_bounds = array<i64: 3, 192>}, {pipeline_mode = #tpu.pipeline_mode<synchronous>, transform_indices = @transform_9, window_bounds = array<i64: 1, 192>}, {pipeline_mode = #tpu.pipeline_mode<synchronous>, transform_indices = @transform_10, window_bounds = array<i64: 192, 64>}, {pipeline_mode = #tpu.pipeline_mode<synchronous>, transform_indices = @transform_11, window_bounds = array<i64: 1, 64>}, {transform_indices = @transform_12, window_bounds = array<i64: 128, 64>}]} {
    %c0 = arith.constant 0 : index
    %c0_0 = arith.constant 0 : index
    %0 = vector.load %arg2[%c0, %c0_0] : memref<128x64xf32, #tpu.memory_space<vmem>>, vector<128x64xf32>
    %1 = arith.truncf %0 : vector<128x64xf32> to vector<128x64xbf16>
    %c0_1 = arith.constant 0 : index
    %c0_2 = arith.constant 0 : index
    %c0_3 = arith.constant 0 : index
    %2 = vector.load %arg3[%c0_1, %c0_2, %c0_3] : memref<1x8x64xf32, #tpu.memory_space<vmem>>, vector<1x8x64xf32>
    %3 = vector.shape_cast %2 : vector<1x8x64xf32> to vector<8x64xf32>
    %4 = arith.truncf %3 : vector<8x64xf32> to vector<8x64xbf16>
    %5 = tpu.iota {dimensions = array<i32: 0>} : vector<128x1xi32>
    %6 = arith.index_cast %arg0 : i32 to index
    %7 = memref.load %arg1[%6] : memref<3xi32, #tpu.memory_space<smem>>
    %8 = vector.broadcast %7 : i32 to vector<128x1xi32>
    %9 = arith.addi %8, %5 : vector<128x1xi32>
    %c192_i32 = arith.constant 192 : i32
    %10 = vector.broadcast %c192_i32 : i32 to vector<128x1xi32>
    %11 = arith.cmpi sge, %9, %10 : vector<128x1xi32>
    %c192_i32_4 = arith.constant 192 : i32
    %12 = vector.broadcast %c192_i32_4 : i32 to vector<128x1xi32>
    %13 = arith.subi %9, %12 : vector<128x1xi32>
    %14 = arith.select %11, %13, %9 : vector<128x1xi1>, vector<128x1xi32>
    %c0_i32 = arith.constant 0 : i32
    %15 = vector.broadcast %c0_i32 : i32 to vector<128x1xi32>
    %16 = arith.cmpi ne, %14, %15 : vector<128x1xi32>
    %cst = arith.constant 1.000000e+00 : f32
    %cst_5 = arith.constant 0.000000e+00 : f32
    %17 = vector.broadcast %cst : f32 to vector<128x1xf32>
    %18 = vector.broadcast %cst_5 : f32 to vector<128x1xf32>
    %19 = arith.select %16, %17, %18 : vector<128x1xi1>, vector<128x1xf32>
    %c191_i32 = arith.constant 191 : i32
    %20 = vector.broadcast %c191_i32 : i32 to vector<128x1xi32>
    %21 = arith.cmpi ne, %14, %20 : vector<128x1xi32>
    %cst_6 = arith.constant 1.000000e+00 : f32
    %cst_7 = arith.constant 0.000000e+00 : f32
    %22 = vector.broadcast %cst_6 : f32 to vector<128x1xf32>
    %23 = vector.broadcast %cst_7 : f32 to vector<128x1xf32>
    %24 = arith.select %21, %22, %23 : vector<128x1xi1>, vector<128x1xf32>
    %c0_i32_8 = arith.constant 0 : i32
    %25 = vector.broadcast %c0_i32_8 : i32 to vector<128x1xi32>
    %26 = arith.cmpi eq, %5, %25 : vector<128x1xi32>
    %c127_i32 = arith.constant 127 : i32
    %27 = vector.broadcast %c127_i32 : i32 to vector<128x1xi32>
    %28 = arith.cmpi eq, %5, %27 : vector<128x1xi32>
    %c0_9 = arith.constant 0 : index
    %c0_10 = arith.constant 0 : index
    %29 = vector.load %arg8[%c0_9, %c0_10] : memref<64x192xbf16, #tpu.memory_space<vmem>>, vector<64x192xbf16>
    %cst_11 = arith.constant dense<0.000000e+00> : vector<128x192xf32>
    %30 = tpu.matmul %1, %29, %cst_11 {dimension_numbers = #tpu.dot_dimension_numbers<[1], [0], [0], [1], [0, 0, 1, 1], [], []>} : vector<128x64xbf16>, vector<64x192xbf16>, vector<128x192xf32> -> vector<128x192xf32>
    %c0_12 = arith.constant 0 : index
    %c0_13 = arith.constant 0 : index
    %31 = vector.load %arg9[%c0_12, %c0_13] : memref<1x192xf32, #tpu.memory_space<vmem>>, vector<1x192xf32>
    %32 = vector.broadcast %31 : vector<1x192xf32> to vector<128x192xf32>
    %33 = arith.addf %30, %32 : vector<128x192xf32>
    %c0_14 = arith.constant 0 : index
    %c0_15 = arith.constant 0 : index
    %34 = vector.load %arg8[%c0_14, %c0_15] : memref<64x192xbf16, #tpu.memory_space<vmem>>, vector<64x192xbf16>
    %cst_16 = arith.constant dense<0.000000e+00> : vector<8x192xf32>
    %35 = tpu.matmul %4, %34, %cst_16 {dimension_numbers = #tpu.dot_dimension_numbers<[1], [0], [0], [1], [0, 0, 1, 1], [], []>} : vector<8x64xbf16>, vector<64x192xbf16>, vector<8x192xf32> -> vector<8x192xf32>
    %c0_17 = arith.constant 0 : index
    %c0_18 = arith.constant 0 : index
    %36 = vector.load %arg9[%c0_17, %c0_18] : memref<1x192xf32, #tpu.memory_space<vmem>>, vector<1x192xf32>
    %37 = vector.broadcast %36 : vector<1x192xf32> to vector<8x192xf32>
    %38 = arith.addf %35, %37 : vector<8x192xf32>
    %39 = vector.extract_strided_slice %38 {offsets = [0, 0], sizes = [1, 192], strides = [1, 1]} : vector<8x192xf32> to vector<1x192xf32>
    %c1_i32 = arith.constant 1 : i32
    %40 = tpu.dynamic_rotate %33 by %c1_i32 dim 0 : vector<128x192xf32>, i32 -> vector<128x192xf32>
    %41 = vector.shape_cast %26 : vector<128x1xi1> to vector<128x1xi1>
    %42 = vector.broadcast %41 : vector<128x1xi1> to vector<128x192xi1>
    %43 = vector.shape_cast %39 : vector<1x192xf32> to vector<1x192xf32>
    %44 = vector.broadcast %43 : vector<1x192xf32> to vector<128x192xf32>
    %45 = arith.select %42, %44, %40 : vector<128x192xi1>, vector<128x192xf32>
    %46 = vector.extract_strided_slice %38 {offsets = [1, 0], sizes = [1, 192], strides = [1, 1]} : vector<8x192xf32> to vector<1x192xf32>
    %c127_i32_19 = arith.constant 127 : i32
    %47 = tpu.dynamic_rotate %33 by %c127_i32_19 dim 0 : vector<128x192xf32>, i32 -> vector<128x192xf32>
    %48 = vector.shape_cast %28 : vector<128x1xi1> to vector<128x1xi1>
    %49 = vector.broadcast %48 : vector<128x1xi1> to vector<128x192xi1>
    %50 = vector.shape_cast %46 : vector<1x192xf32> to vector<1x192xf32>
    %51 = vector.broadcast %50 : vector<1x192xf32> to vector<128x192xf32>
    %52 = arith.select %49, %51, %47 : vector<128x192xi1>, vector<128x192xf32>
    %c0_20 = arith.constant 0 : index
    %c0_21 = arith.constant 0 : index
    %53 = vector.load %arg10[%c0_20, %c0_21] : memref<3x192xf32, #tpu.memory_space<vmem>>, vector<3x192xf32>
    %54 = vector.extract_strided_slice %53 {offsets = [0, 0], sizes = [1, 192], strides = [1, 1]} : vector<3x192xf32> to vector<1x192xf32>
    %55 = vector.broadcast %54 : vector<1x192xf32> to vector<128x192xf32>
    %56 = arith.mulf %45, %55 : vector<128x192xf32>
    %57 = vector.broadcast %19 : vector<128x1xf32> to vector<128x192xf32>
    %58 = arith.mulf %56, %57 : vector<128x192xf32>
    %59 = vector.extract_strided_slice %53 {offsets = [1, 0], sizes = [1, 192], strides = [1, 1]} : vector<3x192xf32> to vector<1x192xf32>
    %60 = vector.broadcast %59 : vector<1x192xf32> to vector<128x192xf32>
    %61 = arith.mulf %33, %60 : vector<128x192xf32>
    %62 = arith.addf %58, %61 : vector<128x192xf32>
    %63 = vector.extract_strided_slice %53 {offsets = [2, 0], sizes = [1, 192], strides = [1, 1]} : vector<3x192xf32> to vector<1x192xf32>
    %64 = vector.broadcast %63 : vector<1x192xf32> to vector<128x192xf32>
    %65 = arith.mulf %52, %64 : vector<128x192xf32>
    %66 = vector.broadcast %24 : vector<128x1xf32> to vector<128x192xf32>
    %67 = arith.mulf %65, %66 : vector<128x192xf32>
    %68 = arith.addf %62, %67 : vector<128x192xf32>
    %c0_22 = arith.constant 0 : index
    %c0_23 = arith.constant 0 : index
    %69 = vector.load %arg11[%c0_22, %c0_23] : memref<1x192xf32, #tpu.memory_space<vmem>>, vector<1x192xf32>
    %70 = vector.broadcast %69 : vector<1x192xf32> to vector<128x192xf32>
    %71 = arith.addf %68, %70 : vector<128x192xf32>
    %72 = arith.negf %71 : vector<128x192xf32>
    %73 = math.exp %72 : vector<128x192xf32>
    %cst_24 = arith.constant 1.000000e+00 : f32
    %74 = vector.broadcast %cst_24 : f32 to vector<128x192xf32>
    %75 = arith.addf %74, %73 : vector<128x192xf32>
    %76 = arith.divf %74, %75 : vector<128x192xf32>
    %c0_25 = arith.constant 0 : index
    %c0_26 = arith.constant 0 : index
    %77 = vector.load %arg4[%c0_25, %c0_26] : memref<64x192xbf16, #tpu.memory_space<vmem>>, vector<64x192xbf16>
    %cst_27 = arith.constant dense<0.000000e+00> : vector<128x192xf32>
    %78 = tpu.matmul %1, %77, %cst_27 {dimension_numbers = #tpu.dot_dimension_numbers<[1], [0], [0], [1], [0, 0, 1, 1], [], []>} : vector<128x64xbf16>, vector<64x192xbf16>, vector<128x192xf32> -> vector<128x192xf32>
    %c0_28 = arith.constant 0 : index
    %c0_29 = arith.constant 0 : index
    %79 = vector.load %arg5[%c0_28, %c0_29] : memref<1x192xf32, #tpu.memory_space<vmem>>, vector<1x192xf32>
    %80 = vector.broadcast %79 : vector<1x192xf32> to vector<128x192xf32>
    %81 = arith.addf %78, %80 : vector<128x192xf32>
    %c0_30 = arith.constant 0 : index
    %c0_31 = arith.constant 0 : index
    %82 = vector.load %arg4[%c0_30, %c0_31] : memref<64x192xbf16, #tpu.memory_space<vmem>>, vector<64x192xbf16>
    %cst_32 = arith.constant dense<0.000000e+00> : vector<8x192xf32>
    %83 = tpu.matmul %4, %82, %cst_32 {dimension_numbers = #tpu.dot_dimension_numbers<[1], [0], [0], [1], [0, 0, 1, 1], [], []>} : vector<8x64xbf16>, vector<64x192xbf16>, vector<8x192xf32> -> vector<8x192xf32>
    %c0_33 = arith.constant 0 : index
    %c0_34 = arith.constant 0 : index
    %84 = vector.load %arg5[%c0_33, %c0_34] : memref<1x192xf32, #tpu.memory_space<vmem>>, vector<1x192xf32>
    %85 = vector.broadcast %84 : vector<1x192xf32> to vector<8x192xf32>
    %86 = arith.addf %83, %85 : vector<8x192xf32>
    %87 = vector.extract_strided_slice %86 {offsets = [0, 0], sizes = [1, 192], strides = [1, 1]} : vector<8x192xf32> to vector<1x192xf32>
    %c1_i32_35 = arith.constant 1 : i32
    %88 = tpu.dynamic_rotate %81 by %c1_i32_35 dim 0 : vector<128x192xf32>, i32 -> vector<128x192xf32>
    %89 = vector.shape_cast %26 : vector<128x1xi1> to vector<128x1xi1>
    %90 = vector.broadcast %89 : vector<128x1xi1> to vector<128x192xi1>
    %91 = vector.shape_cast %87 : vector<1x192xf32> to vector<1x192xf32>
    %92 = vector.broadcast %91 : vector<1x192xf32> to vector<128x192xf32>
    %93 = arith.select %90, %92, %88 : vector<128x192xi1>, vector<128x192xf32>
    %94 = vector.extract_strided_slice %86 {offsets = [1, 0], sizes = [1, 192], strides = [1, 1]} : vector<8x192xf32> to vector<1x192xf32>
    %c127_i32_36 = arith.constant 127 : i32
    %95 = tpu.dynamic_rotate %81 by %c127_i32_36 dim 0 : vector<128x192xf32>, i32 -> vector<128x192xf32>
    %96 = vector.shape_cast %28 : vector<128x1xi1> to vector<128x1xi1>
    %97 = vector.broadcast %96 : vector<128x1xi1> to vector<128x192xi1>
    %98 = vector.shape_cast %94 : vector<1x192xf32> to vector<1x192xf32>
    %99 = vector.broadcast %98 : vector<1x192xf32> to vector<128x192xf32>
    %100 = arith.select %97, %99, %95 : vector<128x192xi1>, vector<128x192xf32>
    %c0_37 = arith.constant 0 : index
    %c0_38 = arith.constant 0 : index
    %101 = vector.load %arg6[%c0_37, %c0_38] : memref<3x192xf32, #tpu.memory_space<vmem>>, vector<3x192xf32>
    %102 = vector.extract_strided_slice %101 {offsets = [0, 0], sizes = [1, 192], strides = [1, 1]} : vector<3x192xf32> to vector<1x192xf32>
    %103 = vector.broadcast %102 : vector<1x192xf32> to vector<128x192xf32>
    %104 = arith.mulf %93, %103 : vector<128x192xf32>
    %105 = vector.broadcast %19 : vector<128x1xf32> to vector<128x192xf32>
    %106 = arith.mulf %104, %105 : vector<128x192xf32>
    %107 = vector.extract_strided_slice %101 {offsets = [1, 0], sizes = [1, 192], strides = [1, 1]} : vector<3x192xf32> to vector<1x192xf32>
    %108 = vector.broadcast %107 : vector<1x192xf32> to vector<128x192xf32>
    %109 = arith.mulf %81, %108 : vector<128x192xf32>
    %110 = arith.addf %106, %109 : vector<128x192xf32>
    %111 = vector.extract_strided_slice %101 {offsets = [2, 0], sizes = [1, 192], strides = [1, 1]} : vector<3x192xf32> to vector<1x192xf32>
    %112 = vector.broadcast %111 : vector<1x192xf32> to vector<128x192xf32>
    %113 = arith.mulf %100, %112 : vector<128x192xf32>
    %114 = vector.broadcast %24 : vector<128x1xf32> to vector<128x192xf32>
    %115 = arith.mulf %113, %114 : vector<128x192xf32>
    %116 = arith.addf %110, %115 : vector<128x192xf32>
    %c0_39 = arith.constant 0 : index
    %c0_40 = arith.constant 0 : index
    %117 = vector.load %arg7[%c0_39, %c0_40] : memref<1x192xf32, #tpu.memory_space<vmem>>, vector<1x192xf32>
    %118 = vector.broadcast %117 : vector<1x192xf32> to vector<128x192xf32>
    %119 = arith.addf %116, %118 : vector<128x192xf32>
    %120 = arith.mulf %119, %76 : vector<128x192xf32>
    %121 = arith.truncf %120 : vector<128x192xf32> to vector<128x192xbf16>
    %c0_41 = arith.constant 0 : index
    %c0_42 = arith.constant 0 : index
    %122 = vector.load %arg12[%c0_41, %c0_42] : memref<192x64xbf16, #tpu.memory_space<vmem>>, vector<192x64xbf16>
    %cst_43 = arith.constant dense<0.000000e+00> : vector<128x64xf32>
    %123 = tpu.matmul %121, %122, %cst_43 {dimension_numbers = #tpu.dot_dimension_numbers<[1], [0], [0], [1], [0, 0, 1, 1], [], []>} : vector<128x192xbf16>, vector<192x64xbf16>, vector<128x64xf32> -> vector<128x64xf32>
    %c0_44 = arith.constant 0 : index
    %c0_45 = arith.constant 0 : index
    %124 = vector.load %arg13[%c0_44, %c0_45] : memref<1x64xf32, #tpu.memory_space<vmem>>, vector<1x64xf32>
    %125 = vector.broadcast %124 : vector<1x64xf32> to vector<128x64xf32>
    %126 = arith.addf %123, %125 : vector<128x64xf32>
    %127 = arith.addf %0, %126 : vector<128x64xf32>
    %c0_46 = arith.constant 0 : index
    %c0_47 = arith.constant 0 : index
    %128 = vector.load %arg14[%c0_46, %c0_47] : memref<128x64xf32, #tpu.memory_space<vmem>>, vector<128x64xf32>
    tpu.vector_store %arg14[%c0_46, %c0_47], %127 {strides = array<i32>} : memref<128x64xf32, #tpu.memory_space<vmem>>, vector<128x64xf32>,
    return
  }
  func.func @transform_0(%arg0: i32, %arg1: memref<3xi32, #tpu.memory_space<smem>>) -> (i32, i32) {
    %c0_i32 = arith.constant 0 : i32
    %c0_i32_0 = arith.constant 0 : i32
    return %arg0, %c0_i32 : i32, i32
  }
  func.func @transform_1(%arg0: i32, %arg1: memref<3xi32, #tpu.memory_space<smem>>) -> (i32, i32, i32) {
    %c0_i32 = arith.constant 0 : i32
    %c0_i32_0 = arith.constant 0 : i32
    %c0_i32_1 = arith.constant 0 : i32
    return %arg0, %c0_i32, %c0_i32_0 : i32, i32, i32
  }
  func.func @transform_2(%arg0: i32, %arg1: memref<3xi32, #tpu.memory_space<smem>>) -> (i32, i32) {
    %c0_i32 = arith.constant 0 : i32
    %c0_i32_0 = arith.constant 0 : i32
    %c0_i32_1 = arith.constant 0 : i32
    return %c0_i32, %c0_i32_0 : i32, i32
  }
  func.func @transform_3(%arg0: i32, %arg1: memref<3xi32, #tpu.memory_space<smem>>) -> (i32, i32) {
    %c0_i32 = arith.constant 0 : i32
    %c0_i32_0 = arith.constant 0 : i32
    %c0_i32_1 = arith.constant 0 : i32
    return %c0_i32, %c0_i32_0 : i32, i32
  }
  func.func @transform_4(%arg0: i32, %arg1: memref<3xi32, #tpu.memory_space<smem>>) -> (i32, i32) {
    %c0_i32 = arith.constant 0 : i32
    %c0_i32_0 = arith.constant 0 : i32
    %c0_i32_1 = arith.constant 0 : i32
    return %c0_i32, %c0_i32_0 : i32, i32
  }
  func.func @transform_5(%arg0: i32, %arg1: memref<3xi32, #tpu.memory_space<smem>>) -> (i32, i32) {
    %c0_i32 = arith.constant 0 : i32
    %c0_i32_0 = arith.constant 0 : i32
    %c0_i32_1 = arith.constant 0 : i32
    return %c0_i32, %c0_i32_0 : i32, i32
  }
  func.func @transform_6(%arg0: i32, %arg1: memref<3xi32, #tpu.memory_space<smem>>) -> (i32, i32) {
    %c0_i32 = arith.constant 0 : i32
    %c0_i32_0 = arith.constant 0 : i32
    %c0_i32_1 = arith.constant 0 : i32
    return %c0_i32, %c0_i32_0 : i32, i32
  }
  func.func @transform_7(%arg0: i32, %arg1: memref<3xi32, #tpu.memory_space<smem>>) -> (i32, i32) {
    %c0_i32 = arith.constant 0 : i32
    %c0_i32_0 = arith.constant 0 : i32
    %c0_i32_1 = arith.constant 0 : i32
    return %c0_i32, %c0_i32_0 : i32, i32
  }
  func.func @transform_8(%arg0: i32, %arg1: memref<3xi32, #tpu.memory_space<smem>>) -> (i32, i32) {
    %c0_i32 = arith.constant 0 : i32
    %c0_i32_0 = arith.constant 0 : i32
    %c0_i32_1 = arith.constant 0 : i32
    return %c0_i32, %c0_i32_0 : i32, i32
  }
  func.func @transform_9(%arg0: i32, %arg1: memref<3xi32, #tpu.memory_space<smem>>) -> (i32, i32) {
    %c0_i32 = arith.constant 0 : i32
    %c0_i32_0 = arith.constant 0 : i32
    %c0_i32_1 = arith.constant 0 : i32
    return %c0_i32, %c0_i32_0 : i32, i32
  }
  func.func @transform_10(%arg0: i32, %arg1: memref<3xi32, #tpu.memory_space<smem>>) -> (i32, i32) {
    %c0_i32 = arith.constant 0 : i32
    %c0_i32_0 = arith.constant 0 : i32
    %c0_i32_1 = arith.constant 0 : i32
    return %c0_i32, %c0_i32_0 : i32, i32
  }
  func.func @transform_11(%arg0: i32, %arg1: memref<3xi32, #tpu.memory_space<smem>>) -> (i32, i32) {
    %c0_i32 = arith.constant 0 : i32
    %c0_i32_0 = arith.constant 0 : i32
    %c0_i32_1 = arith.constant 0 : i32
    return %c0_i32, %c0_i32_0 : i32, i32
  }
  func.func @transform_12(%arg0: i32, %arg1: memref<3xi32, #tpu.memory_space<smem>>) -> (i32, i32) {
    %c0_i32 = arith.constant 0 : i32
    %c0_i32_0 = arith.constant 0 : i32
    return %arg0, %c0_i32 : i32, i32
  }
}

</mosaic_0001>

<bundles_post_ra>
// kernel: tpu_custom_call.1
= control target key start
LH: loop header
LB: loop body
LE: loop exit
PB: predicated region body
PF: predicated region fallthrough
CT: control target
= control target key end

     0   :  { %s5629_s0 = inlined_call_operand.vmem [shape: s32[3], index: 0, kind: input, shape index: {}]   ;;  %s5630_s1 = inlined_call_operand.vmem [shape: f32[384,64], index: 1, kind: input, shape index: {}]   ;;  %s5631_s2 = inlined_call_operand.vmem [shape: f32[3,8,64], index: 2, kind: input, shape index: {}]   ;;  %s5632_s3 = inlined_call_operand.vmem [shape: bf16[64,192], index: 3, kind: input, shape index: {}]   ;;  %s5633_s4 = inlined_call_operand.vmem [shape: f32[1,192], index: 4, kind: input, shape index: {}]   ;;  %s5634_s5 = inlined_call_operand.vmem [shape: f32[3,192], index: 5, kind: input, shape index: {}]   ;;  %s5635_s6 = inlined_call_operand.vmem [shape: f32[1,192], index: 6, kind: input, shape index: {}]   ;;  %s5636_s7 = inlined_call_operand.vmem [shape: bf16[64,192], index: 7, kind: input, shape index: {}]   ;;  %s5637_s8 = inlined_call_operand.vmem [shape: f32[1,192], index: 8, kind: input, shape index: {}]   ;;  %s5638_s9 = inlined_call_operand.vmem [shape: f32[3,192], index: 9, kind: input, shape index: {}]   ;;  %s5639_s10 = inlined_call_operand.vmem [shape: f32[1,192], index: 10, kind: input, shape index: {}]   ;;  %s5640_s11 = inlined_call_operand.vmem [shape: bf16[192,64], index: 11, kind: input, shape index: {}]   ;;  %s5641_s12 = inlined_call_operand.vmem [shape: f32[1,64], index: 12, kind: input, shape index: {}]   ;;  %s5642_s13 = inlined_call_operand.vmem [shape: f32[384,64], index: 13, kind: output, shape index: {}]  }
   0x1   :  { %s18_s27 = sshll.u32 %s5629_s0, 4  ;;  %s19_s27 = int_to_ptr.vmem [resolvable:$true] %s18_s27 }
   0x2   :  { %s3111_s28 = scalar_lea.vmem %s19_s27, 16  ;;  %p3116_p1 = scmp.lt.s32.totalorder %s19_s27, %s19_s27 }
   0x3   :  { %p3112_p0 = scmp.ne.s32.totalorder %s19_s27, %s3111_s28  ;;  %p3117_p2 = scmp.lt.s32.totalorder %s3111_s28, %s3111_s28 }
   0x5   :  { %p3118_p3 = por %p3117_p2, %p3116_p1 }
   0x7   :  { %p3119_p4 = pnand %p3118_p3, %p3112_p0 }
   0x9   :  { %3122 = shalt.err (!%p3119_p4)  }
   0xa   :  { %s3133_s29 = smov [#allocation3]  }
   0xb   :  { %21 = dma.vmem_to_smem %s19_s27, 16, %s3133_s29, [#allocation2] }
   0xc   :  { %3127 = dma.done.wait [#allocation2], 16 }
   0xd   :  { %3128 = vsyncadd [#allocation2], 4294967280 }
   0xe   :  { %23 = sfence }
   0xf   :  { %s3209_s30 = smov 0  }
  0x10 LB: > { %s3215_s0 = sadd.s32 4294967295, %s3131_s30   ;;  %p2801_p5 = scmp.ge.s32.totalorder %s3131_s30, 1  ;;  %s3131_s30 = sphi %s3209_s30, %s29_s30  }
  0x11   : > { %p379_p6 = scmp.lt.s32.totalorder %s3131_s30, 4 }
  0x13   : > { %p380_p7 = pnand %p2801_p5, %p379_p6 }
  0x15   : > { %383 = sbr.rel (%p380_p7) target bundleno = 757 (0x2f5), region = 68 }
  0x1a   : > { %v2931_v0 = vld [vmem:[%s5636_s7 + $0x34] ss:$8 sps:$4 sm:$0xff]   ;;  %s2802_s16 = sshll.u32 %s3215_s0, 4  ;;  %v2933_v1 = vld [vmem:[%s5636_s7 + $0x30] ss:$8 sps:$4 sm:$0xff]   ;;  %v5643_v2 = vmov 0   ;;  %v468_v43 = vlaneseq }
  0x1b   : > { %764 = vmatprep.mubr.bf16.mxu0 %v5643_v2  ;;  %p426_p8 = scmp.lt.s32.totalorder %s2802_s16, 47  ;;  %1791 = vmatprep.mubr.bf16.mxu1 %v5643_v2  ;;  %v2934_v3 = vld [vmem:[%s5636_s7 + $0x24] ss:$8 sps:$4 sm:$0xff]   ;;  %v2936_v4 = vld [vmem:[%s5636_s7 + $0x20] ss:$8 sps:$4 sm:$0xff]   ;;  %vm707_vm0 = vcmask 523264  }
  0x1c   : > { %740 = vmatprep.subr.bf16.mxu0 %v2931_v0  ;;  %v2937_v5 = vld [vmem:[%s5636_s7 + $0x14] ss:$8 sps:$4 sm:$0xff]   ;;  %v3248_v7 = vld [vmem:[%s5632_s3 + $0x30] ss:$8 sps:$4 sm:$0xff]   ;;  %v2940_v9 = vld [vmem:[%s5636_s7 + $0x4] ss:$8 sps:$4 sm:$0xff]  }
  0x1d   : > { %741 = vmatpush1.bf16.msra.mxu0 %v2933_v1  ;;  %s6160_s16 = smov (!%p426_p8, %s2802_s16), 47  ;;  %v3243_v6 = vld [vmem:[%s5632_s3 + $0x34] ss:$8 sps:$4 sm:$0xff]   ;;  %v2939_v8 = vld [vmem:[%s5636_s7 + $0x10] ss:$8 sps:$4 sm:$0xff]   ;;  %p431_p9 = scmp.lt.s32.totalorder %s3215_s0, 2 }
  0x1e   : > { %742 = vmatprep.subr.bf16.mxu0 %v2934_v3  ;;  %s2803_s25 = sshll.u32 %s6160_s16, 3  ;;  %2912 = vmatprep.subr.bf16.mxu1 %v3243_v6  ;;  %v2942_v10 = vld [vmem:[%s5636_s7] ss:$8 sps:$4 sm:$0xff]   ;;  %v3271_v11 = vld [vmem:[%s5632_s3 + $0x24] ss:$8 sps:$4 sm:$0xff]   ;;  %s485_s29 = sld [smem:[#allocation3 + %s3215_s0]] }
  0x1f   : > { %s3258_s19 = scalar_lea.vmem %s5630_s1, %s2803_s25  ;;  %2916 = vmatpush1.bf16.msra.mxu1 %v3248_v7  ;;  %v3277_v13 = vld [vmem:[%s5632_s3 + $0x20] ss:$8 sps:$4 sm:$0xff]   ;;  %v3284_v15 = vld [vmem:[%s5632_s3 + $0x14] ss:$8 sps:$4 sm:$0xff]   ;;  %v3290_v16 = vld [vmem:[%s5632_s3 + $0x10] ss:$8 sps:$4 sm:$0xff]  }
  0x20   : > { %v442_v12 = vld [vmem:[%s3258_s19] sm:$0xff]  ;;  %v443_v14 = vld [vmem:[%s3258_s19 + $0x8] sm:$0xff]  ;;  %2913 = vmatprep.subr.bf16.mxu1 %v3271_v11  ;;  %v444_v20 = vld [vmem:[%s3258_s19 + $0x10] sm:$0xff]  ;;  %s432_s23 = scalar_select %p431_p9, %s3215_s0, 2  ;;  %v3385_v44 = vshrl.u32 %v468_v43, 7 }
  0x21   : > { %743 = vmatpush1.bf16.msra.mxu0 %v2936_v4  ;;  %v3292_v17 = vpack.c.bf16 %v443_v14, %v442_v12  ;;  %v3298_v18 = vld [vmem:[%s5632_s3 + $0x4] ss:$8 sps:$4 sm:$0xff]   ;;  %v3303_v19 = vld [vmem:[%s5632_s3] ss:$8 sps:$4 sm:$0xff]   ;;  %v445_v21 = vld [vmem:[%s3258_s19 + $0x18] sm:$0xff] }
  0x22   : > { %744 = vmatprep.subr.bf16.mxu0 %v2937_v5  ;;  %v446_v22 = vld [vmem:[%s3258_s19 + $0x20] sm:$0xff]  ;;  %v447_v23 = vld [vmem:[%s3258_s19 + $0x28] sm:$0xff]  ;;  %v3315_v24 = vpack.c.bf16 %v445_v21, %v444_v20  ;;  %v448_v26 = vld [vmem:[%s3258_s19 + $0x30] sm:$0xff]  ;;  %s2804_s24 = sshll.u32 %s432_s23, 3  ;;  %v470_v45 = vadd.s32 8, %v3385_v44  ;;  %v3391_v47 = vsub.s32 1, %v3385_v44 }
  0x23   : > { %2917 = vmatpush1.bf16.msra.mxu1 %v3277_v13  ;;  %v460_v25 = vpack.c.bf16 %v447_v23, %v446_v22  ;;  %v449_v27 = vld [vmem:[%s3258_s19 + $0x38] sm:$0xff]  ;;  %v450_v29 = vld [vmem:[%s3258_s19 + $0x40] sm:$0xff]  ;;  %v451_v30 = vld [vmem:[%s3258_s19 + $0x48] sm:$0xff]  ;;  %s434_s28 = scalar_lea.vmem %s5631_s2, %s2804_s24  ;;  %v1253_v51 = vsub.s32 5, %v3385_v44  ;;  %v3401_v52 = vsub.s32 0, %v3385_v44  ;;  %v471_v54 = vadd.s32 16, %v3385_v44 }
  0x24   : > { %2914 = vmatprep.subr.bf16.mxu1 %v3284_v15  ;;  %v461_v28 = vpack.c.bf16 %v449_v27, %v448_v26  ;;  %v462_v31 = vpack.c.bf16 %v451_v30, %v450_v29  ;;  %v452_v32 = vld [vmem:[%s3258_s19 + $0x50] sm:$0xff]  ;;  %v453_v33 = vld [vmem:[%s3258_s19 + $0x58] sm:$0xff]  ;;  %v454_v35 = vld [vmem:[%s3258_s19 + $0x60] sm:$0xff]  ;;  %v3388_v46 = vstv %s485_s29  ;;  %5764 = vst [vmem:[#allocation6_spill] sm:$0xff] %v3391_v47  ;;  %v472_v58 = vadd.s32 24, %v3385_v44 }
  0x25   : > { %745 = vmatpush1.bf16.msra.mxu0 %v2939_v8  ;;  %v463_v34 = vpack.c.bf16 %v453_v33, %v452_v32  ;;  %v455_v36 = vld [vmem:[%s3258_s19 + $0x68] sm:$0xff]  ;;  %v456_v38 = vld [vmem:[%s3258_s19 + $0x70] sm:$0xff]  ;;  %v457_v39 = vld [vmem:[%s3258_s19 + $0x78] sm:$0xff]  ;;  %5763 = vst [vmem:[#allocation5_spill] sm:$0xff] %v3388_v46  ;;  %v487_v49 = vadd.s32 %v3388_v46, %v3385_v44  ;;  %v488_v50 = vadd.s32 %v3388_v46, %v470_v45  ;;  %v3412_v60 = vsub.s32 2, %v3385_v44 }
  0x26   : > { %746 = vmatprep.subr.bf16.mxu0 %v2940_v9  ;;  %v464_v37 = vpack.c.bf16 %v455_v36, %v454_v35  ;;  %v465_v40 = vpack.c.bf16 %v457_v39, %v456_v38  ;;  %v466_v41 = vld [vmem:[%s434_s28] sm:$0xff]  ;;  %5765 = vst [vmem:[#allocation7_spill] sm:$0xff] %v3401_v52  ;;  %v1171_v62 = vsub.s32 4, %v3385_v44  ;;  %v475_v14 = vadd.s32 48, %v3385_v44  ;;  %s5561_s28 = scalar_lea.vmem %s5642_s13, %s2803_s25 }
  0x27   : > { %2918 = vmatpush1.bf16.msra.mxu1 %v3290_v16  ;;  %v467_v42 = vpack.c.bf16 %v466_v41, %v466_v41  ;;  %v1163_v48 = vld [vmem:[%s5638_s9] sm:$0x77]  ;;  %v2807_v56 = vadd.s32 4294967104, %v487_v49  ;;  %v2808_v57 = vadd.s32 4294967104, %v488_v50  ;;  %vm503_vm1 = vcmp.ge.s32.totalorder %v487_v49, 192 }
  0x28   : > { %2915 = vmatprep.subr.bf16.mxu1 %v3298_v18  ;;  %v1250_v53 = vrot.slane %v1163_v48, %v3391_v47  ;;  %v655_v55 = vld [vmem:[%s5637_s8] sm:$0x3]  ;;  %v1254_v59 = vrot.slane %v1163_v48, %v1253_v51  ;;  %vm504_vm2 = vcmp.ge.s32.totalorder %v488_v50, 192  ;;  %v1168_v61 = vrot.slane %v1163_v48, %v3401_v52 }
  0x29   : > { %747 = vmatpush1.bf16.msra.mxu0 %v2942_v10  ;;  %v3417_v63 = vrot.slane %v655_v55, %v3401_v52  ;;  %v5645_v26 = vmov 0.0   ;;  %v1443_v38 = vld [vmem:[%s5639_s10] sm:$0x3] }
  0x2a   : > { %856 = vmatprep.subr.bf16.mxu0 %v2931_v0  ;;  %v3420_v0 = vrot.slane %v1250_v53, %v3391_v47  ;;  %v3437_v12 = vrot.slane %v1168_v61, %v3401_v52  ;;  %v3493_v61 = vrot.slane %v1443_v38, %v3391_v47 }
  0x2b   : > { %2919 = vmatpush1.bf16.msra.mxu1 %v3303_v19 }
  0x2c   : > { %2831 = vmatmul.mubr.msk.bf16.vlgmr.msra.gmra.mxu0 %vm707_vm0, %v3292_v17  ;;  %2600 = vmatprep.subr.bf16.mxu1 %v5643_v2 }
  0x2d   : > { %857 = vmatpush1.bf16.msra.mxu0 %v2933_v1  ;;  %774 = vmatprep.mubr.bf16.mxu0 %v5643_v2  ;;  %v3423_v1 = vrot.slane %v655_v55, %v3391_v47 }
  0x2e   : > { %858 = vmatprep.subr.bf16.mxu0 %v2934_v3  ;;  %2882 = vmatmul.mubr.msk.bf16.vlgmr.msra.gmra.mxu1 %vm707_vm0, %v460_v25  ;;  %v489_v3 = vadd.s32 %v3388_v46, %v471_v54 }
  0x2f   : > { %1801 = vmatprep.mubr.bf16.mxu1 %v5643_v2 }
  0x30   : > { %vm505_vm5 = vcmp.ge.s32.totalorder %v489_v3, 192 }
  0x31   : > { %859 = vmatpush1.bf16.msra.mxu0 %v2936_v4  ;;  %v3426_v4 = vsel %vm503_vm1, %v2807_v56, %v487_v49  ;;  %v3484_v49 = vrot.slane %v1443_v38, %v3401_v52 }
  0x32   : > { %860 = vmatprep.subr.bf16.mxu0 %v2937_v5  ;;  %5766 = vst [vmem:[#allocation8_spill] sm:$0xff] %v3426_v4  ;;  %v536_v5 = vsel %vm504_vm2, %v2808_v57, %v488_v50  ;;  %vm583_vm4 = vcmp.ne.s32.totalorder %v3426_v4, 191 }
  0x33   : > { %vm552_vm3 = vcmp.ne.s32.totalorder %v536_v5, 0  ;;  %vm584_vm7 = vcmp.ne.s32.totalorder %v536_v5, 191 }
  0x34   : > { %2832 = vmatmul.mubr.msk.bf16.gmra.mxu0 %vm707_vm0, %v3315_v24  ;;  %v3459_v27 = vsel %vm552_vm3, 1.0, %v5645_v26  ;;  %v3473_v36 = vsel %vm584_vm7, 1.0, %v5645_v26 }
  0x35   : > { %784 = vmatprep.mubr.bf16.mxu0 %v5643_v2  ;;  %861 = vmatpush1.bf16.msra.mxu0 %v2939_v8  ;;  %v3431_v8 = vrot.slane %v1254_v59, %v3391_v47  ;;  %5767 = vst [vmem:[#allocation9_spill] sm:$0xff] %v3459_v27  ;;  %5769 = vst [vmem:[#allocation11_spill] sm:$0xff] %v3473_v36 }
  0x36   : > { %862 = vmatprep.subr.bf16.mxu0 %v2940_v9  ;;  %2883 = vmatmul.mubr.msk.bf16.gmra.mxu1 %vm707_vm0, %v461_v28  ;;  %v1332_v9 = vrot.slane %v1163_v48, %v3412_v60 }
  0x37   : > { %1811 = vmatprep.mubr.bf16.mxu1 %v5643_v2 }
  0x38   : > { %v3447_v20 = vrot.slane %v1332_v9, %v3412_v60 }
  0x39   : > { %863 = vmatpush1.bf16.msra.mxu0 %v2942_v10  ;;  %v5647_v10 = vsub.s32 6, %v3385_v44 }
  0x3a   : > { %1747 = vmatprep.subr.bf16.mxu0 %v3243_v6 }
  0x3b   : > { %v1336_v21 = vrot.slane %v1163_v48, %v5647_v10 }
  0x3c   : > { %2833 = vmatmul.mubr.msk.bf16.gmra.mxu0 %vm707_vm0, %v460_v25  ;;  %v478_v25 = vadd.s32 72, %v3385_v44 }
  0x3d   : > { %794 = vmatprep.mubr.bf16.mxu0 %v5643_v2  ;;  %v3470_v35 = vrot.slane %v1336_v21, %v3412_v60 }
  0x3e   : > { %2884 = vmatmul.mubr.msk.bf16.gmra.mxu1 %vm707_vm0, %v462_v31 }
  0x3f   : > { %1821 = vmatprep.mubr.bf16.mxu1 %v5643_v2 }
  0x44   : > { %2834 = vmatmul.mubr.msk.bf16.gmra.mxu0 %vm707_vm0, %v461_v28  ;;  %v3464_v28 = vsel %vm583_vm4, 1.0, %v5645_v26 }
  0x45   : > { %804 = vmatprep.mubr.bf16.mxu0 %v5643_v2  ;;  %5768 = vst [vmem:[#allocation10_spill] sm:$0xff] %v3464_v28 }
  0x46   : > { %2885 = vmatmul.mubr.msk.bf16.gmra.mxu1 %vm707_vm0, %v463_v34 }
  0x47   : > { %1831 = vmatprep.mubr.bf16.mxu1 %v5643_v2 }
  0x4c   : > { %2835 = vmatmul.mubr.msk.bf16.gmra.mxu0 %vm707_vm0, %v462_v31 }
  0x4d   : > { %814 = vmatprep.mubr.bf16.mxu0 %v5643_v2 }
  0x4e   : > { %2886 = vmatmul.mubr.msk.bf16.gmra.mxu1 %vm707_vm0, %v464_v37 }
  0x4f   : > { %1841 = vmatprep.mubr.bf16.mxu1 %v5643_v2 }
  0x54   : > { %2836 = vmatmul.mubr.msk.bf16.gmra.mxu0 %vm707_vm0, %v463_v34  ;;  %v479_v34 = vadd.s32 80, %v3385_v44 }
  0x55   : > { %824 = vmatprep.mubr.bf16.mxu0 %v5643_v2 }
  0x56   : > { %2887 = vmatmul.mubr.msk.bf16.gmra.mxu1 %vm707_vm0, %v465_v40  ;;  %v497_v45 = vadd.s32 %v3388_v46, %v479_v34 }
  0x58   : > { %v2817_v59 = vadd.s32 4294967104, %v497_v45 }
  0x5c   : > { %2837 = vmatmul.mubr.msk.bf16.gmra.mxu0 %vm707_vm0, %v464_v37 }
  0x5d   : > { %834 = vmatprep.mubr.bf16.mxu0 %v5643_v2 }
  0x64   : > { %2838 = vmatmul.mubr.msk.bf16.gmra.mxu0 %vm707_vm0, %v465_v40  ;;  %v496_v40 = vadd.s32 %v3388_v46, %v478_v25 }
  0x65   : > { %880 = vmatprep.mubr.bf16.mxu0 %v5643_v2 }
  0x66   : > { %v2816_v56 = vadd.s32 4294967104, %v496_v40  ;;  %vm512_vm3 = vcmp.ge.s32.totalorder %v496_v40, 192 }
  0x6c   : > { %2839 = vmatmul.mubr.msk.bf16.vlgmr.msra.gmra.mxu0 %vm707_vm0, %v467_v42 }
  0x6d   : > { %1748 = vmatpush1.bf16.msra.mxu0 %v3248_v7  ;;  %1771 = vmatprep.mubr.bf16.mxu0 %v5643_v2 }
  0x6e   : > { %1749 = vmatprep.subr.bf16.mxu0 %v3271_v11 }
  0x71   : > { %1750 = vmatpush1.bf16.msra.mxu0 %v3277_v13 }
  0x72   : > { %1751 = vmatprep.subr.bf16.mxu0 %v3284_v15 }
  0x75   : > { %1752 = vmatpush1.bf16.msra.mxu0 %v3290_v16 }
  0x76   : > { %1753 = vmatprep.subr.bf16.mxu0 %v3298_v18 }
  0x79   : > { %1754 = vmatpush1.bf16.msra.mxu0 %v3303_v19 }
  0x7a   : > { %1860 = vmatprep.subr.bf16.mxu0 %v3243_v6  ;;  %v490_v6 = vadd.s32 %v3388_v46, %v472_v58 }
  0x7c   : > { %2880 = vmatmul.mubr.msk.bf16.vlgmr.msra.gmra.mxu0 %vm707_vm0, %v3292_v17  ;;  %v2810_v17 = vadd.s32 4294967104, %v490_v6  ;;  %vm506_vm6 = vcmp.ge.s32.totalorder %v490_v6, 192 }
  0x7d   : > { %1861 = vmatpush1.bf16.msra.mxu0 %v3248_v7  ;;  %1781 = vmatprep.mubr.bf16.mxu0 %v5643_v2  ;;  %v473_v7 = vadd.s32 32, %v3385_v44 }
  0x7e   : > { %1862 = vmatprep.subr.bf16.mxu0 %v3271_v11  ;;  %v474_v11 = vadd.s32 40, %v3385_v44  ;;  %v538_v31 = vsel %vm506_vm6, %v2810_v17, %v490_v6  ;;  %v544_v6 = vsel %vm512_vm3, %v2816_v56, %v496_v40 }
  0x7f   : > { %vm554_vm12 = vcmp.ne.s32.totalorder %v538_v31, 0  ;;  %vm586_vm1 = vcmp.ne.s32.totalorder %v538_v31, 191  ;;  %vm592_vm3 = vcmp.ne.s32.totalorder %v544_v6, 191 }
  0x80   : > { %v492_v22 = vadd.s32 %v3388_v46, %v474_v11  ;;  %v3487_v53 = vsel %vm554_vm12, 1.0, %v5645_v26  ;;  %v3499_v5 = vsel %vm586_vm1, 1.0, %v5645_v26  ;;  %vm560_vm1 = vcmp.ne.s32.totalorder %v544_v6, 0 }
  0x81   : > { %1863 = vmatpush1.bf16.msra.mxu0 %v3277_v13  ;;  %v1172_v13 = vrot.slane %v1163_v48, %v1171_v62  ;;  %5771 = vst [vmem:[#allocation13_spill] sm:$0xff] %v3487_v53  ;;  %5774 = vst [vmem:[#allocation16_spill] sm:$0xff] %v3499_v5  ;;  %v3548_v34 = vsel %vm560_vm1, 1.0, %v5645_v26 }
  0x82   : > { %1864 = vmatprep.subr.bf16.mxu0 %v3284_v15  ;;  %v2809_v15 = vadd.s32 4294967104, %v489_v3  ;;  %v2812_v37 = vadd.s32 4294967104, %v492_v22  ;;  %vm508_vm10 = vcmp.ge.s32.totalorder %v492_v22, 192  ;;  %5781 = vst [vmem:[#allocation23_spill] sm:$0xff] %v3548_v34 }
  0x83   : > { %v3453_v23 = vrot.slane %v1172_v13, %v3401_v52 }
  0x84   : > { %2881 = vmatmul.mubr.msk.bf16.gmra.mxu0 %vm707_vm0, %v3315_v24  ;;  %v493_v24 = vadd.s32 %v3388_v46, %v475_v14  ;;  %v537_v29 = vsel %vm505_vm5, %v2809_v15, %v489_v3  ;;  %v540_v50 = vsel %vm508_vm10, %v2812_v37, %v492_v22  ;;  %vm921_vm10 = vcmp.lt.s32.totalorder %v3385_v44, 1  ;;  %v2101_v14 = vld [vmem:[%s5634_s5] sm:$0x77] }
  0x85   : > { %1865 = vmatpush1.bf16.msra.mxu0 %v3290_v16  ;;  %1884 = vmatprep.mubr.bf16.mxu0 %v5643_v2  ;;  %v476_v16 = vadd.s32 56, %v3385_v44  ;;  %vm553_vm9 = vcmp.ne.s32.totalorder %v537_v29, 0  ;;  %vm585_vm11 = vcmp.ne.s32.totalorder %v537_v29, 191  ;;  %vm556_vm5 = vcmp.ne.s32.totalorder %v540_v50, 0 }
  0x86   : > { %1866 = vmatprep.subr.bf16.mxu0 %v3298_v18  ;;  %v491_v18 = vadd.s32 %v3388_v46, %v473_v7  ;;  %v2813_v39 = vadd.s32 4294967104, %v493_v24  ;;  %vm509_vm13 = vcmp.ge.s32.totalorder %v493_v24, 192  ;;  %v3481_v48 = vsel %vm553_vm9, 1.0, %v5645_v26 }
  0x87   : > { %v494_v30 = vadd.s32 %v3388_v46, %v476_v16  ;;  %5770 = vst [vmem:[#allocation12_spill] sm:$0xff] %v3481_v48  ;;  %v3490_v54 = vsel %vm585_vm11, 1.0, %v5645_v26  ;;  %vm588_vm6 = vcmp.ne.s32.totalorder %v540_v50, 191  ;;  %vm1058_vm11 = vcmp.lt.s32.totalorder %v3385_v44, 7 }
  0x88   : > { %v2811_v32 = vadd.s32 4294967104, %v491_v18  ;;  %vm507_vm8 = vcmp.ge.s32.totalorder %v491_v18, 192  ;;  %5772 = vst [vmem:[#allocation14_spill] sm:$0xff] %v3490_v54  ;;  %v541_v55 = vsel %vm509_vm13, %v2813_v39, %v493_v24  ;;  %v3504_v7 = vsel %vm556_vm5, 1.0, %v5645_v26 }
  0x89   : > { %1867 = vmatpush1.bf16.msra.mxu0 %v3303_v19  ;;  %v477_v19 = vadd.s32 64, %v3385_v44  ;;  %v2814_v41 = vadd.s32 4294967104, %v494_v30  ;;  %vm510_vm14 = vcmp.ge.s32.totalorder %v494_v30, 192  ;;  %vm557_vm7 = vcmp.ne.s32.totalorder %v541_v55, 0 }
  0x8a   : > { %vm589_vm12 = vcmp.ne.s32.totalorder %v541_v55, 191  ;;  %v3510_v11 = vsel %vm557_vm7, 1.0, %v5645_v26  ;;  %v3513_v13 = vsel %vm588_vm6, 1.0, %v5645_v26  ;;  %v2188_v24 = vrot.slane %v2101_v14, %v3391_v47 }
  0x8b   : > { %v495_v33 = vadd.s32 %v3388_v46, %v477_v19  ;;  %v542_v57 = vsel %vm510_vm14, %v2814_v41, %v494_v30  ;;  %5776 = vst [vmem:[#allocation18_spill] sm:$0xff] %v3513_v13  ;;  %v480_v19 = vadd.s32 88, %v3385_v44  ;;  %v3528_v21 = vsel %vm589_vm12, 1.0, %v5645_v26 }
  0x8c   : > { %2888 = vmatmul.mubr.msk.bf16.vlgmr.msra.gmra.mxu0 %vm707_vm0, %v467_v42  ;;  %v539_v42 = vsel %vm507_vm8, %v2811_v32, %v491_v18  ;;  %vm513_vm8 = vcmp.ge.s32.totalorder %v497_v45, 192  ;;  %vm558_vm9 = vcmp.ne.s32.totalorder %v542_v57, 0  ;;  %vm590_vm14 = vcmp.ne.s32.totalorder %v542_v57, 191  ;;  %v1687_v18 = vld [vmem:[%s5633_s4] sm:$0x3]  ;;  %5777 = vst [vmem:[#allocation19_spill] sm:$0xff] %v3528_v21 }
  0x8d   : > { %v2815_v43 = vadd.s32 4294967104, %v495_v33  ;;  %vm511_vm15 = vcmp.ge.s32.totalorder %v495_v33, 192  ;;  %vm555_vm2 = vcmp.ne.s32.totalorder %v539_v42, 0  ;;  %vm587_vm4 = vcmp.ne.s32.totalorder %v539_v42, 191 }
  0x8e   : > { %v3496_v3 = vsel %vm555_vm2, 1.0, %v5645_v26  ;;  %v3507_v9 = vsel %vm587_vm4, 1.0, %v5645_v26  ;;  %v3518_v15 = vsel %vm513_vm8, %v2817_v59, %v497_v45  ;;  %v3521_v17 = vsel %vm558_vm9, 1.0, %v5645_v26 }
  0x8f   : > { %v543_v58 = vsel %vm511_vm15, %v2815_v43, %v495_v33  ;;  %5773 = vst [vmem:[#allocation15_spill] sm:$0xff] %v3496_v3  ;;  %5775 = vst [vmem:[#allocation17_spill] sm:$0xff] %v3507_v9  ;;  %v2192_v25 = vrot.slane %v2101_v14, %v1253_v51  ;;  %v3540_v31 = vsel %vm590_vm14, 1.0, %v5645_v26  ;;  %v2106_v32 = vrot.slane %v2101_v14, %v3401_v52 }
  0x90   : > { %vm559_vm13 = vcmp.ne.s32.totalorder %v543_v58, 0  ;;  %vm591_vm15 = vcmp.ne.s32.totalorder %v543_v58, 191  ;;  %5779 = vst [vmem:[#allocation21_spill] sm:$0xff] %v3540_v31  ;;  %vm561_vm2 = vcmp.ne.s32.totalorder %v3518_v15, 0  ;;  %v3545_v33 = vrot.slane %v1687_v18, %v3401_v52 }
  0x91   : > { %v3531_v22 = vsel %vm559_vm13, 1.0, %v5645_v26  ;;  %v3552_v51 = vsel %vm591_vm15, 1.0, %v5645_v26  ;;  %v3558_v39 = vrot.slane %v1687_v18, %v3391_v47  ;;  %v2270_v40 = vrot.slane %v2101_v14, %v3412_v60 }
  0x92   : > { %5780 = vst [vmem:[#allocation22_spill] sm:$0xff] %v3545_v33  ;;  %5782 = vst [vmem:[#allocation24_spill] sm:$0xff] %v3552_v51  ;;  %v498_v41 = vadd.s32 %v3388_v46, %v480_v19  ;;  %v3564_v43 = vrot.slane %v2188_v24, %v3391_v47  ;;  %v3567_v45 = vrot.slane %v2192_v25, %v3391_v47  ;;  %v3570_v50 = vsel %vm561_vm2, 1.0, %v5645_v26 }
  0x93   : > { %5784 = vst [vmem:[#allocation26_spill] sm:$0xff] %v3558_v39  ;;  %5787 = vst [vmem:[#allocation29_spill] sm:$0xff] %v3570_v50  ;;  %v3574_v57 = vrot.slane %v2106_v32, %v3401_v52  ;;  %v3577_v58 = vsel %vm592_vm3, 1.0, %v5645_v26  ;;  %v2110_v59 = vrot.slane %v2101_v14, %v1171_v62  ;;  %v3586_v32 = vrot.slane %v2270_v40, %v3412_v60 }
  0x94   : > { %5785 = vst [vmem:[#allocation27_spill] sm:$0xff] %v3564_v43  ;;  %5786 = vst [vmem:[#allocation28_spill] sm:$0xff] %v3567_v45  ;;  %vm514_vm4 = vcmp.ge.s32.totalorder %v498_v41, 192  ;;  %vm593_vm7 = vcmp.ne.s32.totalorder %v3518_v15, 191 }
  0x95   : > { %5788 = vst [vmem:[#allocation30_spill] sm:$0xff] %v3574_v57  ;;  %5789 = vst [vmem:[#allocation31_spill] sm:$0xff] %v3577_v58  ;;  %v3601_v24 = vrot.slane %v2110_v59, %v3401_v52 }
  0x96   : > { %5790 = vst [vmem:[#allocation32_spill] sm:$0xff] %v3586_v32 }
  0x97   : > { %5792 = vst [vmem:[#allocation34_spill] sm:$0xff] %v3601_v24 }
  0xec   : > { %v766_v16 = vpop.f32.mrf.mxu0 }
  0xed   : > { %v3537_v29 = vadd.f32 %v766_v16, %v3417_v63 }
  0xee   : > { %v768_v30 = vpop.f32.mrf.mxu0 }
  0xef   : > { %5778 = vst [vmem:[#allocation20_spill] sm:$0xff] %v3537_v29  ;;  %v3555_v37 = vadd.f32 %v768_v30, %v3423_v1  ;;  %v5650_v55 = vrot.slane %v3537_v29, 7  ;;  %v5653_v6 = vrot.slane %v3537_v29, 1 }
  0xf0   : > { %v770_v38 = vpop.f32.mrf.mxu0 }
  0xf1   : > { %5783 = vst [vmem:[#allocation25_spill] sm:$0xff] %v3555_v37  ;;  %v771_v42 = vadd.f32 %v770_v38, %v3417_v63  ;;  %v2818_v38 = vadd.s32 4294967104, %v498_v41  ;;  %v5793_v47 = vrot.slane %v3555_v37, 7  ;;  %v5794_v4 = vrot.slane %v3555_v37, 1 }
  0xf2   : > { %v772_v56 = vpop.f32.mrf.mxu0 }
  0xf3   : > { %v891_v16 = vrot.slane %v771_v42, 7  ;;  %v1028_v18 = vrot.slane %v771_v42, 1  ;;  %v773_v19 = vadd.f32 %v772_v56, %v3423_v1  ;;  %v1267_v52 = vmul.f32 %v3420_v0, %v771_v42 }
  0xf4   : > { %v776_v30 = vpop.f32.mrf.mxu0  ;;  %v3625_v28 = vsel %vm514_vm4, %v2818_v38, %v498_v41 }
  0xf5   : > { %v950_v62 = vsel %vm921_vm10, %v5650_v55, %v891_v16  ;;  %v3596_v2 = vsel %vm1058_vm11, %v5653_v6, %v1028_v18  ;;  %v892_v56 = vrot.slane %v773_v19, 7  ;;  %v1029_v26 = vrot.slane %v773_v19, 1 }
  0xf6   : > { %5791 = vst [vmem:[#allocation33_spill] sm:$0xff] %v3596_v2  ;;  %v1185_v10 = vmul.f32 %v3437_v12, %v950_v62  ;;  %v777_v25 = vadd.f32 %v776_v30, %v3417_v63  ;;  %v778_v40 = vpop.f32.mrf.mxu0  ;;  %v481_v30 = vadd.s32 96, %v3385_v44  ;;  %vm562_vm5 = vcmp.ne.s32.totalorder %v3625_v28, 0 }
  0xf7   : > { %v951_v55 = vsel %vm921_vm10, %v5793_v47, %v892_v56  ;;  %v3611_v6 = vsel %vm1058_vm11, %v5794_v4, %v1029_v26  ;;  %v3614_v62 = vadd.f32 %v778_v40, %v3423_v1  ;;  %v5796_v47 = vsub.s32 6, %v3385_v44 }
  0xf8   : > { %5795 = vst [vmem:[#allocation35_spill] sm:$0xff] %v3611_v6  ;;  %v1217_v59 = vmul.f32 %v1185_v10, %v3459_v27  ;;  %v1186_v32 = vmul.f32 %v3453_v23, %v951_v55  ;;  %v780_v24 = vpop.f32.mrf.mxu0  ;;  %v893_v57 = vrot.slane %v777_v25, 7  ;;  %v1030_v43 = vrot.slane %v777_v25, 1 }
  0xf9   : > { %v3622_v45 = vrot.slane %v2101_v14, %v5796_v47  ;;  %v894_v4 = vrot.slane %v3614_v62, 7  ;;  %v1268_v10 = vmul.f32 %v3431_v8, %v773_v19  ;;  %v1031_v42 = vrot.slane %v3614_v62, 1 }
  0xfa   : > { %v1299_v40 = vadd.f32 %v1267_v52, %v1217_v59  ;;  %v1218_v39 = vmul.f32 %v1186_v32, %v3459_v27  ;;  %v782_v58 = vpop.f32.mrf.mxu0  ;;  %v948_v55 = vsel %vm921_vm10, %v891_v16, %v893_v57  ;;  %v1085_v14 = vsel %vm1058_vm11, %v1028_v18, %v1030_v43 }
  0xfb   : > { %v949_v47 = vsel %vm921_vm10, %v892_v56, %v894_v4  ;;  %v3637_v41 = vadd.s32 %v3388_v46, %v481_v30  ;;  %v1187_v32 = vmul.f32 %v3437_v12, %v948_v55  ;;  %v1349_v19 = vmul.f32 %v3447_v20, %v1085_v14 }
  0xfc   : > { %v1300_v52 = vadd.f32 %v1268_v10, %v1218_v39  ;;  %v1086_v38 = vsel %vm1058_vm11, %v1029_v26, %v1031_v42  ;;  %v786_v59 = vpop.f32.mrf.mxu0  ;;  %v1188_v16 = vmul.f32 %v3453_v23, %v949_v47  ;;  %v781_v18 = vadd.f32 %v780_v24, %v3417_v63 }
  0xfd   : > { %v1350_v27 = vmul.f32 %v3470_v35, %v1086_v38  ;;  %v3647_v56 = vadd.f32 %v782_v58, %v3423_v1  ;;  %v1219_v30 = vmul.f32 %v1187_v32, %v3481_v48  ;;  %v1269_v39 = vmul.f32 %v3420_v0, %v777_v25 }
  0xfe   : > { %v1381_v10 = vmul.f32 %v1349_v19, %v3473_v36  ;;  %v1270_v55 = vmul.f32 %v3431_v8, %v3614_v62  ;;  %v788_v26 = vpop.f32.mrf.mxu0  ;;  %v1220_v14 = vmul.f32 %v1188_v16, %v3481_v48  ;;  %v895_v38 = vrot.slane %v781_v18, 7 }
  0xff   : > { %v1382_v47 = vmul.f32 %v1350_v27, %v3473_v36  ;;  %v1032_v50 = vrot.slane %v781_v18, 1  ;;  %v1301_v24 = vadd.f32 %v1269_v39, %v1219_v30  ;;  %v896_v58 = vrot.slane %v3647_v56, 7 }
 0x100   : > { %v3656_v6 = vadd.f32 %v1381_v10, %v1299_v40  ;;  %v3660_v32 = vadd.f32 %v786_v59, %v3417_v63  ;;  %v790_v25 = vpop.f32.mrf.mxu0  ;;  %v1302_v19 = vadd.f32 %v1270_v55, %v1220_v14  ;;  %v946_v62 = vsel %vm921_vm10, %v893_v57, %v895_v38 }
 0x101   : > { %v3662_v2 = vadd.f32 %v1382_v47, %v1300_v52  ;;  %v1083_v27 = vsel %vm1058_vm11, %v1030_v43, %v1032_v50  ;;  %v1189_v16 = vmul.f32 %v3437_v12, %v946_v62  ;;  %v947_v30 = vsel %vm921_vm10, %v894_v4, %v896_v58 }
 0x102   : > { %v1351_v40 = vmul.f32 %v3447_v20, %v1083_v27  ;;  %v792_v39 = vpop.f32.mrf.mxu0  ;;  %v1033_v59 = vrot.slane %v3647_v56, 1  ;;  %v1190_v52 = vmul.f32 %v3453_v23, %v947_v30  ;;  %v2819_v10 = vadd.s32 4294967104, %v3637_v41 }
 0x103   : > { %v482_v57 = vadd.s32 104, %v3385_v44  ;;  %v1221_v43 = vmul.f32 %v1189_v16, %v3487_v53  ;;  %v1271_v55 = vmul.f32 %v3420_v0, %v781_v18  ;;  %v897_v47 = vrot.slane %v3660_v32, 7 }
 0x104   : > { %v1383_v14 = vmul.f32 %v1351_v40, %v3490_v54  ;;  %v796_v4 = vpop.f32.mrf.mxu0  ;;  %v1084_v62 = vsel %vm1058_vm11, %v1031_v42, %v1033_v59  ;;  %v1222_v27 = vmul.f32 %v1190_v52, %v3487_v53  ;;  %v1272_v30 = vmul.f32 %v3431_v8, %v3647_v56 }
 0x105   : > { %v1034_v36 = vrot.slane %v3660_v32, 1  ;;  %v1303_v48 = vadd.f32 %v1271_v55, %v1221_v43  ;;  %v1352_v18 = vmul.f32 %v3470_v35, %v1084_v62  ;;  %vm515_vm6 = vcmp.ge.s32.totalorder %v3637_v41, 192 }
 0x106   : > { %v3687_v51 = vadd.f32 %v1383_v14, %v1301_v24  ;;  %v3690_v16 = vpop.f32.mrf.mxu0  ;;  %v1304_v40 = vadd.f32 %v1272_v30, %v1222_v27  ;;  %v944_v42 = vsel %vm921_vm10, %v895_v38, %v897_v47  ;;  %v500_v56 = vadd.s32 %v3388_v46, %v482_v57 }
 0x107   : > { %v1081_v52 = vsel %vm1058_vm11, %v1032_v50, %v1034_v36  ;;  %v1384_v53 = vmul.f32 %v1352_v18, %v3490_v54  ;;  %v1191_v24 = vmul.f32 %v3437_v12, %v944_v42  ;;  %v3705_v55 = vrot.slane %v3622_v45, %v3412_v60 }
 0x108   : > { %v3700_v43 = vpop.f32.mrf.mxu0  ;;  %v5798_v14 = vmov 0.0   ;;  %v1353_v50 = vmul.f32 %v3447_v20, %v1081_v52  ;;  %v789_v57 = vadd.f32 %v788_v26, %v3423_v1  ;;  %v3715_v62 = vadd.f32 %v790_v25, %v3417_v63 }
 0x109   : > { %5797 = vst [vmem:[#allocation36_spill] sm:$0xff] %v3705_v55  ;;  %v3710_v38 = vsel %vm562_vm5, 1.0, %v5798_v14  ;;  %vm594_vm8 = vcmp.ne.s32.totalorder %v3625_v28, 191  ;;  %v3718_v27 = vadd.f32 %v1384_v53, %v1302_v19  ;;  %v1223_v30 = vmul.f32 %v1191_v24, %v3496_v3 }
 0x10a   : > { %5799 = vst [vmem:[#allocation37_spill] sm:$0xff] %v3710_v38  ;;  %v1273_v60 = vmul.f32 %v3420_v0, %v3660_v32  ;;  %v3723_v45 = vpop.f32.mrf.mxu0  ;;  %v3728_v18 = vsel %vm515_vm6, %v2819_v10, %v3637_v41  ;;  %v1385_v26 = vmul.f32 %v1353_v50, %v3499_v5  ;;  %v898_v25 = vrot.slane %v789_v57, 7 }
 0x10b   : > { %v1035_v42 = vrot.slane %v789_v57, 1  ;;  %v2820_v52 = vadd.s32 4294967104, %v500_v56  ;;  %v899_v53 = vrot.slane %v3715_v62, 7  ;;  %v3733_v19 = vadd.f32 %v792_v39, %v3423_v1 }
 0x10c   : > { %v1305_v54 = vadd.f32 %v1273_v60, %v1223_v30  ;;  %v3735_v24 = vpop.f32.mrf.mxu0  ;;  %vm516_vm9 = vcmp.ge.s32.totalorder %v500_v56, 192  ;;  %v3737_v32 = vadd.f32 %v1385_v26, %v1303_v48  ;;  %v945_v41 = vsel %vm921_vm10, %v896_v58, %v898_v25 }
 0x10d   : > { %v1082_v10 = vsel %vm1058_vm11, %v1033_v59, %v1035_v42  ;;  %v1036_v50 = vrot.slane %v3715_v62, 1  ;;  %v1192_v30 = vmul.f32 %v3453_v23, %v945_v41  ;;  %v942_v39 = vsel %vm921_vm10, %v897_v47, %v899_v53 }
 0x10e   : > { %v1354_v60 = vmul.f32 %v3470_v35, %v1082_v10  ;;  %v3748_v55 = vpop.f32.mrf.mxu0  ;;  %vm563_vm12 = vcmp.ne.s32.totalorder %v3728_v18, 0  ;;  %v1193_v58 = vmul.f32 %v3437_v12, %v942_v39  ;;  %v3755_v59 = vadd.f32 %v796_v4, %v3417_v63 }
 0x10f   : > { %v1079_v48 = vsel %vm1058_vm11, %v1034_v36, %v1036_v50  ;;  %v3757_v26 = vsel %vm516_vm9, %v2820_v52, %v500_v56  ;;  %v1224_v41 = vmul.f32 %v1192_v30, %v3496_v3  ;;  %v1274_v10 = vmul.f32 %v3431_v8, %v789_v57 }
 0x110   : > { %v1386_v47 = vmul.f32 %v1354_v60, %v3499_v5  ;;  %v1355_v38 = vmul.f32 %v3447_v20, %v1079_v48  ;;  %v3763_v34 = vpop.f32.mrf.mxu0  ;;  %v1225_v33 = vmul.f32 %v1193_v58, %v3504_v7  ;;  %v1275_v36 = vmul.f32 %v3420_v0, %v3715_v62 }
 0x111   : > { %v900_v4 = vrot.slane %v3733_v19, 7  ;;  %v1037_v56 = vrot.slane %v3733_v19, 1  ;;  %v1306_v52 = vadd.f32 %v1274_v10, %v1224_v41  ;;  %v483_v60 = vadd.s32 112, %v3385_v44 }
 0x112   : > { %v3770_v39 = vadd.f32 %v1386_v47, %v1304_v40  ;;  %v1387_v57 = vmul.f32 %v1355_v38, %v3507_v9  ;;  %v3773_v30 = vpop.f32.mrf.mxu0  ;;  %v1307_v48 = vadd.f32 %v1275_v36, %v1225_v33  ;;  %v3783_v3 = vsel %vm593_vm7, 1.0, %v5798_v14 }
 0x113   : > { %v943_v58 = vsel %vm921_vm10, %v898_v25, %v900_v4  ;;  %v1080_v62 = vsel %vm1058_vm11, %v1035_v42, %v1037_v56  ;;  %5800 = vst [vmem:[#allocation38_spill] sm:$0xff] %v3783_v3  ;;  %v3793_v33 = vsel %vm563_vm12, 1.0, %v5798_v14  ;;  %v3798_v25 = vsel %vm594_vm8, 1.0, %v5798_v14 }
 0x114   : > { %v3785_v40 = vadd.f32 %v1387_v57, %v1305_v54  ;;  %v1194_v38 = vmul.f32 %v3453_v23, %v943_v58  ;;  %v3788_v41 = vpop.f32.mrf.mxu0  ;;  %5801 = vst [vmem:[#allocation39_spill] sm:$0xff] %v3793_v33  ;;  %5802 = vst [vmem:[#allocation40_spill] sm:$0xff] %v3798_v25  ;;  %v1356_v15 = vmul.f32 %v3470_v35, %v1080_v62  ;;  %v901_v42 = vrot.slane %v3755_v59, 7 }
 0x115   : > { %v1038_v54 = vrot.slane %v3755_v59, 1  ;;  %vm564_vm13 = vcmp.ne.s32.totalorder %v3757_v26, 0  ;;  %v1276_v47 = vmul.f32 %v3431_v8, %v3733_v19  ;;  %vm595_vm14 = vcmp.ne.s32.totalorder %v3728_v18, 191 }
 0x116   : > { %v1226_v10 = vmul.f32 %v1194_v38, %v3504_v7  ;;  %v3807_v36 = vpop.f32.mrf.mxu0  ;;  %v3811_v28 = vadd.s32 %v3388_v46, %v483_v60  ;;  %v1457_v57 = vadd.f32 %v3484_v49, %v3656_v6  ;;  %v1388_v58 = vmul.f32 %v1356_v15, %v3507_v9 }
 0x117   : > { %v940_v62 = vsel %vm921_vm10, %v899_v53, %v901_v42  ;;  %v1077_v38 = vsel %vm1058_vm11, %v1036_v50, %v1038_v54  ;;  %v1458_v19 = vadd.f32 %v3493_v61, %v3662_v2  ;;  %v3826_v60 = vsel %vm564_vm13, 1.0, %v5798_v14  ;;  %v2955_v2 = vld [vmem:[%s5640_s11 + $0x38] sm:$0xff]  }
 0x118   : > { %v1308_v5 = vadd.f32 %v1276_v47, %v1226_v10  ;;  %v1195_v18 = vmul.f32 %v3437_v12, %v940_v62  ;;  %v3823_v25 = vpop.f32.mrf.mxu0  ;;  %5803 = vst [vmem:[#allocation41_spill] sm:$0xff] %v3826_v60  ;;  %v1420_v6 = vadd.f32 %v1388_v58, %v1306_v52  ;;  %v1357_v15 = vmul.f32 %v3447_v20, %v1077_v38 }
 0x119   : > { %v799_v53 = vadd.f32 %v3690_v16, %v3423_v1  ;;  %v3832_v46 = vsel %vm595_vm14, 1.0, %v5798_v14  ;;  %v1277_v10 = vmul.f32 %v3420_v0, %v3755_v59  ;;  %v3842_v52 = vadd.f32 %v3700_v43, %v3417_v63  ;;  %2601 = vmatpush1.bf16.msra.mxu1 %v2955_v2 }
 0x11a   : > { %5804 = vst [vmem:[#allocation42_spill] sm:$0xff] %v3832_v46  ;;  %v1227_v50 = vmul.f32 %v1195_v18, %v3510_v11  ;;  %v3844_v47 = vpop.f32.mrf.mxu0  ;;  %v3847_v16 = vadd.s32 4294967104, %v3811_v28  ;;  %v2842_v58 = vmul.f32 -1.442695, %v1457_v57  ;;  %v1389_v62 = vmul.f32 %v1357_v15, %v3513_v13 }
 0x11b   : > { %v902_v38 = vrot.slane %v799_v53, 7  ;;  %v1039_v46 = vrot.slane %v799_v53, 1  ;;  %v2843_v60 = vmul.f32 -1.442695, %v1458_v19  ;;  %v903_v33 = vrot.slane %v3842_v52, 7 }
 0x11c   : > { %v1309_v18 = vadd.f32 %v1277_v10, %v1227_v50  ;;  %v5692_v59 = vrot.slane %v3842_v52, 1  ;;  %v3852_v9 = vpop.f32.mrf.mxu0  ;;  %v5805_v43 = vmov 0   ;;  %v3855_v3 = vadd.f32 %v1389_v62, %v1307_v48 }
 0x11d   : > { %2602 = vmatprep.subr.bf16.mxu1 %v5805_v43  ;;  %v941_v57 = vsel %vm921_vm10, %v900_v4, %v902_v38  ;;  %v1078_v15 = vsel %vm1058_vm11, %v1037_v56, %v1039_v46  ;;  %v3863_v19 = vadd.f32 %v3723_v45, %v3423_v1  ;;  %v1460_v2 = vadd.f32 %v3493_v61, %v3718_v27  ;;  %v2956_v4 = vld [vmem:[%s5640_s11 + $0x30] sm:$0xff]  }
 0x11e   : > { %v1196_v50 = vmul.f32 %v3453_v23, %v941_v57  ;;  %v1358_v10 = vmul.f32 %v3470_v35, %v1078_v15  ;;  %v938_v48 = vsel %vm921_vm10, %v901_v42, %v903_v33  ;;  %v3871_v62 = vpop.f32.mrf.mxu0  ;;  %2967 = vpow2.f32 %v2842_v58  ;;  %2603 = vmatpush1.bf16.msra.mxu1 %v2956_v4 }
 0x11f   : > { %5806 = vst [vmem:[#allocation43_spill] sm:$0xff] %v3871_v62  ;;  %v1075_v45 = vsel %vm1058_vm11, %v1038_v54, %v5692_v59  ;;  %v1197_v27 = vmul.f32 %v3437_v12, %v938_v48  ;;  %vm517_vm15 = vcmp.ge.s32.totalorder %v3811_v28, 192  ;;  %2969 = vpow2.f32 %v2843_v60  ;;  %2604 = vmatprep.subr.bf16.mxu1 %v5805_v43 }
 0x120   : > { %v1228_v56 = vmul.f32 %v1196_v50, %v3510_v11  ;;  %v1278_v42 = vmul.f32 %v3431_v8, %v799_v53  ;;  %v1390_v57 = vmul.f32 %v1358_v10, %v3513_v13  ;;  %v3885_v15 = vpop.f32.mrf.mxu0  ;;  %v1279_v62 = vmul.f32 %v3420_v0, %v3842_v52 }
 0x121   : > { %5807 = vst [vmem:[#allocation44_spill] sm:$0xff] %v3885_v15  ;;  %v1229_v58 = vmul.f32 %v1197_v27, %v3521_v17  ;;  %v1359_v54 = vmul.f32 %v3447_v20, %v1075_v45  ;;  %v904_v48 = vrot.slane %v3863_v19, 7  ;;  %v2845_v60 = vmul.f32 -1.442695, %v1460_v2 }
 0x122   : > { %v1310_v50 = vadd.f32 %v1278_v42, %v1228_v56  ;;  %v3893_v59 = vadd.f32 %v1390_v57, %v1308_v5  ;;  %v1041_v53 = vrot.slane %v3863_v19, 1  ;;  %v3896_v10 = vpop.f32.mrf.mxu0  ;;  %v1462_v4 = vadd.f32 %v3493_v61, %v3770_v39 }
 0x123   : > { %v1311_v27 = vadd.f32 %v1279_v62, %v1229_v58  ;;  %v1391_v13 = vmul.f32 %v1359_v54, %v3528_v21  ;;  %v939_v45 = vsel %vm921_vm10, %v902_v38, %v904_v48  ;;  %v1459_v15 = vadd.f32 %v3484_v49, %v3687_v51 }
 0x124   : > { %v1076_v5 = vsel %vm1058_vm11, %v1039_v46, %v1041_v53  ;;  %v1198_v2 = vmul.f32 %v3453_v23, %v939_v45  ;;  %v807_v56 = vadd.f32 %v3735_v24, %v3417_v63  ;;  %vm596_vm1 = vcmp.ne.s32.totalorder %v3757_v26, 191  ;;  %v3911_v39 = vpop.f32.mrf.mxu0 }
 0x125   : > { %v1464_v62 = vadd.f32 %v3493_v61, %v1420_v6  ;;  %v3914_v42 = vadd.f32 %v1391_v13, %v1309_v18  ;;  %v1360_v38 = vmul.f32 %v3470_v35, %v1076_v5  ;;  %v3919_v51 = vadd.f32 %v3748_v55, %v3423_v1 }
 0x126   : > { %v3923_v46 = vmul.f32 %v3420_v0, %v3537_v29  ;;  %v1230_v24 = vmul.f32 %v1198_v2, %v3521_v17  ;;  %v1280_v57 = vmul.f32 %v3431_v8, %v3863_v19  ;;  %v905_v58 = vrot.slane %v807_v56, 7  ;;  %v3928_v54 = vpop.f32.mrf.mxu0 }
 0x127   : > { %2971 = vpow2.f32 %v2845_v60  ;;  %v2847_v13 = vmul.f32 -1.442695, %v1462_v4  ;;  %v1392_v6 = vmul.f32 %v1360_v38, %v3528_v21  ;;  %v1042_v18 = vrot.slane %v807_v56, 1 }
 0x128   : > { %5808 = vst [vmem:[#allocation45_spill] sm:$0xff] %v3923_v46  ;;  %v1312_v45 = vadd.f32 %v1280_v57, %v1230_v24  ;;  %v936_v55 = vsel %vm921_vm10, %v903_v33, %v905_v58  ;;  %v5695_v5 = vrot.slane %v3919_v51, 7  ;;  %v3938_v2 = vsel %vm517_vm15, %v3847_v16, %v3811_v28  ;;  %v3940_v19 = vpop.f32.mrf.mxu0 }
 0x129   : > { %5809 = vst [vmem:[#allocation46_spill] sm:$0xff] %v3938_v2  ;;  %5810 = vst [vmem:[#allocation47_spill] sm:$0xff] %v3940_v19  ;;  %v2844_v46 = vmul.f32 -1.442695, %v1459_v15  ;;  %v2849_v60 = vmul.f32 -1.442695, %v1464_v62  ;;  %v3942_v4 = vadd.f32 %v1392_v6, %v1310_v50  ;;  %v1199_v33 = vmul.f32 %v3437_v12, %v936_v55 }
 0x12a   : > { %v5811_v38 = vrot.slane %v3842_v52, 1  ;;  %v937_v28 = vsel %vm921_vm10, %v904_v48, %v5695_v5  ;;  %v5696_v16 = vrot.slane %v3919_v51, 1  ;;  %v3955_v15 = vpop.f32.mrf.mxu0  ;;  %v2957_v52 = vld [vmem:[%s5640_s11 + $0x28] sm:$0xff]   ;;  %v1461_v50 = vadd.f32 %v3484_v49, %v3737_v32 }
 0x12b   : > { %5812 = vst [vmem:[#allocation48_spill] sm:$0xff] %v3955_v15  ;;  %2973 = vpow2.f32 %v2847_v13  ;;  %v1281_v62 = vmul.f32 %v3420_v0, %v807_v56  ;;  %v1200_v6 = vmul.f32 %v3453_v23, %v937_v28  ;;  %v2968_v55 = vpop.eup %2967  ;;  %v3972_v5 = vadd.f32 %v3763_v34, %v3417_v63  ;;  %2605 = vmatpush1.bf16.msra.mxu1 %v2957_v52 }
 0x12c   : > { %v1073_v24 = vsel %vm1058_vm11, %v5811_v38, %v1042_v18  ;;  %v1231_v38 = vmul.f32 %v1199_v33, %v3531_v22  ;;  %v3974_v32 = vpop.f32.mrf.mxu0  ;;  %v2970_v56 = vpop.eup %2969  ;;  %2975 = vpow2.f32 %v2849_v60  ;;  %v1282_v33 = vmul.f32 %v3431_v8, %v3919_v51  ;;  %2606 = vmatprep.subr.bf16.mxu1 %v5805_v43 }
 0x12d   : > { %v1361_v57 = vmul.f32 %v3447_v20, %v1073_v24  ;;  %v1074_v24 = vsel %vm1058_vm11, %v1041_v53, %v5696_v16  ;;  %5813 = vst [vmem:[#allocation49_spill] sm:$0xff] %v3974_v32  ;;  %v1232_v13 = vmul.f32 %v1200_v6, %v3531_v22  ;;  %v5701_v34 = vrot.slane %v3972_v5, 7 }
 0x12e   : > { %v1313_v28 = vadd.f32 %v1281_v62, %v1231_v38  ;;  %v5702_v16 = vrot.slane %v3972_v5, 1  ;;  %v3985_v29 = vpop.f32.mrf.mxu0  ;;  %v3989_v60 = vmul.f32 %v3431_v8, %v3555_v37  ;;  %v3997_v62 = vsel %vm596_vm1, 1.0, %v5798_v14  ;;  %v5817_v37 = vld [vmem:[#allocation22_spill] sm:$0xff] }
 0x12f   : > { %v1393_v48 = vmul.f32 %v1361_v57, %v3540_v31  ;;  %v1362_v57 = vmul.f32 %v3470_v35, %v1074_v24  ;;  %5814 = vst [vmem:[#allocation50_spill] sm:$0xff] %v3985_v29  ;;  %v3991_v52 = vadd.f32 %v1282_v33, %v1232_v13  ;;  %5816 = vst [vmem:[#allocation52_spill] sm:$0xff] %v3997_v62  ;;  %2977 = vpow2.f32 %v2844_v46  ;;  %v2958_v46 = vld [vmem:[%s5640_s11 + $0x20] sm:$0xff]  }
 0x130   : > { %5815 = vst [vmem:[#allocation51_spill] sm:$0xff] %v3989_v60  ;;  %v1463_v38 = vadd.f32 %v3484_v49, %v3785_v40  ;;  %v1071_v24 = vsel %vm1058_vm11, %v1042_v18, %v5702_v16  ;;  %v886_v13 = vpop.f32.mrf.mxu0  ;;  %v1466_v26 = vadd.f32 %v3493_v61, %v3893_v59  ;;  %v1585_v60 = vadd.f32 1.0, %v2968_v55  ;;  %v5819_v16 = vld [vmem:[#allocation23_spill] sm:$0xff]  ;;  %2607 = vmatpush1.bf16.msra.mxu1 %v2958_v46 }
 0x131   : > { %v3981_v53 = vadd.f32 %v1393_v48, %v1311_v27  ;;  %v1394_v6 = vmul.f32 %v1362_v57, %v3540_v31  ;;  %v2846_v27 = vmul.f32 -1.442695, %v1461_v50  ;;  %v934_v48 = vsel %vm921_vm10, %v905_v58, %v5701_v34  ;;  %v1793_v50 = vpop.f32.mrf.mxu1  ;;  %2608 = vmatprep.subr.bf16.mxu1 %v5805_v43 }
 0x132   : > { %v1201_v57 = vmul.f32 %v3437_v12, %v934_v48  ;;  %v1363_v40 = vmul.f32 %v3447_v20, %v1071_v24  ;;  %v4016_v58 = vadd.f32 %v1793_v50, %v5817_v37  ;;  %v4020_v34 = vadd.f32 %v3773_v30, %v3423_v1  ;;  %v887_v18 = vpop.f32.mrf.mxu0 }
 0x133   : > { %v4011_v33 = vadd.f32 %v1394_v6, %v1312_v45  ;;  %v1586_v13 = vadd.f32 1.0, %v2970_v56  ;;  %v1283_v45 = vmul.f32 %v3420_v0, %v3972_v5  ;;  %v5820_v6 = vld [vmem:[#allocation24_spill] sm:$0xff]  ;;  %2979 = vpow2.f32 %v2846_v27 }
 0x134   : > { %5818 = vst [vmem:[#allocation22_spill] sm:$0xff] %v4016_v58  ;;  %v1233_v59 = vmul.f32 %v1201_v57, %v5819_v16  ;;  %v1395_v48 = vmul.f32 %v1363_v40, %v5820_v6  ;;  %v2972_v55 = vpop.eup %2971  ;;  %v2848_v24 = vmul.f32 -1.442695, %v1463_v38  ;;  %v1465_v30 = vadd.f32 %v3484_v49, %v3855_v3  ;;  %v5821_v40 = vld [vmem:[#allocation33_spill] sm:$0xff] }
 0x135   : > { %v5706_v50 = vrot.slane %v4020_v34, 7  ;;  %v2851_v56 = vmul.f32 -1.442695, %v1466_v26  ;;  %v5703_v29 = vrot.slane %v4020_v34, 1  ;;  %v4039_v32 = vmul.f32 %v3447_v20, %v5821_v40  ;;  %v1795_v26 = vpop.f32.mrf.mxu1 }
 0x136   : > { %v4032_v18 = vadd.f32 %v1283_v45, %v1233_v59  ;;  %v4034_v57 = vadd.f32 %v1395_v48, %v1313_v28  ;;  %2981 = vrcp.f32 %v1585_v60  ;;  %v5822_v27 = vrot.slane %v3919_v51, 7 }
 0x137   : > { %v4049_v38 = vadd.f32 %v3788_v41, %v3417_v63  ;;  %vm565_vm2 = vcmp.ne.s32.totalorder %v3938_v2, 0  ;;  %2983 = vrcp.f32 %v1586_v13  ;;  %v1588_v28 = vadd.f32 1.0, %v2972_v55  ;;  %v2959_v41 = vld [vmem:[%s5640_s11 + $0x18] sm:$0xff]   ;;  %v5824_v55 = vld [vmem:[#allocation35_spill] sm:$0xff] }
 0x138   : > { %v935_v3 = vsel %vm921_vm10, %v5822_v27, %v5706_v50  ;;  %v1468_v60 = vadd.f32 %v3493_v61, %v3942_v4  ;;  %v5823_v59 = vrot.slane %v3919_v51, 1  ;;  %v2974_v48 = vpop.eup %2973  ;;  %2985 = vpow2.f32 %v2848_v24  ;;  %2609 = vmatpush1.bf16.msra.mxu1 %v2959_v41 }
 0x139   : > { %v1202_v46 = vmul.f32 %v3453_v23, %v935_v3  ;;  %v1348_v40 = vmul.f32 %v3470_v35, %v5824_v55  ;;  %v2850_v27 = vmul.f32 -1.442695, %v1465_v30  ;;  %2987 = vpow2.f32 %v2851_v56  ;;  %2610 = vmatprep.subr.bf16.mxu1 %v5805_v43  ;;  %v1797_v56 = vpop.f32.mrf.mxu1 }
 0x13a   : > { %v1072_v45 = vsel %vm1058_vm11, %v5823_v59, %v5703_v29  ;;  %v1467_v51 = vadd.f32 %v3484_v49, %v3914_v42  ;;  %v2976_v59 = vpop.eup %2975  ;;  %v1284_v24 = vmul.f32 %v3431_v8, %v4020_v34  ;;  %v5704_v3 = vrot.slane %v4049_v38, 7 }
 0x13b   : > { %v1364_v4 = vmul.f32 %v3470_v35, %v1072_v45  ;;  %v1234_v29 = vmul.f32 %v1202_v46, %v5819_v16  ;;  %2989 = vrcp.f32 %v1588_v28  ;;  %v1590_v45 = vadd.f32 1.0, %v2974_v48 }
 0x13c   : > { %v2853_v30 = vmul.f32 -1.442695, %v1468_v60  ;;  %v5705_v55 = vrot.slane %v4049_v38, 1  ;;  %v4084_v46 = vadd.f32 %v1797_v56, %v5817_v37  ;;  %v4092_v48 = vpop.f32.mrf.mxu0  ;;  %v2852_v60 = vmul.f32 -1.442695, %v1467_v51 }
 0x13d   : > { %v1396_v13 = vmul.f32 %v1364_v4, %v5820_v6  ;;  %v4078_v42 = vadd.f32 %v1284_v24, %v1234_v29  ;;  %v5825_v4 = vrot.slane %v3972_v5, 7  ;;  %5826 = vst [vmem:[#allocation23_spill] sm:$0xff] %v4092_v48  ;;  %v5827_v29 = vrot.slane %v3972_v5, 1  ;;  %v2960_v5 = vld [vmem:[%s5640_s11 + $0x10] sm:$0xff]  }
 0x13e   : > { %v4103_v24 = vadd.f32 %v3807_v36, %v3423_v1  ;;  %v1592_v56 = vadd.f32 1.0, %v2976_v59  ;;  %2991 = vpow2.f32 %v2850_v27  ;;  %v1285_v36 = vmul.f32 %v3420_v0, %v4049_v38  ;;  %2611 = vmatpush1.bf16.msra.mxu1 %v2960_v5  ;;  %v5836_v5 = vld [vmem:[#allocation26_spill] sm:$0xff] }
 0x13f   : > { %v4081_v41 = vadd.f32 %v1396_v13, %v3991_v52  ;;  %v932_v28 = vsel %vm921_vm10, %v5825_v4, %v5704_v3  ;;  %v1069_v52 = vsel %vm1058_vm11, %v5827_v29, %v5705_v55  ;;  %v1470_v4 = vadd.f32 %v3493_v61, %v4011_v33  ;;  %v4108_v3 = vpop.f32.mrf.mxu0  ;;  %v4113_v29 = vpop.eup %2977  ;;  %2612 = vmatprep.subr.bf16.mxu1 %v5805_v43 }
 0x140   : > { %v1203_v13 = vmul.f32 %v3437_v12, %v932_v28  ;;  %v1365_v51 = vmul.f32 %v3447_v20, %v1069_v52  ;;  %5828 = vst [vmem:[#allocation33_spill] sm:$0xff] %v4108_v3  ;;  %5829 = vst [vmem:[#allocation35_spill] sm:$0xff] %v4113_v29  ;;  %2993 = vpow2.f32 %v2853_v30  ;;  %v5830_v28 = vld [vmem:[#allocation29_spill] sm:$0xff]  ;;  %v5707_v27 = vrot.slane %v4103_v24, 7  ;;  %v5831_v52 = vld [vmem:[#allocation31_spill] sm:$0xff]  ;;  %v4125_v29 = vpop.eup %2979 }
 0x141   : > { %2995 = vrcp.f32 %v1590_v45  ;;  %v1469_v33 = vadd.f32 %v3484_v49, %v3981_v53  ;;  %v4123_v3 = vpop.f32.mrf.mxu0  ;;  %5833 = vst [vmem:[#allocation54_spill] sm:$0xff] %v4125_v29  ;;  %v4138_v53 = vsel %vm565_vm2, 1.0, %v5798_v14  ;;  %v4142_v59 = vadd.f32 %v1795_v26, %v5836_v5 }
 0x142   : > { %v1235_v55 = vmul.f32 %v1203_v13, %v5830_v28  ;;  %v1397_v50 = vmul.f32 %v1365_v51, %v5831_v52  ;;  %5832 = vst [vmem:[#allocation53_spill] sm:$0xff] %v4123_v3  ;;  %2997 = vpow2.f32 %v2852_v60  ;;  %v5834_v13 = vrot.slane %v4020_v34, 7  ;;  %5835 = vst [vmem:[#allocation55_spill] sm:$0xff] %v4138_v53 }
 0x143   : > { %v2855_v51 = vmul.f32 -1.442695, %v1470_v4  ;;  %5837 = vst [vmem:[#allocation26_spill] sm:$0xff] %v4142_v59  ;;  %v4150_v29 = vpop.eup %2981  ;;  %2999 = vrcp.f32 %v1592_v56  ;;  %v5845_v60 = vrot.slane %v4016_v58, 7  ;;  %v5847_v48 = vrot.slane %v4020_v34, 1 }
 0x144   : > { %v4127_v30 = vadd.f32 %v1285_v36, %v1235_v55  ;;  %v933_v45 = vsel %vm921_vm10, %v5834_v13, %v5707_v27  ;;  %v4145_v55 = vadd.f32 %v1397_v50, %v4032_v18  ;;  %v4148_v36 = vpop.f32.mrf.mxu0  ;;  %5839 = vst [vmem:[#allocation57_spill] sm:$0xff] %v4150_v29  ;;  %v5840_v13 = vld [vmem:[#allocation10_spill] sm:$0xff]  ;;  %v4160_v4 = vpop.eup %2983  ;;  %v2854_v50 = vmul.f32 -1.442695, %v1469_v33 }
 0x145   : > { %5838 = vst [vmem:[#allocation56_spill] sm:$0xff] %v4148_v36  ;;  %v4154_v27 = vmul.f32 %v4039_v32, %v5840_v13  ;;  %v4157_v3 = vmul.f32 %v1348_v40, %v5840_v13  ;;  %v1204_v26 = vmul.f32 %v3453_v23, %v933_v45  ;;  %5843 = vst [vmem:[#allocation60_spill] sm:$0xff] %v4160_v4  ;;  %v5844_v18 = vrot.slane %v4084_v46, 7  ;;  %v1799_v36 = vpop.f32.mrf.mxu1  ;;  %v4180_v45 = vpop.eup %2985 }
 0x146   : > { %v5846_v32 = vrot.slane %v4103_v24, 1  ;;  %v4176_v56 = vadd.f32 %v3823_v25, %v3417_v63  ;;  %v4178_v33 = vpop.f32.mrf.mxu0  ;;  %5849 = vst [vmem:[#allocation62_spill] sm:$0xff] %v4180_v45  ;;  %v4183_v4 = vadd.f32 %v1799_v36, %v5836_v5  ;;  %v2988_v13 = vpop.eup %2987  ;;  %3001 = vpow2.f32 %v2855_v51  ;;  %v5850_v25 = vld [vmem:[#allocation27_spill] sm:$0xff] }
 0x147   : > { %5841 = vst [vmem:[#allocation58_spill] sm:$0xff] %v4154_v27  ;;  %5842 = vst [vmem:[#allocation59_spill] sm:$0xff] %v4157_v3  ;;  %v1945_v29 = vsel %vm921_vm10, %v5845_v60, %v5844_v18  ;;  %v1236_v60 = vmul.f32 %v1204_v26, %v5830_v28  ;;  %v1286_v18 = vmul.f32 %v3431_v8, %v4103_v24  ;;  %3003 = vpow2.f32 %v2854_v50  ;;  %v5854_v27 = vld [vmem:[#allocation30_spill] sm:$0xff] }
 0x148   : > { %v1070_v40 = vsel %vm1058_vm11, %v5847_v48, %v5846_v32  ;;  %5848 = vst [vmem:[#allocation61_spill] sm:$0xff] %v4178_v33  ;;  %v4192_v32 = vmul.f32 %v5850_v25, %v4016_v58  ;;  %v4195_v33 = vpop.f32.mrf.mxu0  ;;  %v1471_v36 = vadd.f32 %v3484_v49, %v4034_v57  ;;  %v4203_v51 = vpop.eup %2989  ;;  %v5711_v45 = vrot.slane %v4176_v56, 1 }
 0x149   : > { %v1366_v34 = vmul.f32 %v3470_v35, %v1070_v40  ;;  %5852 = vst [vmem:[#allocation64_spill] sm:$0xff] %v4195_v33  ;;  %v4199_v26 = vadd.f32 %v1286_v18, %v1236_v60  ;;  %v5710_v40 = vrot.slane %v4176_v56, 7  ;;  %5853 = vst [vmem:[#allocation65_spill] sm:$0xff] %v4203_v51  ;;  %v5855_v33 = vld [vmem:[#allocation28_spill] sm:$0xff]  ;;  %v5857_v18 = vrot.slane %v4049_v38, 7 }
 0x14a   : > { %5851 = vst [vmem:[#allocation63_spill] sm:$0xff] %v4192_v32  ;;  %v2131_v32 = vmul.f32 %v5854_v27, %v1945_v29  ;;  %v4210_v14 = vmul.f32 %v5855_v33, %v4142_v59  ;;  %v1594_v29 = vadd.f32 1.0, %v2988_v13  ;;  %v5859_v51 = vrot.slane %v4049_v38, 1 }
 0x14b   : > { %v1398_v3 = vmul.f32 %v1366_v34, %v5831_v52  ;;  %v930_v50 = vsel %vm921_vm10, %v5857_v18, %v5710_v40  ;;  %v4220_v34 = vpop.f32.mrf.mxu0  ;;  %v1472_v18 = vadd.f32 %v3493_v61, %v4081_v41  ;;  %v4237_v13 = vadd.f32 %v3844_v47, %v3423_v1 }
 0x14c   : > { %5856 = vst [vmem:[#allocation30_spill] sm:$0xff] %v4210_v14  ;;  %5858 = vst [vmem:[#allocation66_spill] sm:$0xff] %v4220_v34  ;;  %v1067_v57 = vsel %vm1058_vm11, %v5859_v51, %v5711_v45  ;;  %v2856_v14 = vmul.f32 -1.442695, %v1471_v36  ;;  %v2163_v38 = vmul.f32 %v2131_v32, %v3504_v7  ;;  %v2213_v51 = vmul.f32 %v5850_v25, %v4084_v46  ;;  %v5861_v45 = vld [vmem:[#allocation37_spill] sm:$0xff]  ;;  %v5865_v32 = vld [vmem:[#allocation38_spill] sm:$0xff] }
 0x14d   : > { %v1430_v60 = vadd.f32 %v1398_v3, %v4078_v42  ;;  %v1205_v3 = vmul.f32 %v3437_v12, %v930_v50  ;;  %v4230_v42 = vpop.eup %2991  ;;  %v1367_v40 = vmul.f32 %v3447_v20, %v1067_v57  ;;  %v1287_v36 = vmul.f32 %v3420_v0, %v4176_v56  ;;  %v4256_v6 = vpop.f32.mrf.mxu0 }
 0x14e   : > { %5860 = vst [vmem:[#allocation67_spill] sm:$0xff] %v4230_v42  ;;  %v2994_v48 = vpop.eup %2993  ;;  %v5863_v41 = vrot.slane %v4183_v4, 7  ;;  %v5864_v57 = vrot.slane %v4142_v59, 7  ;;  %v5720_v34 = vrot.slane %v4183_v4, 1  ;;  %5866 = vst [vmem:[#allocation68_spill] sm:$0xff] %v4256_v6  ;;  %3005 = vrcp.f32 %v1594_v29 }
 0x14f   : > { %v1237_v50 = vmul.f32 %v1205_v3, %v5861_v45  ;;  %v4245_v42 = vpop.eup %2995  ;;  %v1399_v52 = vmul.f32 %v1367_v40, %v5865_v32  ;;  %v5869_v15 = vrot.slane %v4016_v58, 1  ;;  %v2857_v40 = vmul.f32 -1.442695, %v1472_v18 }
 0x150   : > { %5862 = vst [vmem:[#allocation37_spill] sm:$0xff] %v4245_v42  ;;  %v1946_v47 = vsel %vm921_vm10, %v5864_v57, %v5863_v41  ;;  %v4258_v3 = vpop.eup %2997  ;;  %v5868_v42 = vrot.slane %v4084_v46, 1  ;;  %v5723_v41 = vrot.slane %v4237_v13, 1  ;;  %v1596_v57 = vadd.f32 1.0, %v2994_v48 }
 0x151   : > { %5867 = vst [vmem:[#allocation69_spill] sm:$0xff] %v4258_v3  ;;  %v4266_v2 = vadd.f32 %v1287_v36, %v1237_v50  ;;  %v5870_v28 = vrot.slane %v4142_v59, 1  ;;  %v1803_v3 = vpop.f32.mrf.mxu1  ;;  %v4276_v6 = vadd.f32 %v1399_v52, %v4127_v30  ;;  %v4278_v58 = vpop.eup %2999  ;;  %v5873_v48 = vrot.slane %v4237_v13, 7  ;;  %v5880_v59 = vld [vmem:[#allocation36_spill] sm:$0xff] }
 0x152   : > { %v2049_v53 = vsel %vm1058_vm11, %v5869_v15, %v5868_v42  ;;  %5871 = vst [vmem:[#allocation70_spill] sm:$0xff] %v4278_v58  ;;  %v5872_v15 = vld [vmem:[#allocation34_spill] sm:$0xff]  ;;  %v4282_v50 = vadd.f32 %v1803_v3, %v5817_v37  ;;  %v5874_v18 = vrot.slane %v4103_v24, 7  ;;  %3007 = vpow2.f32 %v2856_v14  ;;  %v4302_v58 = vpop.f32.mrf.mxu0 }
 0x153   : > { %v2050_v29 = vsel %vm1058_vm11, %v5870_v28, %v5720_v34  ;;  %v2132_v42 = vmul.f32 %v5872_v15, %v1946_v47  ;;  %v5875_v28 = vrot.slane %v4103_v24, 1  ;;  %v4296_v30 = vadd.f32 %v2213_v51, %v2163_v38  ;;  %v5877_v47 = vld [vmem:[#allocation32_spill] sm:$0xff]  ;;  %5879 = vst [vmem:[#allocation71_spill] sm:$0xff] %v4302_v58  ;;  %v3002_v14 = vpop.eup %3001 }
 0x154   : > { %v931_v36 = vsel %vm921_vm10, %v5874_v18, %v5873_v48  ;;  %v4299_v3 = vmul.f32 %v5877_v47, %v2049_v53  ;;  %v2294_v19 = vmul.f32 %v5880_v59, %v2050_v29  ;;  %v4309_v24 = vadd.f32 %v3852_v9, %v3417_v63  ;;  %v4320_v9 = vpop.eup %3003 }
 0x155   : > { %v1068_v52 = vsel %vm1058_vm11, %v5875_v28, %v5723_v41  ;;  %5876 = vst [vmem:[#allocation34_spill] sm:$0xff] %v4296_v30  ;;  %v1206_v34 = vmul.f32 %v3453_v23, %v931_v36  ;;  %3009 = vpow2.f32 %v2857_v40  ;;  %v2214_v53 = vmul.f32 %v5855_v33, %v4183_v4  ;;  %5881 = vst [vmem:[#allocation36_spill] sm:$0xff] %v4320_v9 }
 0x156   : > { %5878 = vst [vmem:[#allocation32_spill] sm:$0xff] %v4299_v3  ;;  %v1368_v18 = vmul.f32 %v3470_v35, %v1068_v52  ;;  %v1288_v51 = vmul.f32 %v3431_v8, %v4237_v13  ;;  %3011 = vrcp.f32 %v1596_v57  ;;  %v1473_v29 = vadd.f32 %v3484_v49, %v4145_v55  ;;  %v1805_v52 = vpop.f32.mrf.mxu1  ;;  %v2961_v57 = vld [vmem:[%s5640_s11 + $0x8] sm:$0xff]   ;;  %v4330_v55 = vpop.f32.mrf.mxu0 }
 0x157   : > { %v1238_v38 = vmul.f32 %v1206_v34, %v5861_v45  ;;  %v2164_v36 = vmul.f32 %v2132_v42, %v3504_v7  ;;  %v1474_v40 = vadd.f32 %v3493_v61, %v1430_v60  ;;  %5882 = vst [vmem:[#allocation72_spill] sm:$0xff] %v4330_v55  ;;  %v5883_v7 = vld [vmem:[#allocation17_spill] sm:$0xff]  ;;  %v5886_v60 = vrot.slane %v4084_v46, 7  ;;  %2613 = vmatpush1.bf16.msra.mxu1 %v2961_v57  ;;  %v5892_v57 = vld [vmem:[#allocation43_spill] sm:$0xff] }
 0x158   : > { %v1400_v28 = vmul.f32 %v1368_v18, %v5865_v32  ;;  %v4333_v42 = vmul.f32 %v2294_v19, %v5883_v7  ;;  %v5885_v18 = vrot.slane %v4282_v50, 7  ;;  %v1598_v34 = vadd.f32 1.0, %v3002_v14  ;;  %2614 = vmatprep.subr.bf16.mxu1 %v5805_v43 }
 0x159   : > { %v4323_v41 = vadd.f32 %v1288_v51, %v1238_v38  ;;  %v4342_v51 = vadd.f32 %v1805_v52, %v5836_v5  ;;  %v5887_v9 = vrot.slane %v4309_v24, 7  ;;  %v5888_v19 = vrot.slane %v4176_v56, 7 }
 0x15a   : > { %5884 = vst [vmem:[#allocation73_spill] sm:$0xff] %v4333_v42  ;;  %v1943_v38 = vsel %vm921_vm10, %v5886_v60, %v5885_v18  ;;  %v1432_v48 = vadd.f32 %v1400_v28, %v4199_v26  ;;  %v5889_v7 = vrot.slane %v4309_v24, 1  ;;  %v5890_v42 = vrot.slane %v4176_v56, 1  ;;  %v1890_v18 = vpop.f32.mrf.mxu0  ;;  %v2962_v26 = vld [vmem:[%s5640_s11] sm:$0xff]  }
 0x15b   : > { %v928_v3 = vsel %vm921_vm10, %v5888_v19, %v5887_v9  ;;  %v2858_v14 = vmul.f32 -1.442695, %v1473_v29  ;;  %v4361_v28 = vadd.f32 %v2214_v53, %v2164_v36  ;;  %v2859_v19 = vmul.f32 -1.442695, %v1474_v40  ;;  %v1807_v53 = vpop.f32.mrf.mxu1  ;;  %v5893_v36 = vld [vmem:[#allocation39_spill] sm:$0xff]  ;;  %v4377_v40 = vpop.eup %3005  ;;  %2615 = vmatpush1.bf16.msra.mxu1 %v2962_v26 }
 0x15c   : > { %v1065_v52 = vsel %vm1058_vm11, %v5890_v42, %v5889_v7  ;;  %v1207_v60 = vmul.f32 %v3437_v12, %v928_v3  ;;  %v2133_v56 = vmul.f32 %v5854_v27, %v1943_v38  ;;  %v4370_v42 = vadd.f32 %v5892_v57, %v3423_v1  ;;  %v1891_v18 = vpop.f32.mrf.mxu0  ;;  %5895 = vst [vmem:[#allocation43_spill] sm:$0xff] %v4377_v40 }
 0x15d   : > { %5891 = vst [vmem:[#allocation74_spill] sm:$0xff] %v4361_v28  ;;  %v1369_v9 = vmul.f32 %v3447_v20, %v1065_v52  ;;  %v1289_v3 = vmul.f32 %v3420_v0, %v4309_v24  ;;  %v5894_v52 = vld [vmem:[#allocation40_spill] sm:$0xff]  ;;  %3013 = vrcp.f32 %v1598_v34  ;;  %v5896_v38 = vrot.slane %v4282_v50, 1  ;;  %2624 = vmatprep.subr.bf16.mxu1 %v5805_v43 }
 0x15e   : > { %v1239_v30 = vmul.f32 %v1207_v60, %v5893_v36  ;;  %v5897_v7 = vrot.slane %v4084_v46, 1  ;;  %v4386_v18 = vadd.f32 %v1807_v53, %v5817_v37  ;;  %v5724_v60 = vrot.slane %v4370_v42, 7 }
 0x15f   : > { %v1401_v28 = vmul.f32 %v1369_v9, %v5894_v52  ;;  %v2963_v9 = vld [vmem:[%s5640_s11 + $0x58] sm:$0xff]   ;;  %3015 = vpow2.f32 %v2858_v14  ;;  %v2215_v34 = vmul.f32 %v5850_v25, %v4282_v50  ;;  %v5898_v26 = vrot.slane %v4237_v13, 7 }
 0x160   : > { %v2047_v57 = vsel %vm1058_vm11, %v5897_v7, %v5896_v38  ;;  %v4394_v29 = vadd.f32 %v1289_v3, %v1239_v30  ;;  %3017 = vpow2.f32 %v2859_v19  ;;  %v2165_v7 = vmul.f32 %v2133_v56, %v3510_v11  ;;  %v4408_v38 = vpop.eup %3007  ;;  %2625 = vmatpush2.bf16.msra.mxu1 %v2963_v9 }
 0x161   : > { %v4397_v46 = vadd.f32 %v1401_v28, %v4266_v2  ;;  %v929_v14 = vsel %vm921_vm10, %v5898_v26, %v5724_v60  ;;  %5899 = vst [vmem:[#allocation39_spill] sm:$0xff] %v4408_v38  ;;  %v4411_v30 = vmul.f32 %v5877_v47, %v2047_v57  ;;  %v5901_v2 = vrot.slane %v4342_v51, 7  ;;  %v1809_v60 = vpop.f32.mrf.mxu1  ;;  %2626 = vmatprep.subr.bf16.mxu1 %v5805_v43 }
 0x162   : > { %v5902_v28 = vrot.slane %v4183_v4, 7  ;;  %v5903_v56 = vrot.slane %v4342_v51, 1  ;;  %v5904_v3 = vrot.slane %v4183_v4, 1  ;;  %v1208_v53 = vmul.f32 %v3453_v23, %v929_v14  ;;  %v3010_v14 = vpop.eup %3009 }
 0x163   : > { %5900 = vst [vmem:[#allocation75_spill] sm:$0xff] %v4411_v30  ;;  %v1476_v57 = vadd.f32 %v3493_v61, %v1432_v48  ;;  %v4429_v30 = vadd.f32 %v1809_v60, %v5836_v5  ;;  %v5905_v40 = vrot.slane %v4370_v42, 1  ;;  %v1600_v32 = vadd.f32 1.0, %v3010_v14 }
 0x164   : > { %v1944_v19 = vsel %vm921_vm10, %v5902_v28, %v5901_v2  ;;  %v2048_v26 = vsel %vm1058_vm11, %v5904_v3, %v5903_v56  ;;  %v5906_v2 = vrot.slane %v4237_v13, 1  ;;  %v2964_v28 = vld [vmem:[%s5640_s11 + $0x50] sm:$0xff]   ;;  %v1240_v48 = vmul.f32 %v1208_v53, %v5893_v36  ;;  %v5907_v3 = vld [vmem:[#allocation44_spill] sm:$0xff]  ;;  %v4449_v13 = vpop.eup %3011 }
 0x165   : > { %v1290_v56 = vmul.f32 %v3431_v8, %v4370_v42  ;;  %v4446_v38 = vadd.f32 %v5907_v3, %v3417_v63  ;;  %5908 = vst [vmem:[#allocation44_spill] sm:$0xff] %v4449_v13  ;;  %v2134_v9 = vmul.f32 %v5872_v15, %v1944_v19  ;;  %v2216_v53 = vmul.f32 %v5855_v33, %v4342_v51  ;;  %v5914_v13 = vld [vmem:[#allocation18_spill] sm:$0xff] }
 0x166   : > { %v1066_v4 = vsel %vm1058_vm11, %v5906_v2, %v5905_v40  ;;  %v4451_v40 = vadd.f32 %v2215_v34, %v2165_v7  ;;  %v2296_v2 = vmul.f32 %v5880_v59, %v2048_v26  ;;  %v5910_v34 = vrot.slane %v4386_v18, 7  ;;  %2627 = vmatpush2.bf16.msra.mxu1 %v2964_v28 }
 0x167   : > { %v1370_v60 = vmul.f32 %v3470_v35, %v1066_v4  ;;  %v1475_v4 = vadd.f32 %v3484_v49, %v4276_v6  ;;  %v4459_v55 = vadd.f32 %v1290_v56, %v1240_v48  ;;  %v5727_v58 = vrot.slane %v4446_v38, 7  ;;  %v2965_v6 = vld [vmem:[%s5640_s11 + $0x48] sm:$0xff]   ;;  %2628 = vmatprep.subr.bf16.mxu1 %v5805_v43 }
 0x168   : > { %5909 = vst [vmem:[#allocation76_spill] sm:$0xff] %v4451_v40  ;;  %v5911_v7 = vrot.slane %v4282_v50, 7  ;;  %v5728_v26 = vrot.slane %v4446_v38, 1  ;;  %v2861_v48 = vmul.f32 -1.442695, %v1476_v57  ;;  %v2166_v28 = vmul.f32 %v2134_v9, %v3510_v11  ;;  %v1813_v40 = vpop.f32.mrf.mxu1 }
 0x169   : > { %v1402_v3 = vmul.f32 %v1370_v60, %v5894_v52  ;;  %v5912_v60 = vrot.slane %v4309_v24, 7  ;;  %v5913_v57 = vrot.slane %v4309_v24, 1  ;;  %v2860_v56 = vmul.f32 -1.442695, %v1475_v4 }
 0x16a   : > { %v1941_v19 = vsel %vm921_vm10, %v5911_v7, %v5910_v34  ;;  %v4493_v52 = vmul.f32 %v2296_v2, %v5914_v13  ;;  %v4498_v9 = vadd.f32 %v1813_v40, %v5817_v37  ;;  %v1291_v24 = vmul.f32 %v3420_v0, %v4446_v38  ;;  %2629 = vmatpush2.bf16.msra.mxu1 %v2965_v6  ;;  %v2966_v2 = vld [vmem:[%s5640_s11 + $0x40] sm:$0xff]   ;;  %v4510_v4 = vpop.eup %3013 }
 0x16b   : > { %v1434_v14 = vadd.f32 %v1402_v3, %v4323_v41  ;;  %v926_v34 = vsel %vm921_vm10, %v5912_v60, %v5727_v58  ;;  %v1063_v41 = vsel %vm1058_vm11, %v5913_v57, %v5728_v26  ;;  %v2135_v60 = vmul.f32 %v5854_v27, %v1941_v19  ;;  %v5916_v58 = vld [vmem:[#allocation41_spill] sm:$0xff]  ;;  %2630 = vmatprep.subr.bf16.mxu1 %v5805_v43 }
 0x16c   : > { %v1209_v3 = vmul.f32 %v3437_v12, %v926_v34  ;;  %5915 = vst [vmem:[#allocation77_spill] sm:$0xff] %v4493_v52  ;;  %v1371_v11 = vmul.f32 %v3447_v20, %v1063_v41  ;;  %v4505_v57 = vadd.f32 %v3896_v10, %v3423_v1  ;;  %5917 = vst [vmem:[#allocation41_spill] sm:$0xff] %v4510_v4  ;;  %3019 = vpow2.f32 %v2861_v48  ;;  %v4526_v4 = vpop.eup %3015  ;;  %v1815_v52 = vpop.f32.mrf.mxu1 }
 0x16d   : > { %v5918_v40 = vrot.slane %v4386_v18, 1  ;;  %v5919_v19 = vrot.slane %v4282_v50, 1  ;;  %v5920_v41 = vrot.slane %v4429_v30, 7  ;;  %v5921_v10 = vrot.slane %v4342_v51, 7  ;;  %5923 = vst [vmem:[#allocation78_spill] sm:$0xff] %v4526_v4 }
 0x16e   : > { %v1241_v7 = vmul.f32 %v1209_v3, %v5916_v58  ;;  %v5922_v3 = vld [vmem:[#allocation42_spill] sm:$0xff]  ;;  %v5924_v48 = vrot.slane %v4429_v30, 1  ;;  %v5925_v50 = vrot.slane %v4342_v51, 1  ;;  %3021 = vrcp.f32 %v1600_v32  ;;  %2631 = vmatpush2.bf16.msra.mxu1 %v2966_v2 }
 0x16f   : > { %v2045_v34 = vsel %vm1058_vm11, %v5919_v19, %v5918_v40  ;;  %v1942_v6 = vsel %vm921_vm10, %v5921_v10, %v5920_v41  ;;  %v1403_v26 = vmul.f32 %v1371_v11, %v5922_v3  ;;  %v5730_v19 = vrot.slane %v4498_v9, 7  ;;  %v3018_v10 = vpop.eup %3017 }
 0x170   : > { %v2046_v40 = vsel %vm1058_vm11, %v5925_v50, %v5924_v48  ;;  %v4535_v13 = vadd.f32 %v1291_v24, %v1241_v7  ;;  %v5729_v41 = vrot.slane %v4505_v57, 1  ;;  %v4538_v11 = vadd.f32 %v2216_v53, %v2166_v28 }
 0x171   : > { %v1435_v43 = vadd.f32 %v1403_v26, %v4394_v29  ;;  %v4542_v4 = vadd.f32 %v1815_v52, %v5836_v5  ;;  %3023 = vpow2.f32 %v2860_v56  ;;  %v2167_v51 = vmul.f32 %v2135_v60, %v3521_v17 }
 0x172   : > { %v2217_v48 = vmul.f32 %v5850_v25, %v4386_v18  ;;  %v5926_v7 = vrot.slane %v4370_v42, 1  ;;  %v4554_v53 = vmul.f32 %v5877_v47, %v2045_v34  ;;  %v2136_v29 = vmul.f32 %v5872_v15, %v1942_v6 }
 0x173   : > { %v2298_v52 = vmul.f32 %v5880_v59, %v2046_v40  ;;  %v1478_v26 = vadd.f32 %v3493_v61, %v1434_v14  ;;  %v1602_v56 = vadd.f32 1.0, %v3018_v10  ;;  %v5928_v28 = vrot.slane %v4386_v18, 7 }
 0x174   : > { %v1064_v32 = vsel %vm1058_vm11, %v5926_v7, %v5729_v41  ;;  %5927 = vst [vmem:[#allocation79_spill] sm:$0xff] %v4554_v53  ;;  %v4568_v2 = vadd.f32 %v3911_v39, %v3417_v63  ;;  %v1477_v34 = vadd.f32 %v3484_v49, %v4397_v46  ;;  %v2218_v14 = vmul.f32 %v5855_v33, %v4429_v30  ;;  %v1817_v39 = vpop.f32.mrf.mxu1 }
 0x175   : > { %v1939_v60 = vsel %vm921_vm10, %v5928_v28, %v5730_v19  ;;  %v1372_v24 = vmul.f32 %v3470_v35, %v1064_v32  ;;  %v5732_v6 = vrot.slane %v4542_v4, 7  ;;  %v4576_v40 = vadd.f32 %v2217_v48, %v2167_v51 }
 0x176   : > { %v5733_v10 = vrot.slane %v4498_v9, 1  ;;  %v2863_v28 = vmul.f32 -1.442695, %v1478_v26  ;;  %v2137_v41 = vmul.f32 %v5854_v27, %v1939_v60  ;;  %v4583_v46 = vadd.f32 %v1817_v39, %v5817_v37 }
 0x177   : > { %5929 = vst [vmem:[#allocation80_spill] sm:$0xff] %v4576_v40  ;;  %v1404_v32 = vmul.f32 %v1372_v24, %v5922_v3  ;;  %v5731_v19 = vrot.slane %v4568_v2, 1  ;;  %3025 = vrcp.f32 %v1602_v56  ;;  %v2168_v50 = vmul.f32 %v2136_v29, %v3521_v17 }
 0x178   : > { %v4588_v51 = vmul.f32 %v2298_v52, %v3528_v21  ;;  %v2862_v7 = vmul.f32 -1.442695, %v1477_v34  ;;  %v5931_v26 = vrot.slane %v4429_v30, 7  ;;  %v5932_v24 = vrot.slane %v4542_v4, 1 }
 0x179   : > { %v1436_v48 = vadd.f32 %v1404_v32, %v4459_v55  ;;  %v5933_v39 = vrot.slane %v4429_v30, 1  ;;  %v5934_v29 = vrot.slane %v4446_v38, 1  ;;  %v5935_v52 = vrot.slane %v4386_v18, 1 }
 0x17a   : > { %5930 = vst [vmem:[#allocation81_spill] sm:$0xff] %v4588_v51  ;;  %v1940_v60 = vsel %vm921_vm10, %v5931_v26, %v5732_v6  ;;  %v2219_v30 = vmul.f32 %v5850_v25, %v4498_v9  ;;  %v5936_v34 = vrot.slane %v4505_v57, 7  ;;  %v5937_v32 = vrot.slane %v4370_v42, 7 }
 0x17b   : > { %v2044_v17 = vsel %vm1058_vm11, %v5933_v39, %v5932_v24  ;;  %v1061_v55 = vsel %vm1058_vm11, %v5934_v29, %v5731_v19  ;;  %v2043_v56 = vsel %vm1058_vm11, %v5935_v52, %v5733_v10  ;;  %3027 = vpow2.f32 %v2863_v28  ;;  %v3020_v52 = vpop.eup %3019 }
 0x17c   : > { %v927_v26 = vsel %vm921_vm10, %v5937_v32, %v5936_v34  ;;  %v1373_v24 = vmul.f32 %v3447_v20, %v1061_v55  ;;  %v2169_v39 = vmul.f32 %v2137_v41, %v3531_v22  ;;  %v5734_v18 = vrot.slane %v4583_v46, 7  ;;  %v1819_v32 = vpop.f32.mrf.mxu1  ;;  %v4638_v10 = vpop.eup %3021 }
 0x17d   : > { %v4628_v29 = vadd.f32 %v3928_v54, %v3423_v1  ;;  %v1479_v19 = vadd.f32 %v3484_v49, %v1435_v43  ;;  %v2138_v6 = vmul.f32 %v5872_v15, %v1940_v60  ;;  %v2300_v42 = vmul.f32 %v5880_v59, %v2044_v17  ;;  %5939 = vst [vmem:[#allocation83_spill] sm:$0xff] %v4638_v10 }
 0x17e   : > { %v1405_v34 = vmul.f32 %v1373_v24, %v3997_v62  ;;  %3029 = vpow2.f32 %v2862_v7  ;;  %v4634_v55 = vadd.f32 %v2218_v14, %v2168_v50  ;;  %v1210_v41 = vmul.f32 %v3453_v23, %v927_v26  ;;  %v4649_v14 = vpop.eup %3023 }
 0x17f   : > { %v4641_v54 = vmul.f32 %v5877_v47, %v2043_v56  ;;  %v2220_v43 = vmul.f32 %v5855_v33, %v4542_v4  ;;  %v4647_v17 = vadd.f32 %v1819_v32, %v5836_v5  ;;  %5941 = vst [vmem:[#allocation85_spill] sm:$0xff] %v4649_v14  ;;  %v1604_v50 = vadd.f32 1.0, %v3020_v52 }
 0x180   : > { %5938 = vst [vmem:[#allocation82_spill] sm:$0xff] %v4634_v55  ;;  %v1437_v60 = vadd.f32 %v1405_v34, %v4535_v13  ;;  %v4651_v7 = vadd.f32 %v2219_v30, %v2169_v39  ;;  %v5943_v26 = vrot.slane %v4498_v9, 7  ;;  %v5735_v24 = vrot.slane %v4628_v29, 1 }
 0x181   : > { %5940 = vst [vmem:[#allocation84_spill] sm:$0xff] %v4641_v54  ;;  %v2864_v28 = vmul.f32 -1.442695, %v1479_v19  ;;  %v2170_v13 = vmul.f32 %v2138_v6, %v3531_v22  ;;  %v4662_v34 = vmul.f32 %v2300_v42, %v3540_v31  ;;  %v1292_v52 = vmul.f32 %v3431_v8, %v4505_v57  ;;  %v1823_v6 = vpop.f32.mrf.mxu1 }
 0x182   : > { %5942 = vst [vmem:[#allocation86_spill] sm:$0xff] %v4651_v7  ;;  %v1937_v56 = vsel %vm921_vm10, %v5943_v26, %v5734_v18  ;;  %v1242_v30 = vmul.f32 %v1210_v41, %v5916_v58  ;;  %v5945_v32 = vrot.slane %v4568_v2, 7  ;;  %v5946_v7 = vrot.slane %v4446_v38, 7 }
 0x183   : > { %5944 = vst [vmem:[#allocation87_spill] sm:$0xff] %v4662_v34  ;;  %v5947_v22 = vrot.slane %v4505_v57, 1  ;;  %v2139_v42 = vmul.f32 %v5854_v27, %v1937_v56  ;;  %v4684_v39 = vadd.f32 %v1823_v6, %v5817_v37  ;;  %v1480_v38 = vadd.f32 %v3493_v61, %v1436_v48 }
 0x184   : > { %v924_v26 = vsel %vm921_vm10, %v5946_v7, %v5945_v32  ;;  %v4690_v14 = vadd.s32 120, %v3385_v44  ;;  %3031 = vrcp.f32 %v1604_v50  ;;  %v2221_v56 = vmul.f32 %v5850_v25, %v4583_v46 }
 0x185   : > { %v1062_v19 = vsel %vm1058_vm11, %v5947_v22, %v5735_v24  ;;  %v4692_v22 = vadd.f32 %v2220_v43, %v2170_v13  ;;  %v4697_v24 = vpop.eup %3025  ;;  %v5950_v6 = vrot.slane %v4583_v46, 1  ;;  %v5951_v48 = vrot.slane %v4498_v9, 1  ;;  %v5952_v43 = vld [vmem:[#allocation5_spill] sm:$0xff] }
 0x186   : > { %v1374_v18 = vmul.f32 %v3470_v35, %v1062_v19  ;;  %v1211_v19 = vmul.f32 %v3437_v12, %v924_v26  ;;  %5949 = vst [vmem:[#allocation89_spill] sm:$0xff] %v4697_v24  ;;  %v502_v13 = vadd.s32 %v5952_v43, %v4690_v14  ;;  %3033 = vpow2.f32 %v2864_v28 }
 0x187   : > { %5948 = vst [vmem:[#allocation88_spill] sm:$0xff] %v4692_v22  ;;  %v2041_v32 = vsel %vm1058_vm11, %v5951_v48, %v5950_v6  ;;  %v1324_v41 = vadd.f32 %v1292_v52, %v1242_v30  ;;  %v2171_v26 = vmul.f32 %v2139_v42, %v5819_v16  ;;  %v5953_v24 = vrot.slane %v4647_v17, 7  ;;  %v5959_v42 = vld [vmem:[#allocation47_spill] sm:$0xff] }
 0x188   : > { %v1406_v7 = vmul.f32 %v1374_v18, %v3997_v62  ;;  %v5954_v10 = vrot.slane %v4542_v4, 7  ;;  %v2865_v40 = vmul.f32 -1.442695, %v1480_v38  ;;  %v5955_v6 = vrot.slane %v4647_v17, 1  ;;  %v5961_v38 = vld [vmem:[#allocation46_spill] sm:$0xff] }
 0x189   : > { %v5956_v18 = vrot.slane %v4542_v4, 1  ;;  %v5957_v28 = vrot.slane %v4628_v29, 7  ;;  %v5958_v52 = vrot.slane %v4505_v57, 7  ;;  %v4730_v43 = vadd.f32 %v5959_v42, %v3417_v63  ;;  %v5962_v4 = vld [vmem:[#allocation55_spill] sm:$0xff] }
 0x18a   : > { %v1938_v9 = vsel %vm921_vm10, %v5954_v10, %v5953_v24  ;;  %v3028_v10 = vpop.eup %3027  ;;  %v4733_v24 = vmul.f32 %v5877_v47, %v2041_v32  ;;  %vm597_vm3 = vcmp.ne.s32.totalorder %v5961_v38, 191  ;;  %v1243_v50 = vmul.f32 %v1211_v19, %v5962_v4 }
 0x18b   : > { %v2042_v48 = vsel %vm1058_vm11, %v5956_v18, %v5955_v6  ;;  %v925_v30 = vsel %vm921_vm10, %v5958_v52, %v5957_v28  ;;  %v1293_v6 = vmul.f32 %v3420_v0, %v4568_v2  ;;  %v2222_v57 = vmul.f32 %v5855_v33, %v4647_v17  ;;  %v4748_v54 = vpop.eup %3029 }
 0x18c   : > { %5960 = vst [vmem:[#allocation5_spill] sm:$0xff] %v4733_v24  ;;  %v2140_v18 = vmul.f32 %v5872_v15, %v1938_v9  ;;  %v1438_v28 = vadd.f32 %v1406_v7, %v1324_v41  ;;  %v5963_v52 = vrot.slane %v4684_v39, 7  ;;  %v5964_v42 = vrot.slane %v4583_v46, 7  ;;  %5965 = vst [vmem:[#allocation47_spill] sm:$0xff] %v4748_v54  ;;  %v1825_v9 = vpop.f32.mrf.mxu1 }
 0x18d   : > { %v2822_v24 = vadd.s32 4294967104, %v502_v13  ;;  %v1481_v19 = vadd.f32 %v3484_v49, %v1437_v60  ;;  %v2302_v31 = vmul.f32 %v5880_v59, %v2042_v48  ;;  %v1212_v22 = vmul.f32 %v3453_v23, %v925_v30 }
 0x18e   : > { %v1935_v32 = vsel %vm921_vm10, %v5964_v42, %v5963_v52  ;;  %vm518_vm4 = vcmp.ge.s32.totalorder %v502_v13, 192  ;;  %v1606_v53 = vadd.f32 1.0, %v3028_v10  ;;  %3035 = vpow2.f32 %v2865_v40  ;;  %v5967_v40 = vld [vmem:[#allocation48_spill] sm:$0xff] }
 0x18f   : > { %v4753_v41 = vadd.f32 %v2221_v56, %v2171_v26  ;;  %v919_v7 = vrot.slane %v4730_v43, 7  ;;  %v4756_v21 = vadd.f32 %v1293_v6, %v1243_v50  ;;  %v5738_v52 = vrot.slane %v4684_v39, 1  ;;  %v5968_v6 = vld [vmem:[#allocation24_spill] sm:$0xff] }
 0x190   : > { %v2141_v42 = vmul.f32 %v5854_v27, %v1935_v32  ;;  %v4761_v60 = vadd.f32 %v1825_v9, %v5836_v5  ;;  %v1482_v48 = vadd.f32 %v3493_v61, %v1438_v28  ;;  %v550_v30 = vsel %vm518_vm4, %v2822_v24, %v502_v13 }
 0x191   : > { %5966 = vst [vmem:[#allocation46_spill] sm:$0xff] %v4753_v41  ;;  %v1056_v10 = vrot.slane %v4730_v43, 1  ;;  %v4767_v56 = vadd.f32 %v5967_v40, %v3423_v1  ;;  %v2866_v26 = vmul.f32 -1.442695, %v1481_v19  ;;  %v2172_v50 = vmul.f32 %v2140_v18, %v5819_v16  ;;  %v4790_v19 = vpop.eup %3031 }
 0x192   : > { %v4771_v41 = vmul.f32 %v2302_v31, %v5968_v6  ;;  %v1244_v32 = vmul.f32 %v1212_v22, %v5962_v4  ;;  %3037 = vrcp.f32 %v1606_v53  ;;  %v1294_v9 = vmul.f32 %v3431_v8, %v4628_v29  ;;  %v5972_v22 = vld [vmem:[#allocation29_spill] sm:$0xff] }
 0x193   : > { %v2223_v13 = vmul.f32 %v5850_v25, %v4684_v39  ;;  %v5970_v24 = vrot.slane %v4568_v2, 7  ;;  %v5971_v16 = vrot.slane %v4583_v46, 1  ;;  %v2173_v53 = vmul.f32 %v2141_v42, %v5972_v22  ;;  %5973 = vst [vmem:[#allocation29_spill] sm:$0xff] %v4790_v19  ;;  %v4803_v18 = vpop.eup %3033 }
 0x194   : > { %5969 = vst [vmem:[#allocation48_spill] sm:$0xff] %v4771_v41  ;;  %vm566_vm5 = vcmp.ne.s32.totalorder %v550_v30, 0  ;;  %v2867_v40 = vmul.f32 -1.442695, %v1482_v48  ;;  %v5974_v54 = vrot.slane %v4568_v2, 1  ;;  %v5739_v6 = vrot.slane %v4761_v60, 1 }
 0x195   : > { %v922_v28 = vsel %vm921_vm10, %v5970_v24, %v919_v7  ;;  %v2039_v31 = vsel %vm1058_vm11, %v5971_v16, %v5738_v52  ;;  %v5740_v46 = vrot.slane %v4767_v56, 1  ;;  %3039 = vpow2.f32 %v2866_v26  ;;  %v1827_v52 = vpop.f32.mrf.mxu1  ;;  %5976 = vst [vmem:[#allocation91_spill] sm:$0xff] %v4803_v18  ;;  %v5990_v18 = vld [vmem:[#allocation6_spill] sm:$0xff] }
 0x196   : > { %v1059_v24 = vsel %vm1058_vm11, %v5974_v54, %v1056_v10  ;;  %v4798_v41 = vadd.f32 %v2222_v57, %v2172_v50  ;;  %v4800_v16 = vadd.f32 %v1294_v9, %v1244_v32  ;;  %v1213_v42 = vmul.f32 %v3437_v12, %v922_v28 }
 0x197   : > { %v4806_v48 = vmul.f32 %v5877_v47, %v2039_v31  ;;  %v5978_v2 = vmov 0.0   ;;  %v4817_v57 = vadd.f32 %v1827_v52, %v5817_v37  ;;  %v4819_v26 = vadd.f32 %v2223_v13, %v2173_v53 }
 0x198   : > { %5975 = vst [vmem:[#allocation90_spill] sm:$0xff] %v4798_v41  ;;  %v4809_v19 = vsel %vm566_vm5, 1.0, %v5978_v2  ;;  %v4814_v54 = vsel %vm597_vm3, 1.0, %v5978_v2  ;;  %v1295_v50 = vmul.f32 %v3420_v0, %v4730_v43  ;;  %v1375_v32 = vmul.f32 %v3447_v20, %v1059_v24  ;;  %v5986_v24 = vld [vmem:[#allocation8_spill] sm:$0xff]  ;;  %v1829_v41 = vpop.f32.mrf.mxu1 }
 0x199   : > { %5977 = vst [vmem:[#allocation92_spill] sm:$0xff] %v4806_v48  ;;  %5979 = vst [vmem:[#allocation93_spill] sm:$0xff] %v4809_v19  ;;  %v4826_v9 = vmul.f32 %v5855_v33, %v4761_v60  ;;  %3041 = vpow2.f32 %v2867_v40  ;;  %v5982_v28 = vrot.slane %v4761_v60, 7  ;;  %v5983_v38 = vrot.slane %v4647_v17, 7 }
 0x19a   : > { %5980 = vst [vmem:[#allocation94_spill] sm:$0xff] %v4814_v54  ;;  %5981 = vst [vmem:[#allocation95_spill] sm:$0xff] %v4819_v26  ;;  %v5984_v13 = vrot.slane %v4647_v17, 1  ;;  %v5985_v43 = vrot.slane %v4628_v29, 1  ;;  %v1245_v53 = vmul.f32 %v1213_v42, %v4809_v19  ;;  %v920_v40 = vrot.slane %v4767_v56, 7  ;;  %v5988_v17 = vld [vmem:[#allocation50_spill] sm:$0xff] }
 0x19b   : > { %v1936_v52 = vsel %vm921_vm10, %v5983_v38, %v5982_v28  ;;  %vm551_vm6 = vcmp.ne.s32.totalorder %v5986_v24, 0  ;;  %v5987_v28 = vld [vmem:[#allocation49_spill] sm:$0xff]  ;;  %vm598_vm7 = vcmp.ne.s32.totalorder %v550_v30, 191  ;;  %vm615_vm8 = vcmp.eq.s32.totalorder %v3385_v44, 0  ;;  %v5991_v30 = vld [vmem:[#allocation20_spill] sm:$0xff] }
 0x19c   : > { %v2040_v0 = vsel %vm1058_vm11, %v5984_v13, %v5739_v6  ;;  %v1060_v31 = vsel %vm1058_vm11, %v5985_v43, %v5740_v46  ;;  %v883_v38 = vadd.f32 %v5987_v28, %v3417_v63  ;;  %vm646_vm9 = vcmp.eq.s32.totalorder %v4690_v14, 127  ;;  %v3036_v6 = vpop.eup %3035  ;;  %v5989_v46 = vld [vmem:[#allocation7_spill] sm:$0xff] }
 0x19d   : > { %v885_v13 = vadd.f32 %v5988_v17, %v3423_v1  ;;  %v1407_v43 = vmul.f32 %v1375_v32, %v4814_v54  ;;  %v1376_v42 = vmul.f32 %v3470_v35, %v1060_v31  ;;  %v5992_v28 = vrot.slane %v5991_v30, 7 }
 0x19e   : > { %v989_v26 = vrot.slane %v883_v38, %v5989_v46  ;;  %v1126_v48 = vrot.slane %v883_v38, %v5990_v18  ;;  %v5993_v55 = vrot.slane %v5991_v30, 1  ;;  %v4872_v31 = vsel %vm551_vm6, 1.0, %v5978_v2 }
 0x19f   : > { %v952_v34 = vsel %vm921_vm10, %v919_v7, %v5992_v28  ;;  %v993_v32 = vrot.slane %v885_v13, %v5989_v46  ;;  %v4875_v38 = vsel %vm598_vm7, 1.0, %v5978_v2  ;;  %v5995_v30 = vrot.slane %v4628_v29, 7  ;;  %v5996_v28 = vld [vmem:[#allocation25_spill] sm:$0xff]  ;;  %v4891_v51 = vpop.eup %3037 }
 0x1a0   : > { %v1089_v1 = vsel %vm1058_vm11, %v1056_v10, %v5993_v55  ;;  %5994 = vst [vmem:[#allocation8_spill] sm:$0xff] %v4875_v38  ;;  %v994_v17 = vsel %vm615_vm8, %v989_v26, %v952_v34  ;;  %v5997_v63 = vrot.slane %v5996_v28, 7  ;;  %v1608_v34 = vadd.f32 1.0, %v3036_v6 }
 0x1a1   : > { %v1161_v7 = vsel %vm646_vm9, %v1126_v48, %v1089_v1  ;;  %v923_v55 = vsel %vm921_vm10, %v5995_v30, %v920_v40  ;;  %v1183_v10 = vmul.f32 %v3437_v12, %v994_v17  ;;  %v1439_v26 = vadd.f32 %v1407_v43, %v4756_v21  ;;  %v1833_v1 = vpop.f32.mrf.mxu1 }
 0x1a2   : > { %v1377_v24 = vmul.f32 %v3447_v20, %v1161_v7  ;;  %v953_v2 = vsel %vm921_vm10, %v920_v40, %v5997_v63  ;;  %v2142_v48 = vmul.f32 %v5872_v15, %v1936_v52  ;;  %v1130_v17 = vrot.slane %v885_v13, %v5990_v18 }
 0x1a3   : > { %v995_v29 = vsel %vm615_vm8, %v993_v32, %v953_v2  ;;  %v1215_v12 = vmul.f32 %v1183_v10, %v4872_v31  ;;  %v1327_v40 = vadd.f32 %v1295_v50, %v1245_v53  ;;  %v1214_v63 = vmul.f32 %v3453_v23, %v923_v55  ;;  %v4909_v32 = vpop.eup %3039  ;;  %v6001_v10 = vld [vmem:[#allocation45_spill] sm:$0xff] }
 0x1a4   : > { %v1409_v20 = vmul.f32 %v1377_v24, %v4875_v38  ;;  %v1184_v7 = vmul.f32 %v3453_v23, %v995_v29  ;;  %v1408_v6 = vmul.f32 %v1376_v42, %v4814_v54  ;;  %v5998_v21 = vrot.slane %v4817_v57, 7  ;;  %6000 = vst [vmem:[#allocation49_spill] sm:$0xff] %v4909_v32 }
 0x1a5   : > { %v5999_v52 = vrot.slane %v4684_v39, 7  ;;  %v2304_v30 = vmul.f32 %v5880_v59, %v2040_v0  ;;  %v1297_v13 = vadd.f32 %v6001_v10, %v1215_v12  ;;  %v6002_v24 = vrot.slane %v5996_v28, 1  ;;  %v1835_v0 = vpop.f32.mrf.mxu1  ;;  %v6005_v10 = vld [vmem:[#allocation51_spill] sm:$0xff] }
 0x1a6   : > { %v6003_v50 = vrot.slane %v4767_v56, 1  ;;  %v1216_v53 = vmul.f32 %v1184_v7, %v4872_v31  ;;  %v2174_v42 = vmul.f32 %v2142_v48, %v5972_v22  ;;  %v2019_v55 = vrot.slane %v4817_v57, 1 }
 0x1a7   : > { %v1933_v43 = vsel %vm921_vm10, %v5999_v52, %v5998_v21  ;;  %v1441_v2 = vadd.f32 %v1409_v20, %v1327_v40  ;;  %v1483_v12 = vadd.f32 %v3484_v49, %v1439_v26  ;;  %v6004_v21 = vld [vmem:[#allocation58_spill] sm:$0xff]  ;;  %3043 = vrcp.f32 %v1608_v34  ;;  %v6006_v20 = vld [vmem:[#allocation31_spill] sm:$0xff] }
 0x1a8   : > { %v1090_v23 = vsel %vm1058_vm11, %v6003_v50, %v6002_v24  ;;  %v2143_v28 = vmul.f32 %v5854_v27, %v1933_v43  ;;  %v1411_v52 = vadd.f32 %v6004_v21, %v1297_v13  ;;  %v1298_v54 = vadd.f32 %v6005_v10, %v1216_v53  ;;  %v3042_v24 = vpop.eup %3041  ;;  %v6007_v43 = vld [vmem:[#allocation59_spill] sm:$0xff] }
 0x1a9   : > { %v1162_v29 = vsel %vm646_vm9, %v1130_v17, %v1090_v23  ;;  %v1246_v7 = vmul.f32 %v1214_v63, %v4809_v19  ;;  %v1440_v22 = vadd.f32 %v1408_v6, %v4800_v16  ;;  %v1830_v48 = vadd.f32 %v1829_v41, %v5836_v5  ;;  %v6048_v19 = vld [vmem:[#allocation68_spill] sm:$0xff] }
 0x1aa   : > { %v4932_v40 = vmul.f32 %v2304_v30, %v6006_v20  ;;  %v1296_v26 = vmul.f32 %v3431_v8, %v4767_v56  ;;  %v1378_v17 = vmul.f32 %v3470_v35, %v1162_v29  ;;  %v1412_v13 = vadd.f32 %v6007_v43, %v1298_v54  ;;  %v1837_v8 = vpop.f32.mrf.mxu1 }
 0x1ab   : > { %v4939_v50 = vadd.f32 %v4826_v9, %v2174_v42  ;;  %v6008_v34 = vrot.slane %v4684_v39, 1  ;;  %v2225_v16 = vmul.f32 %v5850_v25, %v4817_v57  ;;  %v1485_v63 = vadd.f32 %v3484_v49, %v1441_v2 }
 0x1ac   : > { %v2868_v56 = vmul.f32 -1.442695, %v1483_v12  ;;  %v2175_v35 = vmul.f32 %v2143_v28, %v5861_v45  ;;  %v1455_v54 = vadd.f32 %v3484_v49, %v1411_v52  ;;  %v4953_v9 = vadd.f32 %v1833_v1, %v5817_v37  ;;  %v1839_v21 = vpop.f32.mrf.mxu1 }
 0x1ad   : > { %v2037_v41 = vsel %vm1058_vm11, %v6008_v34, %v2019_v55  ;;  %v1328_v6 = vadd.f32 %v1296_v26, %v1246_v7  ;;  %v1484_v39 = vadd.f32 %v3493_v61, %v1440_v22  ;;  %v1916_v30 = vrot.slane %v1830_v48, 7 }
 0x1ae   : > { %v1836_v23 = vadd.f32 %v1835_v0, %v5836_v5  ;;  %v4958_v53 = vmul.f32 %v5877_v47, %v2037_v41  ;;  %v1410_v42 = vmul.f32 %v1378_v17, %v4875_v38  ;;  %v1456_v2 = vadd.f32 %v3493_v61, %v1412_v13 }
 0x1af   : > { %v1917_v29 = vrot.slane %v4953_v9, 7  ;;  %v2870_v12 = vmul.f32 -1.442695, %v1485_v63  ;;  %v2020_v49 = vrot.slane %v1830_v48, 1  ;;  %v4964_v1 = vadd.f32 %v1837_v8, %v5817_v37 }
 0x1b0   : > { %6009 = vst [vmem:[#allocation50_spill] sm:$0xff] %v4958_v53  ;;  %v1918_v28 = vrot.slane %v1836_v23, 7  ;;  %3045 = vpow2.f32 %v2868_v56  ;;  %v4966_v52 = vadd.f32 %v2225_v16, %v2175_v35  ;;  %v2840_v0 = vmul.f32 -1.442695, %v1455_v54 }
 0x1b1   : > { %v4969_v10 = vadd.f32 %v1839_v21, %v5836_v5  ;;  %v1610_v7 = vadd.f32 1.0, %v3042_v24  ;;  %v2869_v22 = vmul.f32 -1.442695, %v1484_v39  ;;  %v6012_v26 = vrot.slane %v4761_v60, 7  ;;  %v1843_v39 = vpop.f32.mrf.mxu1 }
 0x1b2   : > { %6010 = vst [vmem:[#allocation7_spill] sm:$0xff] %v4966_v52  ;;  %v2226_v43 = vmul.f32 %v5855_v33, %v1830_v48  ;;  %v1442_v13 = vadd.f32 %v1410_v42, %v1328_v6  ;;  %v2841_v34 = vmul.f32 -1.442695, %v1456_v2  ;;  %v6013_v41 = vrot.slane %v4817_v57, 7 }
 0x1b3   : > { %6011 = vst [vmem:[#allocation6_spill] sm:$0xff] %v4969_v10  ;;  %v1934_v17 = vsel %vm921_vm10, %v6012_v26, %v1916_v30  ;;  %v1919_v63 = vrot.slane %v4964_v1, 7  ;;  %3047 = vpow2.f32 %v2870_v12  ;;  %v6014_v24 = vrot.slane %v4761_v60, 1 }
 0x1b4   : > { %v1931_v16 = vsel %vm921_vm10, %v6013_v41, %v1917_v29  ;;  %v1932_v56 = vsel %vm921_vm10, %v1916_v30, %v1918_v28  ;;  %v2022_v35 = vrot.slane %v1836_v23, 1  ;;  %3049 = vpow2.f32 %v2840_v0  ;;  %v4995_v12 = vpop.eup %3043 }
 0x1b5   : > { %v2038_v8 = vsel %vm1058_vm11, %v6014_v24, %v2020_v49  ;;  %v2144_v48 = vmul.f32 %v5872_v15, %v1934_v17  ;;  %v2021_v54 = vrot.slane %v4953_v9, 1  ;;  %v5743_v6 = vrot.slane %v4969_v10, 7  ;;  %6015 = vst [vmem:[#allocation20_spill] sm:$0xff] %v4995_v12  ;;  %v1845_v24 = vpop.f32.mrf.mxu1  ;;  %v6049_v12 = vld [vmem:[#allocation10_spill] sm:$0xff] }
 0x1b6   : > { %3051 = vpow2.f32 %v2869_v22  ;;  %v2145_v42 = vmul.f32 %v5854_v27, %v1931_v16  ;;  %v5746_v60 = vrot.slane %v4969_v10, 1  ;;  %v4993_v2 = vadd.f32 %v1843_v39, %v5817_v37 }
 0x1b7   : > { %v1486_v30 = vadd.f32 %v3493_v61, %v1442_v13  ;;  %3053 = vpow2.f32 %v2841_v34  ;;  %v2146_v21 = vmul.f32 %v5872_v15, %v1932_v56  ;;  %v1929_v0 = vsel %vm921_vm10, %v1917_v29, %v1919_v63 }
 0x1b8   : > { %3055 = vrcp.f32 %v1610_v7  ;;  %v2306_v22 = vmul.f32 %v5880_v59, %v2038_v8  ;;  %v2036_v26 = vsel %vm1058_vm11, %v2020_v49, %v2022_v35  ;;  %v5745_v17 = vrot.slane %v4993_v2, 7 }
 0x1b9   : > { %v2176_v41 = vmul.f32 %v2144_v48, %v5861_v45  ;;  %v2035_v61 = vsel %vm1058_vm11, %v2019_v55, %v2021_v54  ;;  %v2227_v13 = vmul.f32 %v5850_v25, %v4953_v9  ;;  %v1930_v29 = vsel %vm921_vm10, %v1918_v28, %v5743_v6 }
 0x1ba   : > { %v2177_v7 = vmul.f32 %v2145_v42, %v5893_v36  ;;  %v2023_v49 = vrot.slane %v4964_v1, 1  ;;  %v2147_v34 = vmul.f32 %v5854_v27, %v1929_v0  ;;  %v2034_v45 = vsel %vm1058_vm11, %v2022_v35, %v5746_v60 }
 0x1bb   : > { %v2871_v57 = vmul.f32 -1.442695, %v1486_v30  ;;  %v2178_v55 = vmul.f32 %v2146_v21, %v5893_v36  ;;  %v2228_v9 = vmul.f32 %v5855_v33, %v1836_v23  ;;  %v2308_v16 = vmul.f32 %v5880_v59, %v2036_v26  ;;  %v6017_v36 = vld [vmem:[#allocation38_spill] sm:$0xff]  ;;  %v6021_v26 = vld [vmem:[#allocation40_spill] sm:$0xff] }
 0x1bc   : > { %v2148_v28 = vmul.f32 %v5872_v15, %v1930_v29  ;;  %v1927_v8 = vsel %vm921_vm10, %v1919_v63, %v5745_v17  ;;  %v5744_v56 = vrot.slane %v4993_v2, 1  ;;  %v5033_v48 = vadd.f32 %v1845_v24, %v5836_v5  ;;  %v6026_v24 = vld [vmem:[#allocation33_spill] sm:$0xff] }
 0x1bd   : > { %v5035_v35 = vadd.f32 %v2226_v43, %v2176_v41  ;;  %v5038_v39 = vmul.f32 %v2306_v22, %v6017_v36  ;;  %v5041_v23 = vmul.f32 %v5877_v47, %v2035_v61  ;;  %v2310_v42 = vmul.f32 %v5880_v59, %v2034_v45  ;;  %v5044_v30 = vpop.eup %3045  ;;  %v6055_v36 = vld [vmem:[#allocation22_spill] sm:$0xff] }
 0x1be   : > { %6016 = vst [vmem:[#allocation25_spill] sm:$0xff] %v5033_v48  ;;  %6019 = vst [vmem:[#allocation58_spill] sm:$0xff] %v5044_v30  ;;  %v5046_v21 = vadd.f32 %v2227_v13, %v2177_v7  ;;  %v2033_v63 = vsel %vm1058_vm11, %v2021_v54, %v2023_v49  ;;  %v2179_v0 = vmul.f32 %v2147_v34, %v5916_v58  ;;  %3057 = vpow2.f32 %v2871_v57  ;;  %v1847_v7 = vpop.f32.mrf.mxu1 }
 0x1bf   : > { %6018 = vst [vmem:[#allocation45_spill] sm:$0xff] %v5041_v23  ;;  %v2229_v43 = vmul.f32 %v5850_v25, %v4964_v1  ;;  %v5053_v22 = vadd.f32 %v2228_v9, %v2178_v55  ;;  %v5056_v41 = vmul.f32 %v2308_v16, %v6021_v26  ;;  %v2149_v61 = vmul.f32 %v5854_v27, %v1927_v8  ;;  %v6024_v55 = vld [vmem:[#allocation23_spill] sm:$0xff]  ;;  %v6027_v8 = vld [vmem:[#allocation53_spill] sm:$0xff]  ;;  %v6050_v23 = vld [vmem:[#allocation12_spill] sm:$0xff] }
 0x1c0   : > { %6020 = vst [vmem:[#allocation51_spill] sm:$0xff] %v5046_v21  ;;  %v2180_v29 = vmul.f32 %v2148_v28, %v5916_v58  ;;  %v2230_v13 = vmul.f32 %v5855_v33, %v4969_v10  ;;  %v2031_v54 = vsel %vm1058_vm11, %v2023_v49, %v5744_v56  ;;  %v5749_v1 = vrot.slane %v5033_v48, 1  ;;  %v3048_v34 = vpop.eup %3047 }
 0x1c1   : > { %v5068_v45 = vmul.f32 %v5877_v47, %v2033_v63  ;;  %v5071_v57 = vmul.f32 %v2310_v42, %v5922_v3  ;;  %v5075_v58 = vmul.f32 %v5850_v25, %v4993_v2  ;;  %v5079_v9 = vadd.f32 %v6024_v55, %v5817_v37  ;;  %v3050_v16 = vpop.eup %3049  ;;  %v6028_v42 = vld [vmem:[#allocation56_spill] sm:$0xff] }
 0x1c2   : > { %v5081_v49 = vadd.f32 %v2229_v43, %v2179_v0  ;;  %v5085_v28 = vadd.f32 %v6026_v24, %v5836_v5  ;;  %v1778_v63 = vadd.f32 %v6027_v8, %v5817_v37  ;;  %v5091_v6 = vadd.f32 %v6028_v42, %v5836_v5 }
 0x1c3   : > { %6022 = vst [vmem:[#allocation31_spill] sm:$0xff] %v5068_v45  ;;  %6023 = vst [vmem:[#allocation59_spill] sm:$0xff] %v5075_v58  ;;  %v5093_v56 = vpop.eup %3051  ;;  %v5096_v17 = vmul.f32 %v2149_v61, %v5962_v4  ;;  %v5099_v55 = vmul.f32 %v5877_v47, %v2031_v54  ;;  %v5103_v43 = vadd.f32 %v1847_v7, %v5817_v37  ;;  %v1613_v60 = vadd.f32 1.0, %v3048_v34 }
 0x1c4   : > { %6025 = vst [vmem:[#allocation23_spill] sm:$0xff] %v5081_v49  ;;  %6029 = vst [vmem:[#allocation33_spill] sm:$0xff] %v5093_v56  ;;  %v3054_v24 = vpop.eup %3053  ;;  %v5105_v8 = vadd.f32 %v2230_v13, %v2180_v29  ;;  %v6032_v42 = vrot.slane %v4969_v10, 1  ;;  %v1895_v4 = vrot.slane %v1778_v63, 7  ;;  %v1583_v54 = vadd.f32 1.0, %v3050_v16  ;;  %v6034_v10 = vld [vmem:[#allocation61_spill] sm:$0xff] }
 0x1c5   : > { %6030 = vst [vmem:[#allocation53_spill] sm:$0xff] %v5096_v17  ;;  %6031 = vst [vmem:[#allocation56_spill] sm:$0xff] %v5099_v55  ;;  %v5113_v56 = vpop.eup %3055  ;;  %v1896_v49 = vrot.slane %v5091_v6, 7  ;;  %v5120_v29 = vmul.f32 %v5850_v25, %v5079_v9  ;;  %v5752_v13 = vrot.slane %v5085_v28, 7  ;;  %v1999_v34 = vrot.slane %v1778_v63, 1  ;;  %v1849_v55 = vpop.f32.mrf.mxu1 }
 0x1c6   : > { %v2032_v61 = vsel %vm1058_vm11, %v6032_v42, %v5749_v1  ;;  %6033 = vst [vmem:[#allocation96_spill] sm:$0xff] %v5113_v56  ;;  %v5125_v42 = vadd.f32 %v6034_v10, %v5817_v37  ;;  %v1584_v1 = vadd.f32 1.0, %v3054_v24  ;;  %v5756_v0 = vrot.slane %v5103_v43, 7  ;;  %v6036_v10 = vld [vmem:[#allocation64_spill] sm:$0xff] }
 0x1c7   : > { %v2312_v16 = vmul.f32 %v5880_v59, %v2032_v61  ;;  %v6035_v7 = vrot.slane %v5079_v9, 7  ;;  %3059 = vrcp.f32 %v1613_v60  ;;  %v1954_v48 = vsel %vm921_vm10, %v5752_v13, %v1896_v49 }
 0x1c8   : > { %v2000_v58 = vrot.slane %v5091_v6, 1  ;;  %v5140_v24 = vadd.f32 %v6036_v10, %v5836_v5  ;;  %3061 = vrcp.f32 %v1583_v54  ;;  %v6037_v61 = vrot.slane %v4993_v2, 7 }
 0x1c9   : > { %v1953_v21 = vsel %vm921_vm10, %v6035_v7, %v1895_v4  ;;  %v5757_v60 = vrot.slane %v5103_v43, 1  ;;  %v6038_v13 = vrot.slane %v5079_v9, 1  ;;  %v1897_v54 = vrot.slane %v5125_v42, 7 }
 0x1ca   : > { %v1925_v7 = vsel %vm921_vm10, %v6037_v61, %v5756_v0  ;;  %v2123_v10 = vmul.f32 %v5854_v27, %v1953_v21  ;;  %3063 = vrcp.f32 %v1584_v1  ;;  %v5158_v38 = vmul.f32 %v2312_v16, %v3997_v62  ;;  %v6046_v62 = vld [vmem:[#allocation9_spill] sm:$0xff] }
 0x1cb   : > { %v2057_v45 = vsel %vm1058_vm11, %v6038_v13, %v1999_v34  ;;  %v6040_v61 = vrot.slane %v4993_v2, 1  ;;  %v2124_v13 = vmul.f32 %v5872_v15, %v1954_v48  ;;  %v5169_v17 = vpop.eup %3057  ;;  %v5172_v21 = vadd.f32 %v1849_v55, %v5836_v5 }
 0x1cc   : > { %6039 = vst [vmem:[#allocation61_spill] sm:$0xff] %v5158_v38  ;;  %6042 = vst [vmem:[#allocation97_spill] sm:$0xff] %v5169_v17  ;;  %v6043_v1 = vrot.slane %v5085_v28, 1  ;;  %v1951_v3 = vsel %vm921_vm10, %v1895_v4, %v1897_v54  ;;  %v1898_v2 = vrot.slane %v5140_v24, 7  ;;  %v2285_v48 = vmul.f32 %v5877_v47, %v2057_v45  ;;  %v6047_v4 = vld [vmem:[#allocation66_spill] sm:$0xff] }
 0x1cd   : > { %v5166_v0 = vsel %vm1058_vm11, %v6040_v61, %v5757_v60  ;;  %v5182_v61 = vmul.f32 %v5854_v27, %v1925_v7  ;;  %v6045_v60 = vrot.slane %v5125_v42, 1  ;;  %v2002_v17 = vrot.slane %v5140_v24, 1 }
 0x1ce   : > { %6041 = vst [vmem:[#allocation64_spill] sm:$0xff] %v5166_v0  ;;  %v2058_v16 = vsel %vm1058_vm11, %v6043_v1, %v2000_v58  ;;  %v2155_v52 = vmul.f32 %v2123_v10, %v6046_v62  ;;  %v2125_v1 = vmul.f32 %v5854_v27, %v1951_v3  ;;  %v1788_v30 = vadd.f32 %v6047_v4, %v5817_v37 }
 0x1cf   : > { %6044 = vst [vmem:[#allocation98_spill] sm:$0xff] %v5182_v61  ;;  %v2055_v55 = vsel %vm1058_vm11, %v1999_v34, %v6045_v60  ;;  %v1790_v7 = vadd.f32 %v6048_v19, %v5836_v5  ;;  %v5198_v45 = vmul.f32 %v5855_v33, %v5085_v28  ;;  %v2156_v61 = vmul.f32 %v2124_v13, %v6046_v62 }
 0x1d0   : > { %v2286_v34 = vmul.f32 %v5880_v59, %v2058_v16  ;;  %v1952_v60 = vsel %vm921_vm10, %v1896_v49, %v1898_v2  ;;  %v2205_v3 = vmul.f32 %v5850_v25, %v1778_v63  ;;  %v2287_v4 = vmul.f32 %v5877_v47, %v2055_v55 }
 0x1d1   : > { %v1899_v56 = vrot.slane %v1788_v30, 7  ;;  %v5208_v19 = vmul.f32 %v2285_v48, %v6049_v12  ;;  %v2206_v0 = vmul.f32 %v5855_v33, %v5091_v6  ;;  %v2056_v62 = vsel %vm1058_vm11, %v2000_v58, %v2002_v17  ;;  %v6051_v58 = vld [vmem:[#allocation11_spill] sm:$0xff] }
 0x1d2   : > { %v1900_v13 = vrot.slane %v1790_v7, 7  ;;  %v2237_v16 = vadd.f32 %v2205_v3, %v2155_v52  ;;  %v2157_v49 = vmul.f32 %v2125_v1, %v6050_v23  ;;  %v2207_v10 = vmul.f32 %v5850_v25, %v5125_v42 }
 0x1d3   : > { %v2126_v63 = vmul.f32 %v5872_v15, %v1952_v60  ;;  %v2238_v55 = vadd.f32 %v2206_v0, %v2156_v61  ;;  %v5219_v26 = vmul.f32 %v2286_v34, %v6049_v12  ;;  %v2208_v48 = vmul.f32 %v5855_v33, %v5140_v24  ;;  %v6053_v12 = vld [vmem:[#allocation26_spill] sm:$0xff] }
 0x1d4   : > { %v1949_v6 = vsel %vm921_vm10, %v1897_v54, %v1899_v56  ;;  %v2319_v32 = vmul.f32 %v2287_v4, %v6051_v58  ;;  %v2288_v52 = vmul.f32 %v5880_v59, %v2056_v62  ;;  %v2003_v1 = vrot.slane %v1788_v30, 1  ;;  %v5229_v53 = vpop.eup %3059 }
 0x1d5   : > { %v1950_v3 = vsel %vm921_vm10, %v1898_v2, %v1900_v13  ;;  %6052 = vst [vmem:[#allocation9_spill] sm:$0xff] %v5229_v53  ;;  %v2209_v0 = vmul.f32 %v5850_v25, %v1788_v30  ;;  %v6054_v61 = vrot.slane %v6053_v12, 7  ;;  %v2004_v34 = vrot.slane %v1790_v7, 1  ;;  %v5237_v60 = vpop.eup %3061 }
 0x1d6   : > { %v2128_v54 = vmul.f32 %v5872_v15, %v1950_v3  ;;  %v5239_v4 = vadd.f32 %v2207_v10, %v2157_v49  ;;  %v2158_v62 = vmul.f32 %v2126_v63, %v6050_v23  ;;  %v6056_v2 = vrot.slane %v6055_v36, 7 }
 0x1d7   : > { %v1948_v24 = vsel %vm921_vm10, %v1900_v13, %v6054_v61  ;;  %v2127_v30 = vmul.f32 %v5854_v27, %v1949_v6  ;;  %v6057_v25 = vrot.slane %v6053_v12, 1  ;;  %v2054_v3 = vsel %vm1058_vm11, %v2002_v17, %v2004_v34  ;;  %v6058_v61 = vld [vmem:[#allocation13_spill] sm:$0xff]  ;;  %v5255_v23 = vpop.eup %3063 }
 0x1d8   : > { %v1947_v53 = vsel %vm921_vm10, %v1899_v56, %v6056_v2  ;;  %v2160_v10 = vmul.f32 %v2128_v54, %v6058_v61  ;;  %v2210_v49 = vmul.f32 %v5855_v33, %v1790_v7  ;;  %v2351_v63 = vadd.f32 %v2319_v32, %v2237_v16  ;;  %v2381_v7 = vld [vmem:[%s5635_s6] sm:$0x3]  ;;  %v6060_v32 = vld [vmem:[#allocation71_spill] sm:$0xff] }
 0x1d9   : > { %v2052_v13 = vsel %vm1058_vm11, %v2004_v34, %v6057_v25  ;;  %v2130_v38 = vmul.f32 %v5872_v15, %v1948_v24  ;;  %v2290_v56 = vmul.f32 %v5880_v59, %v2054_v3  ;;  %v2320_v12 = vmul.f32 %v2288_v52, %v6051_v58  ;;  %v6062_v52 = vld [vmem:[#allocation16_spill] sm:$0xff]  ;;  %v6063_v3 = vld [vmem:[#allocation14_spill] sm:$0xff] }
 0x1da   : > { %v2292_v6 = vmul.f32 %v5880_v59, %v2052_v13  ;;  %v6059_v25 = vrot.slane %v6055_v36, 1  ;;  %v2242_v34 = vadd.f32 %v2210_v49, %v2160_v10  ;;  %v5270_v16 = vadd.f32 %v6060_v32, %v5817_v37  ;;  %v6064_v37 = vld [vmem:[#allocation72_spill] sm:$0xff] }
 0x1db   : > { %v2240_v24 = vadd.f32 %v2208_v48, %v2158_v62  ;;  %v6061_v54 = vrot.slane %v5125_v42, 1  ;;  %v2129_v36 = vmul.f32 %v5854_v27, %v1947_v53  ;;  %v2159_v13 = vmul.f32 %v2127_v30, %v6058_v61  ;;  %v6065_v48 = vld [vmem:[#allocation15_spill] sm:$0xff] }
 0x1dc   : > { %v2051_v17 = vsel %vm1058_vm11, %v2003_v1, %v6059_v25  ;;  %v2324_v2 = vmul.f32 %v2292_v6, %v6062_v52  ;;  %v2322_v10 = vmul.f32 %v2290_v56, %v6063_v3  ;;  %v1960_v49 = vrot.slane %v5270_v16, %v5989_v46 }
 0x1dd   : > { %v2053_v58 = vsel %vm1058_vm11, %v6061_v54, %v2003_v1  ;;  %v5284_v25 = vadd.f32 %v6064_v37, %v5836_v5  ;;  %v2162_v42 = vmul.f32 %v2130_v38, %v6065_v48  ;;  %v5288_v1 = vrot.slane %v2381_v7, %v5990_v18 }
 0x1de   : > { %v2356_v62 = vadd.f32 %v2324_v2, %v2242_v34  ;;  %v6066_v53 = vrot.slane %v5079_v9, 7  ;;  %v6067_v6 = vrot.slane %v5103_v43, 7  ;;  %v2289_v61 = vmul.f32 %v5877_v47, %v2053_v58 }
 0x1df   : > { %v2291_v56 = vmul.f32 %v5877_v47, %v2051_v17  ;;  %v1964_v38 = vrot.slane %v5284_v25, %v5989_v46  ;;  %v2161_v34 = vmul.f32 %v2129_v36, %v6065_v48  ;;  %v6068_v2 = vrot.slane %v5085_v28, 7  ;;  %v6070_v48 = vld [vmem:[#allocation30_spill] sm:$0xff] }
 0x1e0   : > { %v1955_v30 = vsel %vm921_vm10, %v6067_v6, %v6066_v53  ;;  %v2400_v32 = vadd.f32 %v5288_v1, %v2356_v62  ;;  %v6069_v37 = vrot.slane %v5172_v21, 7  ;;  %v5312_v17 = vrot.slane %v2381_v7, %v5989_v46  ;;  %v6072_v46 = vld [vmem:[#allocation35_spill] sm:$0xff] }
 0x1e1   : > { %v1965_v5 = vsel %vm615_vm8, %v1960_v49, %v1955_v30  ;;  %v2352_v53 = vadd.f32 %v2320_v12, %v2238_v55  ;;  %v2354_v6 = vadd.f32 %v2322_v10, %v2240_v24  ;;  %v2241_v36 = vadd.f32 %v2209_v0, %v2159_v13  ;;  %v6073_v12 = vld [vmem:[#allocation54_spill] sm:$0xff]  ;;  %v6074_v10 = vld [vmem:[#allocation65_spill] sm:$0xff] }
 0x1e2   : > { %v2121_v54 = vmul.f32 %v5854_v27, %v1965_v5  ;;  %v1956_v58 = vsel %vm921_vm10, %v6069_v37, %v6068_v2  ;;  %v2244_v62 = vadd.f32 %v6070_v48, %v2162_v42  ;;  %v2395_v5 = vadd.f32 %v5312_v17, %v2351_v63  ;;  %v6071_v2 = vld [vmem:[#allocation37_spill] sm:$0xff] }
 0x1e3   : > { %v1966_v49 = vsel %vm615_vm8, %v1964_v38, %v1956_v58  ;;  %v2398_v33 = vadd.f32 %v5288_v1, %v2354_v6  ;;  %v5322_v37 = vmul.f32 %v6071_v2, %v2400_v32  ;;  %v1587_v7 = vadd.f32 1.0, %v6072_v46  ;;  %v6077_v6 = vld [vmem:[#allocation74_spill] sm:$0xff]  ;;  %v6078_v48 = vld [vmem:[#allocation77_spill] sm:$0xff] }
 0x1e4   : > { %v2153_v27 = vmul.f32 %v2121_v54, %v4872_v31  ;;  %v2122_v30 = vmul.f32 %v5872_v15, %v1966_v49  ;;  %v2323_v38 = vmul.f32 %v2291_v56, %v6062_v52  ;;  %v1589_v24 = vadd.f32 1.0, %v6073_v12  ;;  %v6075_v52 = vld [vmem:[#allocation57_spill] sm:$0xff] }
 0x1e5   : > { %v2396_v13 = vadd.f32 %v5288_v1, %v2352_v53  ;;  %v2430_v42 = vmul.f32 %v6074_v10, %v2398_v33  ;;  %3065 = vrcp.f32 %v1587_v7  ;;  %v2321_v63 = vmul.f32 %v2289_v61, %v6063_v3  ;;  %v6079_v3 = vld [vmem:[#allocation62_spill] sm:$0xff] }
 0x1e6   : > { %v2235_v55 = vadd.f32 %v5120_v29, %v2153_v27  ;;  %v2154_v0 = vmul.f32 %v2122_v30, %v4872_v31  ;;  %v2355_v54 = vadd.f32 %v2323_v38, %v2241_v36  ;;  %3067 = vrcp.f32 %v1589_v24  ;;  %v6076_v31 = vld [vmem:[#allocation73_spill] sm:$0xff]  ;;  %v6080_v36 = vld [vmem:[#allocation67_spill] sm:$0xff]  ;;  %v6081_v30 = vld [vmem:[#allocation60_spill] sm:$0xff] }
 0x1e7   : > { %v2427_v56 = vmul.f32 %v6075_v52, %v2395_v5  ;;  %v2460_v29 = vpack.c.bf16 %v5322_v37, %v2430_v42  ;;  %v2358_v49 = vadd.f32 %v6076_v31, %v2244_v62  ;;  %v2360_v53 = vadd.f32 %v6078_v48, %v6077_v6  ;;  %v6083_v38 = vld [vmem:[#allocation70_spill] sm:$0xff]  ;;  %v6091_v6 = vld [vmem:[#allocation87_spill] sm:$0xff] }
 0x1e8   : > { %v2349_v32 = vadd.f32 %v5208_v19, %v2235_v55  ;;  %v2236_v58 = vadd.f32 %v5198_v45, %v2154_v0  ;;  %v1591_v61 = vadd.f32 1.0, %v6079_v3  ;;  %v1593_v19 = vadd.f32 1.0, %v6080_v36  ;;  %v6084_v0 = vld [vmem:[#allocation43_spill] sm:$0xff]  ;;  %v6085_v24 = vld [vmem:[#allocation18_spill] sm:$0xff] }
 0x1e9   : > { %v2428_v45 = vmul.f32 %v6081_v30, %v2396_v13  ;;  %v2353_v2 = vadd.f32 %v2321_v63, %v5239_v4  ;;  %v2402_v5 = vadd.f32 %v5288_v1, %v2358_v49  ;;  %v2404_v37 = vadd.f32 %v5288_v1, %v2360_v53  ;;  %v6086_v4 = vld [vmem:[#allocation75_spill] sm:$0xff]  ;;  %v6087_v63 = vld [vmem:[#allocation17_spill] sm:$0xff]  ;;  %v6090_v49 = vld [vmem:[#allocation82_spill] sm:$0xff] }
 0x1ea   : > { %v2350_v33 = vadd.f32 %v5219_v26, %v2236_v58  ;;  %v2393_v27 = vadd.f32 %v5312_v17, %v2349_v32  ;;  %3069 = vrcp.f32 %v1591_v61  ;;  %v6082_v26 = vld [vmem:[#allocation63_spill] sm:$0xff]  ;;  %v2327_v13 = vmul.f32 %v6086_v4, %v6085_v24  ;;  %v6088_v32 = vld [vmem:[#allocation32_spill] sm:$0xff]  ;;  %v6092_v53 = vld [vmem:[#allocation69_spill] sm:$0xff] }
 0x1eb   : > { %v2243_v7 = vadd.f32 %v6082_v26, %v2161_v34  ;;  %v5351_v55 = vmul.f32 %v6083_v38, %v2402_v5  ;;  %v5354_v12 = vmul.f32 %v6084_v0, %v2404_v37  ;;  %3071 = vrcp.f32 %v1593_v19  ;;  %v6094_v19 = vld [vmem:[#allocation34_spill] sm:$0xff]  ;;  %v6095_v30 = vld [vmem:[#allocation44_spill] sm:$0xff]  ;;  %v6096_v37 = vld [vmem:[#allocation19_spill] sm:$0xff] }
 0x1ec   : > { %v2394_v62 = vadd.f32 %v5288_v1, %v2350_v33  ;;  %v2425_v46 = vmul.f32 %v5237_v60, %v2393_v27  ;;  %v2325_v58 = vmul.f32 %v6088_v32, %v6087_v63  ;;  %v6089_v60 = vld [vmem:[#allocation81_spill] sm:$0xff]  ;;  %v2399_v34 = vadd.f32 %v5312_v17, %v2355_v54  ;;  %v6099_v26 = vld [vmem:[#allocation48_spill] sm:$0xff]  ;;  %v6103_v24 = vld [vmem:[#allocation90_spill] sm:$0xff] }
 0x1ed   : > { %v2362_v52 = vadd.f32 %v6089_v60, %v4538_v11  ;;  %v2462_v31 = vpack.c.bf16 %v5354_v12, %v5351_v55  ;;  %v2364_v48 = vadd.f32 %v6091_v6, %v6090_v49  ;;  %v1595_v33 = vadd.f32 1.0, %v6092_v53  ;;  %v6100_v38 = vld [vmem:[#allocation41_spill] sm:$0xff]  ;;  %v6102_v0 = vld [vmem:[#allocation84_spill] sm:$0xff]  ;;  %v6107_v49 = vld [vmem:[#allocation78_spill] sm:$0xff] }
 0x1ee   : > { %v2426_v10 = vmul.f32 %v5255_v23, %v2394_v62  ;;  %v2457_v42 = vpack.c.bf16 %v2427_v56, %v2425_v46  ;;  %v2357_v3 = vadd.f32 %v2325_v58, %v2243_v7  ;;  %v6093_v56 = vld [vmem:[#allocation36_spill] sm:$0xff]  ;;  %v2397_v36 = vadd.f32 %v5312_v17, %v2353_v2  ;;  %v6101_v55 = vld [vmem:[#allocation21_spill] sm:$0xff] }
 0x1ef   : > { %v2406_v23 = vadd.f32 %v5288_v1, %v2362_v52  ;;  %v1597_v61 = vadd.f32 1.0, %v6093_v56  ;;  %v2359_v11 = vadd.f32 %v2327_v13, %v6094_v19  ;;  %v2408_v54 = vadd.f32 %v5288_v1, %v2364_v48  ;;  %v6098_v46 = vld [vmem:[#allocation88_spill] sm:$0xff]  ;;  %v6104_v13 = vld [vmem:[#allocation39_spill] sm:$0xff] }
 0x1f0   : > { %v2458_v27 = vpack.c.bf16 %v2428_v45, %v2426_v10  ;;  %3073 = vrcp.f32 %v1595_v33  ;;  %v6097_v45 = vld [vmem:[#allocation79_spill] sm:$0xff]  ;;  %v2366_v7 = vadd.f32 %v6099_v26, %v6098_v46  ;;  %v2331_v12 = vmul.f32 %v6102_v0, %v6101_v55  ;;  %v6108_v56 = vld [vmem:[#allocation76_spill] sm:$0xff] }
 0x1f1   : > { %v5376_v5 = vmul.f32 %v6095_v30, %v2406_v23  ;;  %3075 = vrcp.f32 %v1597_v61  ;;  %v2329_v62 = vmul.f32 %v6097_v45, %v6096_v37  ;;  %v5383_v2 = vmul.f32 %v6100_v38, %v2408_v54  ;;  %v6111_v54 = vld [vmem:[#allocation89_spill] sm:$0xff]  ;;  %v6113_v26 = vld [vmem:[#allocation24_spill] sm:$0xff] }
 0x1f2   : > { %2902 = vmatprep.mubr.msk.bf16.mxu1 %vm707_vm0, %v2458_v27  ;;  %v2368_v4 = vadd.f32 %v4932_v40, %v6103_v24  ;;  %v1599_v10 = vadd.f32 1.0, %v6104_v13  ;;  %v3066_v63 = vpop.eup %3065  ;;  %v6105_v32 = vrot.slane %v5079_v9, 1  ;;  %v6106_v58 = vrot.slane %v5103_v43, 1  ;;  %v6115_v55 = vld [vmem:[#allocation92_spill] sm:$0xff] }
 0x1f3   : > { %2633 = vmatmul.mubr.bf16.vlgmr.msra.gmra.mxu1 %v2457_v42  ;;  %v2064_v42 = vrot.slane %v5270_v16, %v5990_v18  ;;  %v2401_v52 = vadd.f32 %v5312_v17, %v2357_v3  ;;  %v1601_v6 = vadd.f32 1.0, %v6107_v49  ;;  %v3068_v40 = vpop.eup %3067  ;;  %v2403_v48 = vadd.f32 %v5312_v17, %v2359_v11  ;;  %v6110_v3 = vld [vmem:[#allocation83_spill] sm:$0xff] }
 0x1f4   : > { %v2059_v60 = vsel %vm1058_vm11, %v6106_v58, %v6105_v32  ;;  %2903 = vmatprep.mubr.msk.bf16.mxu1 %vm707_vm0, %v2460_v29  ;;  %v2464_v9 = vpack.c.bf16 %v5383_v2, %v5376_v5  ;;  %v2410_v53 = vadd.f32 %v5288_v1, %v2366_v7  ;;  %v2412_v33 = vadd.f32 %v5288_v1, %v2368_v4  ;;  %v6109_v29 = vld [vmem:[#allocation80_spill] sm:$0xff]  ;;  %v6114_v7 = vld [vmem:[#allocation5_spill] sm:$0xff] }
 0x1f5   : > { %v2429_v27 = vmul.f32 %v3066_v63, %v2397_v36  ;;  %v2431_v23 = vmul.f32 %v3068_v40, %v2399_v34  ;;  %v2361_v16 = vadd.f32 %v2329_v62, %v6108_v56  ;;  %3077 = vrcp.f32 %v1599_v10  ;;  %v6112_v34 = vld [vmem:[#allocation85_spill] sm:$0xff]  ;;  %v6122_v56 = vld [vmem:[#allocation38_spill] sm:$0xff] }
 0x1f6   : > { %v2363_v61 = vadd.f32 %v2331_v12, %v6109_v29  ;;  %v5409_v19 = vmul.f32 %v6110_v3, %v2410_v53  ;;  %v5412_v30 = vmul.f32 %v6111_v54, %v2412_v33  ;;  %3079 = vrcp.f32 %v1601_v6  ;;  %v6116_v12 = vld [vmem:[#allocation47_spill] sm:$0xff]  ;;  %v6117_v63 = vld [vmem:[#allocation29_spill] sm:$0xff]  ;;  %v6121_v33 = vld [vmem:[#allocation46_spill] sm:$0xff] }
 0x1f7   : > { %v2459_v11 = vpack.c.bf16 %v2431_v23, %v2429_v27  ;;  %v2370_v37 = vadd.f32 %v5038_v39, %v4939_v50  ;;  %v2372_v36 = vadd.f32 %v5056_v41, %v5035_v35  ;;  %v1603_v45 = vadd.f32 1.0, %v6112_v34  ;;  %v3070_v62 = vpop.eup %3069  ;;  %v6119_v6 = vld [vmem:[#allocation61_spill] sm:$0xff] }
 0x1f8   : > { %v2466_v46 = vpack.c.bf16 %v5412_v30, %v5409_v19  ;;  %v2333_v38 = vmul.f32 %v6114_v7, %v6113_v26  ;;  %v2335_v0 = vmul.f32 %v6115_v55, %v6006_v20  ;;  %v1605_v24 = vadd.f32 1.0, %v6116_v12  ;;  %v3072_v4 = vpop.eup %3071  ;;  %v6124_v29 = vld [vmem:[#allocation49_spill] sm:$0xff]  ;;  %v6128_v26 = vld [vmem:[#allocation64_spill] sm:$0xff] }
 0x1f9   : > { %v2433_v13 = vmul.f32 %v3070_v62, %v2401_v52  ;;  %v2414_v50 = vadd.f32 %v5288_v1, %v2370_v37  ;;  %v2416_v35 = vadd.f32 %v5288_v1, %v2372_v36  ;;  %3081 = vrcp.f32 %v1603_v45  ;;  %v6126_v3 = vld [vmem:[#allocation45_spill] sm:$0xff]  ;;  %v6127_v45 = vld [vmem:[#allocation27_spill] sm:$0xff] }
 0x1fa   : > { %v2099_v39 = vsel %vm646_vm9, %v2064_v42, %v2059_v60  ;;  %v2435_v41 = vmul.f32 %v3072_v4, %v2403_v48  ;;  %v2405_v10 = vadd.f32 %v5312_v17, %v2361_v16  ;;  %3083 = vrcp.f32 %v1605_v24  ;;  %v6118_v60 = vld [vmem:[#allocation86_spill] sm:$0xff]  ;;  %v6120_v48 = vld [vmem:[#allocation91_spill] sm:$0xff]  ;;  %v6131_v24 = vld [vmem:[#allocation93_spill] sm:$0xff] }
 0x1fb   : > { %2641 = vmatmul.mubr.bf16.gmra.mxu1 %v2459_v11  ;;  %v2407_v20 = vadd.f32 %v5312_v17, %v2363_v61  ;;  %v5434_v32 = vmul.f32 %v6117_v63, %v2414_v50  ;;  %v5437_v58 = vmul.f32 %v4891_v51, %v2416_v35  ;;  %v2374_v52 = vadd.f32 %v5071_v57, %v5053_v22  ;;  %v6123_v51 = vld [vmem:[#allocation50_spill] sm:$0xff]  ;;  %v6125_v57 = vld [vmem:[#allocation40_spill] sm:$0xff]  ;;  %v6135_v63 = vld [vmem:[#allocation7_spill] sm:$0xff] }
 0x1fc   : > { %2904 = vmatprep.mubr.msk.bf16.mxu1 %vm707_vm0, %v2462_v31  ;;  %v2461_v49 = vpack.c.bf16 %v2435_v41, %v2433_v13  ;;  %v2365_v42 = vadd.f32 %v2333_v38, %v6118_v60  ;;  %v2376_v40 = vadd.f32 %v6119_v6, %v5105_v8  ;;  %v1607_v53 = vadd.f32 1.0, %v6120_v48  ;;  %v6129_v38 = vld [vmem:[#allocation20_spill] sm:$0xff]  ;;  %v6132_v4 = vld [vmem:[#allocation98_spill] sm:$0xff] }
 0x1fd   : > { %v3074_v31 = vpop.eup %3073  ;;  %v2367_v27 = vadd.f32 %v2335_v0, %v6121_v33  ;;  %v2468_v23 = vpack.c.bf16 %v5437_v58, %v5434_v32  ;;  %v2337_v16 = vmul.f32 %v6123_v51, %v6122_v56  ;;  %v1609_v61 = vadd.f32 1.0, %v6124_v29  ;;  %v6130_v0 = vld [vmem:[#allocation96_spill] sm:$0xff]  ;;  %v6142_v29 = vld [vmem:[#allocation59_spill] sm:$0xff] }
 0x1fe   : > { %v3076_v22 = vpop.eup %3075  ;;  %v2339_v54 = vmul.f32 %v6126_v3, %v6125_v57  ;;  %v2418_v11 = vadd.f32 %v5288_v1, %v2374_v52  ;;  %v2420_v8 = vadd.f32 %v5288_v1, %v2376_v40  ;;  %3085 = vrcp.f32 %v1607_v53  ;;  %v6136_v40 = vld [vmem:[#allocation8_spill] sm:$0xff]  ;;  %v6138_v53 = vld [vmem:[#allocation31_spill] sm:$0xff]  ;;  %v6144_v3 = vld [vmem:[#allocation25_spill] sm:$0xff] }
 0x1ff   : > { %v2315_v37 = vmul.f32 %v5877_v47, %v2099_v39  ;;  %v2437_v36 = vmul.f32 %v3074_v31, %v2405_v10  ;;  %v2439_v34 = vmul.f32 %v3076_v22, %v2407_v20  ;;  %3087 = vrcp.f32 %v1609_v61  ;;  %v6133_v39 = vld [vmem:[#allocation58_spill] sm:$0xff]  ;;  %v6134_v20 = vld [vmem:[#allocation95_spill] sm:$0xff]  ;;  %v6139_v31 = vld [vmem:[#allocation52_spill] sm:$0xff] }
 0x200   : > { %v2233_v62 = vmul.f32 %v6127_v45, %v5103_v43  ;;  %v2313_v7 = vmul.f32 %v5877_v47, %v6128_v26  ;;  %v5461_v55 = vmul.f32 %v6129_v38, %v2418_v11  ;;  %v5464_v12 = vmul.f32 %v6130_v0, %v2420_v8  ;;  %v6140_v33 = vld [vmem:[#allocation56_spill] sm:$0xff]  ;;  %v6146_v45 = vld [vmem:[#allocation51_spill] sm:$0xff]  ;;  %v6148_v0 = vld [vmem:[#allocation94_spill] sm:$0xff] }
 0x201   : > { %v2183_v13 = vmul.f32 %v6132_v4, %v6131_v24  ;;  %v2463_v50 = vpack.c.bf16 %v2439_v34, %v2437_v36  ;;  %v2409_v35 = vadd.f32 %v5312_v17, %v2365_v42  ;;  %v1611_v41 = vadd.f32 1.0, %v6133_v39  ;;  %v6137_v42 = vld [vmem:[#allocation42_spill] sm:$0xff]  ;;  %v6147_v26 = vld [vmem:[#allocation23_spill] sm:$0xff] }
 0x202   : > { %v3078_v10 = vpop.eup %3077  ;;  %v2411_v43 = vadd.f32 %v5312_v17, %v2367_v27  ;;  %v2369_v47 = vadd.f32 %v2337_v16, %v6134_v20  ;;  %v2371_v52 = vadd.f32 %v2339_v54, %v6135_v63  ;;  %v2470_v60 = vpack.c.bf16 %v5464_v12, %v5461_v55  ;;  %v6141_v16 = vld [vmem:[#allocation53_spill] sm:$0xff] }
 0x203   : > { %2649 = vmatmul.mubr.bf16.gmra.mxu1 %v2461_v49  ;;  %v3080_v6 = vpop.eup %3079  ;;  %v2347_v48 = vmul.f32 %v2315_v37, %v6136_v40  ;;  %v2341_v49 = vmul.f32 %v6138_v53, %v6137_v42  ;;  %v2343_v27 = vmul.f32 %v6140_v33, %v6139_v31  ;;  %3089 = vrcp.f32 %v1611_v41  ;;  %v6149_v41 = vld [vmem:[#allocation97_spill] sm:$0xff] }
 0x204   : > { %2905 = vmatprep.mubr.msk.bf16.mxu1 %vm707_vm0, %v2464_v9  ;;  %v2441_v56 = vmul.f32 %v3078_v10, %v2409_v35  ;;  %v2443_v51 = vmul.f32 %v3080_v6, %v2411_v43  ;;  %v2263_v61 = vadd.f32 %v6142_v29, %v6141_v16  ;;  %v2265_v22 = vadd.f32 %v2233_v62, %v2183_v13  ;;  %v3095_v12 = vld [vmem:[%s3258_s19] sm:$0xff] }
 0x205   : > { %v6143_v57 = vrot.slane %v5172_v21, 7  ;;  %v6145_v54 = vrot.slane %v6144_v3, 7  ;;  %v2028_v2 = vrot.slane %v5172_v21, 1  ;;  %v2068_v11 = vrot.slane %v5284_v25, %v5990_v18  ;;  %v6151_v18 = vld [vmem:[#allocation6_spill] sm:$0xff] }
 0x206   : > { %v3082_v9 = vpop.eup %3081  ;;  %v2465_v8 = vpack.c.bf16 %v2443_v51, %v2441_v56  ;;  %v2413_v37 = vadd.f32 %v5312_v17, %v2369_v47  ;;  %v2415_v36 = vadd.f32 %v5312_v17, %v2371_v52  ;;  %v2373_v62 = vadd.f32 %v2341_v49, %v6146_v45  ;;  %v6154_v52 = vld [vmem:[#allocation33_spill] sm:$0xff] }
 0x207   : > { %v1926_v5 = vsel %vm921_vm10, %v6145_v54, %v6143_v57  ;;  %v3084_v34 = vpop.eup %3083  ;;  %v2375_v38 = vadd.f32 %v2343_v27, %v6147_v26  ;;  %v2345_v4 = vmul.f32 %v2313_v7, %v6148_v0  ;;  %v2379_v13 = vadd.f32 %v2347_v48, %v2265_v22 }
 0x208   : > { %v2445_v35 = vmul.f32 %v3082_v9, %v2413_v37  ;;  %v2447_v39 = vmul.f32 %v3084_v34, %v2415_v36  ;;  %v1614_v10 = vadd.f32 1.0, %v6149_v41  ;;  %v6150_v43 = vmov %v6145_v54  ;;  %v6158_v9 = vld [vmem:[#allocation55_spill] sm:$0xff] }
 0x209   : > { %v6152_v25 = vrot.slane %v6151_v18, 7  ;;  %v6153_v47 = vrot.slane %v5085_v28, 1  ;;  %v1612_v6 = vadd.f32 1.0, %v6154_v52  ;;  %v2152_v7 = vmul.f32 %v5872_v15, %v1926_v5 }
 0x20a   : > { %v2467_v42 = vpack.c.bf16 %v2447_v39, %v2445_v35  ;;  %v2417_v28 = vadd.f32 %v5312_v17, %v2373_v62  ;;  %v2419_v49 = vadd.f32 %v5312_v17, %v2375_v38  ;;  %v2377_v31 = vadd.f32 %v2345_v4, %v2263_v61  ;;  %v5553_v62 = vld [vmem:[%s5641_s12] ss:$0 sm:$0xff] }
 0x20b   : > { %v1928_v20 = vsel %vm921_vm10, %v6152_v25, %v6150_v43  ;;  %v2060_v63 = vsel %vm1058_vm11, %v2028_v2, %v6153_v47  ;;  %2657 = vmatmul.mubr.bf16.gmra.mxu1 %v2463_v50  ;;  %v3086_v53 = vpop.eup %3085  ;;  %v2423_v33 = vadd.f32 %v5312_v17, %v2379_v13  ;;  %3091 = vrcp.f32 %v1614_v10  ;;  %v3096_v13 = vld [vmem:[%s3258_s19 + $0x8] sm:$0xff]  ;;  %v3097_v43 = vld [vmem:[%s3258_s19 + $0x10] sm:$0xff] }
 0x20c   : > { %v2100_v48 = vsel %vm646_vm9, %v2068_v11, %v2060_v63  ;;  %2906 = vmatprep.mubr.msk.bf16.mxu1 %vm707_vm0, %v2466_v46  ;;  %v3088_v27 = vpop.eup %3087  ;;  %v2150_v56 = vmul.f32 %v5872_v15, %v1928_v20  ;;  %v2449_v50 = vmul.f32 %v3086_v53, %v2417_v28  ;;  %3093 = vrcp.f32 %v1612_v6  ;;  %v6156_v46 = vld [vmem:[#allocation28_spill] sm:$0xff]  ;;  %v6157_v15 = vld [vmem:[#allocation9_spill] sm:$0xff] }
 0x20d   : > { %v2316_v14 = vmul.f32 %v5880_v59, %v2100_v48  ;;  %v2451_v51 = vmul.f32 %v3088_v27, %v2419_v49  ;;  %v6155_v19 = vrot.slane %v6144_v3, 1  ;;  %v2234_v16 = vmul.f32 %v6156_v46, %v5172_v21  ;;  %v3098_v63 = vld [vmem:[%s3258_s19 + $0x18] sm:$0xff] }
 0x20e   : > { %v2184_v29 = vmul.f32 %v2152_v7, %v6131_v24  ;;  %v2421_v22 = vadd.f32 %v5312_v17, %v2377_v31  ;;  %v2455_v57 = vmul.f32 %v6157_v15, %v2423_v33  ;;  %v2232_v5 = vmul.f32 %v6156_v46, %v6144_v3  ;;  %v3100_v33 = vld [vmem:[%s3258_s19 + $0x28] sm:$0xff] }
 0x20f   : > { %v2030_v30 = vsel %vm1058_vm11, %v6155_v19, %v2028_v2  ;;  %v2469_v61 = vpack.c.bf16 %v2451_v51, %v2449_v50  ;;  %v2182_v11 = vmul.f32 %v2150_v56, %v6158_v9  ;;  %v2348_v44 = vmul.f32 %v2316_v14, %v6136_v40  ;;  %v3101_v51 = vld [vmem:[%s3258_s19 + $0x30] sm:$0xff] }
 0x210   : > { %v3090_v54 = vpop.eup %3089  ;;  %v2314_v37 = vmul.f32 %v5880_v59, %v2030_v30  ;;  %v2266_v21 = vadd.f32 %v2234_v16, %v2184_v29  ;;  %v3102_v29 = vld [vmem:[%s3258_s19 + $0x38] sm:$0xff] }
 0x211   : > { %v2453_v2 = vmul.f32 %v3090_v54, %v2421_v22  ;;  %v2264_v24 = vadd.f32 %v2232_v5, %v2182_v11  ;;  %v3103_v54 = vld [vmem:[%s3258_s19 + $0x40] sm:$0xff] }
 0x212   : > { %v2346_v36 = vmul.f32 %v2314_v37, %v6148_v0  ;;  %v2380_v34 = vadd.f32 %v2348_v44, %v2266_v21  ;;  %v3104_v44 = vld [vmem:[%s3258_s19 + $0x48] sm:$0xff] }
 0x213   : > { %2665 = vmatmul.mubr.bf16.gmra.mxu1 %v2465_v8  ;;  %v2471_v17 = vpack.c.bf16 %v2455_v57, %v2453_v2 }
 0x214   : > { %2907 = vmatprep.mubr.msk.bf16.mxu1 %vm707_vm0, %v2468_v23  ;;  %v2378_v3 = vadd.f32 %v2346_v36, %v2264_v24  ;;  %v2424_v45 = vadd.f32 %v5288_v1, %v2380_v34  ;;  %v3105_v36 = vld [vmem:[%s3258_s19 + $0x50] sm:$0xff] }
 0x216   : > { %v2422_v32 = vadd.f32 %v5288_v1, %v2378_v3 }
 0x218   : > { %v3092_v59 = vpop.eup %3091 }
 0x219   : > { %v3094_v40 = vpop.eup %3093  ;;  %v2456_v58 = vmul.f32 %v3092_v59, %v2424_v45 }
 0x21a   : > { %v2454_v23 = vmul.f32 %v3094_v40, %v2422_v32  ;;  %v3106_v40 = vld [vmem:[%s3258_s19 + $0x58] sm:$0xff] }
 0x21b   : > { %2673 = vmatmul.mubr.bf16.gmra.mxu1 %v2467_v42  ;;  %v3099_v42 = vld [vmem:[%s3258_s19 + $0x20] sm:$0xff] }
 0x21c   : > { %2908 = vmatprep.mubr.msk.bf16.mxu1 %vm707_vm0, %v2470_v60  ;;  %v2472_v8 = vpack.c.bf16 %v2456_v58, %v2454_v23 }
 0x223   : > { %2681 = vmatmul.mubr.bf16.gmra.mxu1 %v2469_v61 }
 0x224   : > { %2909 = vmatprep.mubr.msk.bf16.mxu1 %vm707_vm0, %v2472_v8 }
 0x22b   : > { %2689 = vmatmul.mubr.bf16.gmra.mxu1 %v2471_v17 }
 0x2b3   : > { %v2634_v26 = vpop.f32.mrf.mxu1 }
 0x2b4   : > { %v2635_v55 = vadd.f32 %v5553_v62, %v2634_v26  ;;  %v3107_v26 = vld [vmem:[%s3258_s19 + $0x60] sm:$0xff] }
 0x2b5   : > { %v2636_v1 = vpop.f32.mrf.mxu1 }
 0x2b6   : > { %v2697_v60 = vadd.f32 %v3095_v12, %v2635_v55 }
 0x2b7   : > { %v2637_v38 = vpop.f32.mrf.mxu1 }
 0x2b8   : > { %2713 = vst.msk [vmem:[%s5561_s28] sm:$0xff] %vm707_vm0, %v2697_v60  ;;  %v2638_v0 = vadd.f32 %v5553_v62, %v2637_v38  ;;  %v3108_v38 = vld [vmem:[%s3258_s19 + $0x68] sm:$0xff] }
 0x2b9   : > { %v2639_v4 = vpop.f32.mrf.mxu1 }
 0x2ba   : > { %v2698_v35 = vadd.f32 %v3096_v13, %v2638_v0 }
 0x2bb   : > { %v2642_v39 = vpop.f32.mrf.mxu1 }
 0x2bc   : > { %2714 = vst.msk [vmem:[%s5561_s28 + $0x8] sm:$0xff] %vm707_vm0, %v2698_v35  ;;  %v2643_v41 = vadd.f32 %v5553_v62, %v2642_v39  ;;  %v3109_v39 = vld [vmem:[%s3258_s19 + $0x70] sm:$0xff] }
 0x2bd   : > { %v2644_v10 = vpop.f32.mrf.mxu1 }
 0x2be   : > { %v2699_v18 = vadd.f32 %v3097_v43, %v2643_v41 }
 0x2bf   : > { %v2645_v25 = vpop.f32.mrf.mxu1 }
 0x2c0   : > { %2715 = vst.msk [vmem:[%s5561_s28 + $0x10] sm:$0xff] %vm707_vm0, %v2699_v18  ;;  %v2646_v20 = vadd.f32 %v5553_v62, %v2645_v25  ;;  %v3110_v25 = vld [vmem:[%s3258_s19 + $0x78] sm:$0xff] }
 0x2c1   : > { %v2647_v47 = vpop.f32.mrf.mxu1 }
 0x2c2   : > { %v2700_v52 = vadd.f32 %v3098_v63, %v2646_v20 }
 0x2c3   : > { %v2650_v6 = vpop.f32.mrf.mxu1 }
 0x2c4   : > { %2716 = vst.msk [vmem:[%s5561_s28 + $0x18] sm:$0xff] %vm707_vm0, %v2700_v52  ;;  %v2651_v7 = vadd.f32 %v5553_v62, %v2650_v6 }
 0x2c5   : > { %v2652_v48 = vpop.f32.mrf.mxu1 }
 0x2c6   : > { %v2701_v53 = vadd.f32 %v3099_v42, %v2651_v7 }
 0x2c7   : > { %v2653_v28 = vpop.f32.mrf.mxu1 }
 0x2c8   : > { %2717 = vst.msk [vmem:[%s5561_s28 + $0x20] sm:$0xff] %vm707_vm0, %v2701_v53  ;;  %v2654_v49 = vadd.f32 %v5553_v62, %v2653_v28 }
 0x2c9   : > { %v2655_v31 = vpop.f32.mrf.mxu1 }
 0x2ca   : > { %v2702_v27 = vadd.f32 %v3100_v33, %v2654_v49 }
 0x2cb   : > { %v2658_v56 = vpop.f32.mrf.mxu1 }
 0x2cc   : > { %2718 = vst.msk [vmem:[%s5561_s28 + $0x28] sm:$0xff] %vm707_vm0, %v2702_v27  ;;  %v2659_v14 = vadd.f32 %v5553_v62, %v2658_v56 }
 0x2cd   : > { %v2660_v50 = vpop.f32.mrf.mxu1 }
 0x2ce   : > { %v2703_v19 = vadd.f32 %v3101_v51, %v2659_v14 }
 0x2cf   : > { %v2661_v30 = vpop.f32.mrf.mxu1 }
 0x2d0   : > { %2719 = vst.msk [vmem:[%s5561_s28 + $0x30] sm:$0xff] %vm707_vm0, %v2703_v19  ;;  %v2662_v46 = vadd.f32 %v5553_v62, %v2661_v30 }
 0x2d1   : > { %v2663_v16 = vpop.f32.mrf.mxu1 }
 0x2d2   : > { %v2704_v61 = vadd.f32 %v3102_v29, %v2662_v46 }
 0x2d3   : > { %v2666_v22 = vpop.f32.mrf.mxu1 }
 0x2d4   : > { %2720 = vst.msk [vmem:[%s5561_s28 + $0x38] sm:$0xff] %vm707_vm0, %v2704_v61  ;;  %v2667_v15 = vadd.f32 %v5553_v62, %v2666_v22 }
 0x2d5   : > { %v2668_v57 = vpop.f32.mrf.mxu1 }
 0x2d6   : > { %v2705_v5 = vadd.f32 %v3103_v54, %v2667_v15 }
 0x2d7   : > { %v2669_v9 = vpop.f32.mrf.mxu1 }
 0x2d8   : > { %2721 = vst.msk [vmem:[%s5561_s28 + $0x40] sm:$0xff] %vm707_vm0, %v2705_v5  ;;  %v2670_v11 = vadd.f32 %v5553_v62, %v2669_v9 }
 0x2d9   : > { %v2671_v37 = vpop.f32.mrf.mxu1 }
 0x2da   : > { %v2706_v2 = vadd.f32 %v3104_v44, %v2670_v11 }
 0x2db   : > { %v2674_v21 = vpop.f32.mrf.mxu1 }
 0x2dc   : > { %2722 = vst.msk [vmem:[%s5561_s28 + $0x48] sm:$0xff] %vm707_vm0, %v2706_v2  ;;  %v2675_v17 = vadd.f32 %v5553_v62, %v2674_v21 }
 0x2dd   : > { %v2676_v24 = vpop.f32.mrf.mxu1 }
 0x2de   : > { %v2707_v34 = vadd.f32 %v3105_v36, %v2675_v17 }
 0x2df   : > { %v2677_v3 = vpop.f32.mrf.mxu1 }
 0x2e0   : > { %2723 = vst.msk [vmem:[%s5561_s28 + $0x50] sm:$0xff] %vm707_vm0, %v2707_v34  ;;  %v2678_v45 = vadd.f32 %v5553_v62, %v2677_v3 }
 0x2e1   : > { %v2679_v59 = vpop.f32.mrf.mxu1 }
 0x2e2   : > { %v2708_v32 = vadd.f32 %v3106_v40, %v2678_v45 }
 0x2e3   : > { %v2682_v58 = vpop.f32.mrf.mxu1 }
 0x2e4   : > { %2724 = vst.msk [vmem:[%s5561_s28 + $0x58] sm:$0xff] %vm707_vm0, %v2708_v32  ;;  %v2683_v23 = vadd.f32 %v5553_v62, %v2682_v58 }
 0x2e5   : > { %v2684_v8 = vpop.f32.mrf.mxu1 }
 0x2e6   : > { %v2709_v55 = vadd.f32 %v3107_v26, %v2683_v23 }
 0x2e7   : > { %v2685_v1 = vpop.f32.mrf.mxu1 }
 0x2e8   : > { %2725 = vst.msk [vmem:[%s5561_s28 + $0x60] sm:$0xff] %vm707_vm0, %v2709_v55  ;;  %v2686_v12 = vadd.f32 %v5553_v62, %v2685_v1 }
 0x2e9   : > { %v2687_v60 = vpop.f32.mrf.mxu1 }
 0x2ea   : > { %v2710_v0 = vadd.f32 %v3108_v38, %v2686_v12 }
 0x2eb   : > { %v2690_v4 = vpop.f32.mrf.mxu1 }
 0x2ec   : > { %2726 = vst.msk [vmem:[%s5561_s28 + $0x68] sm:$0xff] %vm707_vm0, %v2710_v0  ;;  %v2691_v13 = vadd.f32 %v5553_v62, %v2690_v4 }
 0x2ed   : > { %v2692_v35 = vpop.f32.mrf.mxu1 }
 0x2ee   : > { %v2711_v41 = vadd.f32 %v3109_v39, %v2691_v13 }
 0x2ef   : > { %v2693_v10 = vpop.f32.mrf.mxu1 }
 0x2f0   : > { %2727 = vst.msk [vmem:[%s5561_s28 + $0x70] sm:$0xff] %vm707_vm0, %v2711_v41  ;;  %v2694_v43 = vadd.f32 %v5553_v62, %v2693_v10 }
 0x2f1   : > { %v2695_v18 = vpop.f32.mrf.mxu1 }
 0x2f2   : > { %v2712_v20 = vadd.f32 %v3110_v25, %v2694_v43 }
 0x2f4   : > { %2728 = vst.msk [vmem:[%s5561_s28 + $0x78] sm:$0xff] %vm707_vm0, %v2712_v20 }
 0x2f5 PF: > { %s29_s30 = sadd.s32 1, %s3131_s30  }
 0x2f6   : > { %p26_p10 = scmp.ge.s32.totalorder %s29_s30, 5  }
 0x2f8   :  { %28 = sbr.rel (!%p26_p10) target bundleno = 16 (0x10), region = 101 }

</bundles_post_ra>
